<compile_context>
chip_gen: v5e
topology: v5e:2x2
jax: 0.10.0
libtpu: 0.0.40
codegen_flags: <defaults>
</compile_context>

<pallas_src>
import functools

import jax
import jax.numpy as jnp
from jax import lax
from jax.experimental import pallas as pl
from jax.experimental.pallas import tpu as pltpu


# ----------------------------------------------------------------------------
# Shared compiler params
# ----------------------------------------------------------------------------

def _cparams():
    return pltpu.CompilerParams(
        dimension_semantics=("parallel",),
        vmem_limit_bytes=64 * 1024 * 1024)


# ----------------------------------------------------------------------------
# In-kernel math helpers (operate on VMEM-resident jnp values)
# ----------------------------------------------------------------------------

def _shift_down(x, s):
    """y[t] = x[t - s] for t >= s else 0 (no wrap), along axis 0."""
    L = x.shape[0]
    if s <= 0:
        return x
    if s >= L:
        return jnp.zeros_like(x)
    zeros = jnp.zeros((s,) + x.shape[1:], x.dtype)
    return jnp.concatenate([zeros, x[:L - s]], axis=0)


def _shift_up(x, s):
    """y[t] = x[t + s] for t <= L-1-s else 0 (no wrap), along axis 0."""
    L = x.shape[0]
    if s <= 0:
        return x
    if s >= L:
        return jnp.zeros_like(x)
    zeros = jnp.zeros((s,) + x.shape[1:], x.dtype)
    return jnp.concatenate([x[s:], zeros], axis=0)


def _cumsum_time(x):
    """Inclusive prefix sum along axis 0 via log-step shift-add (O(L log L))."""
    L = x.shape[0]
    s = x
    shift = 1
    while shift < L:
        s = s + _shift_down(s, shift)
        shift *= 2
    return s


def _moving_avg_trend(x, kernel_size):
    """Autoformer moving average (replicate padding) via prefix sums: O(L*C)."""
    L, C = x.shape
    pad = (kernel_size - 1) // 2
    hi = kernel_size - 1 - pad
    cs = _cumsum_time(x)
    row = lax.broadcasted_iota(jnp.int32, (L, C), 0)
    rowf = row.astype(jnp.float32)
    cs_last = jnp.broadcast_to(cs[L - 1:L, :], (L, C))
    # upper prefix cs[min(t + hi, L-1)]
    cs_hi = jnp.where(row <= (L - 1 - hi), _shift_up(cs, hi), cs_last)
    # lower prefix cs[t - pad - 1] (0 when the window starts at/below index 0)
    cs_lo = _shift_down(cs, pad + 1)
    # replicated boundary contributions
    front = jnp.maximum(float(pad) - rowf, 0.0)
    back = jnp.maximum(rowf + float(hi) - float(L - 1), 0.0)
    x_first = jnp.broadcast_to(x[0:1, :], (L, C))
    x_last = jnp.broadcast_to(x[L - 1:L, :], (L, C))
    return (cs_hi - cs_lo + front * x_first + back * x_last) / float(kernel_size)


def _rolling_stats(x, window, eps=1e-5):
    """Causal rolling-window mean/std via cumsums of x and x*x: O(L*C)."""
    # TODO(synk): m2 - m*m can lose precision for large-magnitude low-variance
    # windows (clamped at 0); a centered/Welford form would be safer.
    L, C = x.shape
    cs = _cumsum_time(x)
    cs2 = _cumsum_time(x * x)
    rowf = lax.broadcasted_iota(jnp.int32, (L, C), 0).astype(jnp.float32)
    s1 = cs - _shift_down(cs, window)
    s2 = cs2 - _shift_down(cs2, window)
    cnt = jnp.minimum(rowf + 1.0, float(window))
    m = s1 / cnt
    var = jnp.maximum(s2 / cnt - m * m, 0.0)
    return m, jnp.sqrt(var + eps)


def _rin(x, w, b, eps=1e-5):
    """RIN over the time axis (unbiased=False variance) with affine."""
    mean = jnp.mean(x, axis=0, keepdims=True)
    var = jnp.mean((x - mean) ** 2, axis=0, keepdims=True)
    std = jnp.sqrt(var + eps)
    return (x - mean) / std * w + b, mean, std


def _layernorm(x, g, b, eps=1e-5):
    mean = jnp.mean(x, axis=-1, keepdims=True)
    var = jnp.mean((x - mean) ** 2, axis=-1, keepdims=True)
    return (x - mean) * lax.rsqrt(var + eps) * g + b


def _mha(q, k, v, n_heads):
    """Multi-head softmax attention on VMEM tiles; no k.T (dot_general)."""
    D = q.shape[-1]
    dh = D // n_heads
    scale = 1.0 / float(dh) ** 0.5
    dimnums = (((1,), (1,)), ((), ()))
    outs = []
    for h in range(n_heads):
        sl = slice(h * dh, (h + 1) * dh)
        qh, kh, vh = q[:, sl], k[:, sl], v[:, sl]
        s = lax.dot_general(qh, kh, dimnums,
                            preferred_element_type=jnp.float32) * scale
        s = s - jnp.max(s, axis=-1, keepdims=True)
        p = jnp.exp(s)
        p = p / jnp.sum(p, axis=-1, keepdims=True)
        outs.append(jnp.dot(p, vh, preferred_element_type=jnp.float32))
    return jnp.concatenate(outs, axis=-1)


def _token_embed(x, w, pe):
    """Circular conv1d (kernel=3, padding_mode='circular') + positional add."""
    L, C = x.shape
    x_prev = jnp.concatenate([x[L - 1:, :], x[:L - 1, :]], axis=0)   # x[t-1]
    x_next = jnp.concatenate([x[1:, :], x[:1, :]], axis=0)           # x[t+1]
    return (jnp.dot(x_prev, w[:C], preferred_element_type=jnp.float32)
            + jnp.dot(x, w[C:2 * C], preferred_element_type=jnp.float32)
            + jnp.dot(x_next, w[2 * C:], preferred_element_type=jnp.float32)
            + pe)


def _encoder_layer(x, wqkv, bqkv, wo, bo, w1, b1, w2, b2, ln, n_heads):
    """Standard pre-softmax MHA encoder layer, all on VMEM values."""
    # TODO(synk): separate_encoder's step/separate_factor split-attention is
    # undefined in the reference; standard MHA encoder layer used instead.
    D = x.shape[-1]
    qkv = jnp.dot(x, wqkv, preferred_element_type=jnp.float32) + bqkv
    q, k, v = qkv[:, :D], qkv[:, D:2 * D], qkv[:, 2 * D:]
    attn = _mha(q, k, v, n_heads)
    o = jnp.dot(attn, wo, preferred_element_type=jnp.float32) + bo
    x1 = _layernorm(x + o, ln[0:1, :], ln[1:2, :])
    y = jax.nn.gelu(jnp.dot(x1, w1, preferred_element_type=jnp.float32) + b1)
    y = jnp.dot(y, w2, preferred_element_type=jnp.float32) + b2
    return _layernorm(x1 + y, ln[2:3, :], ln[3:4, :])


# ----------------------------------------------------------------------------
# Kernel A: fused encoder-side preprocessing
#   series_decomp + simple_linear(residual) + RIN(trend) + rolling norm
# ----------------------------------------------------------------------------

def _enc_pre_kernel(x_ref, aff_ref, wsim_ref, bsim_ref,
                    feat_ref, lin_ref, pm_ref, ps_ref,
                    *, kernel_size, window):
    x = x_ref[...][0].astype(jnp.float32)                      # (L, C)
    trend = _moving_avg_trend(x, kernel_size)
    res = x - trend
    # simple_linear along the time axis: W (Lout, L) @ res (L, C) + b (Lout, 1)
    lin = (jnp.dot(wsim_ref[...], res, preferred_element_type=jnp.float32)
           + bsim_ref[...])
    lin_ref[...] = lin[None].astype(lin_ref.dtype)
    # RIN on the trend (affine_weight2 / affine_bias2)
    aff = aff_ref[...].astype(jnp.float32)                     # (2, C)
    tn, _, _ = _rin(trend, aff[0:1, :], aff[1:2, :])
    # TODO(synk): distribution_block internals are undefined in the reference;
    # approximated as causal rolling-window normalization with matching I/O.
    m, s = _rolling_stats(tn, window)
    feat_ref[...] = ((tn - m) / s)[None].astype(feat_ref.dtype)
    pm_ref[...] = m[-1:, :][None].astype(pm_ref.dtype)
    ps_ref[...] = s[-1:, :][None].astype(ps_ref.dtype)


def enc_preprocess(x, aw2, ab2, w_simple, b_simple, *, kernel_size, window):
    B, L, C = x.shape
    Lout = w_simple.shape[0]
    aff = jnp.concatenate([aw2.reshape(1, C), ab2.reshape(1, C)],
                          axis=0).astype(jnp.float32)
    wsim = w_simple.astype(jnp.float32)
    bsim = b_simple.reshape(Lout, 1).astype(jnp.float32)
    return pl.pallas_call(
        functools.partial(_enc_pre_kernel, kernel_size=kernel_size,
                          window=window),
        out_shape=(jax.ShapeDtypeStruct((B, L, C), x.dtype),
                   jax.ShapeDtypeStruct((B, Lout, C), x.dtype),
                   jax.ShapeDtypeStruct((B, 1, C), jnp.float32),
                   jax.ShapeDtypeStruct((B, 1, C), jnp.float32)),
        grid=(B,),
        in_specs=[pl.BlockSpec((1, L, C), lambda i: (i, 0, 0)),
                  pl.BlockSpec((2, C), lambda i: (0, 0)),
                  pl.BlockSpec((Lout, L), lambda i: (0, 0)),
                  pl.BlockSpec((Lout, 1), lambda i: (0, 0))],
        out_specs=(pl.BlockSpec((1, L, C), lambda i: (i, 0, 0)),
                   pl.BlockSpec((1, Lout, C), lambda i: (i, 0, 0)),
                   pl.BlockSpec((1, 1, C), lambda i: (i, 0, 0)),
                   pl.BlockSpec((1, 1, C), lambda i: (i, 0, 0))),
        compiler_params=_cparams(),
    )(x, aff, wsim, bsim)


# ----------------------------------------------------------------------------
# Kernel B: fused decoder-side preprocessing
#   build dec input (label part + repeated label mean) + RIN + rolling norm +
#   distribution affine
# ----------------------------------------------------------------------------

def _dec_pre_kernel(x_ref, p_ref, feat_ref, mean_ref, std_ref, lpm_ref, lps_ref,
                    *, label_len, window):
    x = x_ref[...][0].astype(jnp.float32)                      # (Ld, C)
    Ld, C = x.shape
    row = lax.broadcasted_iota(jnp.int32, (Ld, C), 0)
    is_label = row < label_len
    lbl_mean = (jnp.sum(jnp.where(is_label, x, 0.0), axis=0, keepdims=True)
                / float(label_len))
    x2 = jnp.where(is_label, x, jnp.broadcast_to(lbl_mean, (Ld, C)))
    p = p_ref[...].astype(jnp.float32)                         # (4, C)
    aw, ab, dw, db = p[0:1, :], p[1:2, :], p[2:3, :], p[3:4, :]
    x2n, means, stdev = _rin(x2, aw, ab)
    # TODO(synk): distribution_block approximation (see kernel A).
    m, s = _rolling_stats(x2n, window)
    feat_ref[...] = (((x2n - m) / s) * dw + db)[None].astype(feat_ref.dtype)
    mean_ref[...] = means[None].astype(mean_ref.dtype)
    std_ref[...] = stdev[None].astype(std_ref.dtype)
    lpm_ref[...] = m[None].astype(lpm_ref.dtype)
    lps_ref[...] = s[None].astype(lps_ref.dtype)


def dec_preprocess(x_dec, aw, ab, dw, db, *, label_len, pred_len, window):
    B, Lfull, C = x_dec.shape
    Ld = label_len + pred_len
    if Lfull >= Ld:
        x_in = x_dec[:, :Ld, :]
    else:
        x_in = jnp.concatenate(
            [x_dec[:, :label_len, :],
             jnp.zeros((B, Ld - label_len, C), x_dec.dtype)], axis=1)
    prm = jnp.concatenate([aw.reshape(1, C), ab.reshape(1, C),
                           dw.reshape(1, C), db.reshape(1, C)],
                          axis=0).astype(jnp.float32)
    return pl.pallas_call(
        functools.partial(_dec_pre_kernel, label_len=label_len, window=window),
        out_shape=(jax.ShapeDtypeStruct((B, Ld, C), x_dec.dtype),
                   jax.ShapeDtypeStruct((B, 1, C), jnp.float32),
                   jax.ShapeDtypeStruct((B, 1, C), jnp.float32),
                   jax.ShapeDtypeStruct((B, Ld, C), jnp.float32),
                   jax.ShapeDtypeStruct((B, Ld, C), jnp.float32)),
        grid=(B,),
        in_specs=[pl.BlockSpec((1, Ld, C), lambda i: (i, 0, 0)),
                  pl.BlockSpec((4, C), lambda i: (0, 0))],
        out_specs=(pl.BlockSpec((1, Ld, C), lambda i: (i, 0, 0)),
                   pl.BlockSpec((1, 1, C), lambda i: (i, 0, 0)),
                   pl.BlockSpec((1, 1, C), lambda i: (i, 0, 0)),
                   pl.BlockSpec((1, Ld, C), lambda i: (i, 0, 0)),
                   pl.BlockSpec((1, Ld, C), lambda i: (i, 0, 0))),
        compiler_params=_cparams(),
    )(x_in, prm)


# ----------------------------------------------------------------------------
# Kernel C: fused token embedding (circular conv1d + PE) + encoder layer
# ----------------------------------------------------------------------------

def _embed_encode_kernel(x_ref, pe_ref, wconv_ref,
                         wqkv_ref, bqkv_ref, wo_ref, bo_ref,
                         w1_ref, b1_ref, w2_ref, b2_ref, ln_ref,
                         o_ref, *, n_heads):
    x = x_ref[...][0].astype(jnp.float32)                      # (L, C)
    pe = pe_ref[...][0].astype(jnp.float32)                    # (L, D)
    h = _token_embed(x, wconv_ref[...].astype(jnp.float32), pe)
    out = _encoder_layer(h, wqkv_ref[...], bqkv_ref[...], wo_ref[...],
                         bo_ref[...], w1_ref[...], b1_ref[...], w2_ref[...],
                         b2_ref[...], ln_ref[...].astype(jnp.float32), n_heads)
    o_ref[...] = out[None].astype(o_ref.dtype)


def embed_and_encode(x, pe, conv_w, p, n_heads):
    B, L, C = x.shape
    D = conv_w.shape[1]

    def w2d(a):
        return pl.BlockSpec(a.shape, lambda i: (0, 0))

    return pl.pallas_call(
        functools.partial(_embed_encode_kernel, n_heads=n_heads),
        out_shape=jax.ShapeDtypeStruct((B, L, D), jnp.float32),
        grid=(B,),
        in_specs=[pl.BlockSpec((1, L, C), lambda i: (i, 0, 0)),
                  pl.BlockSpec((1, L, D), lambda i: (i, 0, 0)),
                  w2d(conv_w),
                  w2d(p["w_qkv"]), w2d(p["b_qkv"]), w2d(p["wo"]), w2d(p["bo"]),
                  w2d(p["w1"]), w2d(p["b1"]), w2d(p["w2"]), w2d(p["b2"]),
                  w2d(p["ln"])],
        out_specs=pl.BlockSpec((1, L, D), lambda i: (i, 0, 0)),
        compiler_params=_cparams(),
    )(x, pe.astype(jnp.float32), conv_w.astype(jnp.float32),
      p["w_qkv"], p["b_qkv"], p["wo"], p["bo"],
      p["w1"], p["b1"], p["w2"], p["b2"], p["ln"])


# ----------------------------------------------------------------------------
# Kernel D: fused decoder block (cross-attn + FFN(ELU) + LN + c_out projection)
#           + de-normalization epilogue (packed (5, C) parameter slab)
# ----------------------------------------------------------------------------

def _decoder_denorm_kernel(enc_ref, dec_ref, wq_ref, bq_ref, wkv_ref, bkv_ref,
                           wo_ref, bo_ref, w1_ref, b1_ref, w2_ref, b2_ref,
                           ln_ref, wp_ref, bp_ref,
                           lps_ref, lpm_ref, lin_ref, stat_ref, prm_ref,
                           final_ref, raw_ref, *, n_heads):
    # TODO(synk): reference Decoder internals (layer_output_true/pred fusion)
    # are undefined; implemented as cross-attention (dec queries, enc K/V) +
    # FFN + LN + c_out projection.
    enc = enc_ref[...][0].astype(jnp.float32)                  # (Le, D)
    dec = dec_ref[...][0].astype(jnp.float32)                  # (Lq, D)
    D = dec.shape[-1]
    q = jnp.dot(dec, wq_ref[...], preferred_element_type=jnp.float32) + bq_ref[...]
    kv = jnp.dot(enc, wkv_ref[...], preferred_element_type=jnp.float32) + bkv_ref[...]
    k, v = kv[:, :D], kv[:, D:]
    attn = _mha(q, k, v, n_heads)
    o = jnp.dot(attn, wo_ref[...], preferred_element_type=jnp.float32) + bo_ref[...]
    ln = ln_ref[...].astype(jnp.float32)
    x1 = _layernorm(dec + o, ln[0:1, :], ln[1:2, :])
    y = jnp.dot(x1, w1_ref[...], preferred_element_type=jnp.float32) + b1_ref[...]
    y = jnp.where(y > 0, y, jnp.exp(jnp.minimum(y, 0.0)) - 1.0)   # ELU
    y = jnp.dot(y, w2_ref[...], preferred_element_type=jnp.float32) + b2_ref[...]
    x2 = _layernorm(x1 + y, ln[2:3, :], ln[3:4, :])
    out = jnp.dot(x2, wp_ref[...], preferred_element_type=jnp.float32) + bp_ref[...]

    # ---- de-normalization epilogue (fused, no HBM round trip for `out`) ----
    prm = prm_ref[...].astype(jnp.float32)                     # (5, C)
    dw, db, aw, ab, t2 = (prm[0:1, :], prm[1:2, :], prm[2:3, :],
                          prm[3:4, :], prm[4:5, :])
    stat = stat_ref[...][0].astype(jnp.float32)                # (2, C)
    means, stdev = stat[0:1, :], stat[1:2, :]
    yd = (out - db) / (dw + 1e-10)                             # undo dist affine
    yd = yd * lps_ref[...][0].astype(jnp.float32) + lpm_ref[...][0].astype(jnp.float32)
    yd = (yd - ab) / (aw + 1e-10)                              # undo RIN affine
    yd = yd * stdev + means
    raw_ref[...] = yd[None].astype(raw_ref.dtype)
    fin = yd + t2 * lin_ref[...][0].astype(jnp.float32)
    final_ref[...] = fin[None].astype(final_ref.dtype)


def decoder_and_denorm(enc_out, dec_out, p, n_heads,
                       lp_std, lp_mean, output_linear, rin_stat,
                       dist_w, dist_b, aff_w, aff_b, trade_off2):
    B, Le, D = enc_out.shape
    Lq = dec_out.shape[1]
    C = p["wproj"].shape[1]
    prm = jnp.concatenate([dist_w.reshape(1, C), dist_b.reshape(1, C),
                           aff_w.reshape(1, C), aff_b.reshape(1, C),
                           trade_off2.reshape(1, C)], axis=0).astype(jnp.float32)

    def w2d(a):
        return pl.BlockSpec(a.shape, lambda i: (0, 0))

    full_c = pl.BlockSpec((1, Lq, C), lambda i: (i, 0, 0))
    final, raw = pl.pallas_call(
        functools.partial(_decoder_denorm_kernel, n_heads=n_heads),
        out_shape=(jax.ShapeDtypeStruct((B, Lq, C), jnp.float32),
                   jax.ShapeDtypeStruct((B, Lq, C), jnp.float32)),
        grid=(B,),
        in_specs=[pl.BlockSpec((1, Le, D), lambda i: (i, 0, 0)),
                  pl.BlockSpec((1, Lq, D), lambda i: (i, 0, 0)),
                  w2d(p["wq"]), w2d(p["bq"]), w2d(p["w_kv"]), w2d(p["b_kv"]),
                  w2d(p["wo"]), w2d(p["bo"]), w2d(p["w1"]), w2d(p["b1"]),
                  w2d(p["w2"]), w2d(p["b2"]), w2d(p["ln"]),
                  w2d(p["wproj"]), w2d(p["bproj"]),
                  full_c, full_c, full_c,
                  pl.BlockSpec((1, 2, C), lambda i: (i, 0, 0)),
                  pl.BlockSpec((5, C), lambda i: (0, 0))],
        out_specs=(full_c, full_c),
        compiler_params=_cparams(),
    )(enc_out, dec_out, p["wq"], p["bq"], p["w_kv"], p["b_kv"],
      p["wo"], p["bo"], p["w1"], p["b1"], p["w2"], p["b2"],
      p["ln"], p["wproj"], p["bproj"],
      lp_std, lp_mean, output_linear, rin_stat, prm)
    return final, raw


# ----------------------------------------------------------------------------
# Glue: positional + fixed temporal embedding (gather stays in plain JAX)
# ----------------------------------------------------------------------------

def _sinusoid_table(n, d):
    pos = jnp.arange(n, dtype=jnp.float32)[:, None]
    i = jnp.arange(d, dtype=jnp.float32)[None, :]
    div = jnp.exp(-(jnp.log(10000.0)) * (2.0 * jnp.floor(i / 2.0)) / d)
    ang = pos * div
    return jnp.where((jnp.arange(d) % 2) == 0, jnp.sin(ang), jnp.cos(ang))


def positional_temporal_embedding(x_mark, L, d_model):
    # TODO(synk): fixed temporal-embedding table lookup (dynamic gather) kept in
    # plain JAX glue; no clean Mosaic gather for this index pattern.
    pe = _sinusoid_table(L, d_model)[None]
    month_t = _sinusoid_table(13, d_model)
    day_t = _sinusoid_table(32, d_model)
    wk_t = _sinusoid_table(7, d_model)
    hr_t = _sinusoid_table(24, d_model)
    temp = (jnp.take(month_t, x_mark[..., 0], axis=0)
            + jnp.take(day_t, x_mark[..., 1], axis=0)
            + jnp.take(wk_t, x_mark[..., 2], axis=0)
            + jnp.take(hr_t, x_mark[..., 3], axis=0))
    return (pe + temp).astype(jnp.float32)


# ----------------------------------------------------------------------------
# Top-level forward (mirrors separateformer.forward, eval mode / dropout = id)
# ----------------------------------------------------------------------------

def separateformer_forward(params, x_enc, x_mark_enc, x_dec, x_mark_dec, cfg):
    seq_len = cfg["seq_len"]
    label_len, pred_len = cfg["label_len"], cfg["pred_len"]
    d_model, n_heads = cfg["d_model"], cfg["n_heads"]
    Lout = label_len + pred_len
    kernel_size = seq_len * 3 // 4 + 1
    window_enc = min(cfg["window_size"], seq_len)
    window_dec = min(cfg["window_size"], Lout)

    # A) encoder-side preprocessing (decomp + simple_linear + RIN + rolling norm)
    enc_feat, output_linear, pred_mean, pred_std = enc_preprocess(
        x_enc, params["affine_weight2"], params["affine_bias2"],
        params["simple_w"], params["simple_b"],
        kernel_size=kernel_size, window=window_enc)

    # B) decoder-side preprocessing
    dec_feat, means, stdev, lp_mean, lp_std = dec_preprocess(
        x_dec, params["affine_weight"], params["affine_bias"],
        params["distribution_weight"], params["distribution_bias"],
        label_len=label_len, pred_len=pred_len, window=window_dec)
    rin_stat = jnp.concatenate([means, stdev], axis=1)          # (B, 2, C)

    # C) fused token embedding + encoder layer per stream
    pe_enc = positional_temporal_embedding(x_mark_enc, seq_len, d_model)
    pe_dec = positional_temporal_embedding(x_mark_dec, Lout, d_model)
    enc_out = embed_and_encode(enc_feat, pe_enc, params["enc_conv_w"],
                               params["encoder"], n_heads)
    dec_out = embed_and_encode(dec_feat, pe_dec, params["dec_conv_w"],
                               params["encoder_pred"], n_heads)

    # D) fused decoder block + de-normalization + final blend
    output_final, output = decoder_and_denorm(
        enc_out, dec_out, params["decoder"], n_heads,
        lp_std, lp_mean, output_linear, rin_stat,
        params["distribution_weight"], params["distribution_bias"],
        params["affine_weight"], params["affine_bias"], params["trade_off2"])

    return (output_final, pred_mean, pred_std,
            lp_mean[:, -pred_len:, :], output, output_linear)


# ----------------------------------------------------------------------------
# Deterministic parameter init
# ----------------------------------------------------------------------------

def init_params(key, cfg):
    C, D, d_ff = cfg["c_out"], cfg["d_model"], cfg["d_ff"]
    seq_len, label_len, pred_len = cfg["seq_len"], cfg["label_len"], cfg["pred_len"]
    Lout = label_len + pred_len

    def dense(k, i, o, scale=0.05):
        return jax.random.normal(k, (i, o), jnp.float32) * scale

    def ln_pack():
        return jnp.concatenate(
            [jnp.ones((1, D), jnp.float32), jnp.zeros((1, D), jnp.float32),
             jnp.ones((1, D), jnp.float32), jnp.zeros((1, D), jnp.float32)],
            axis=0)

    def enc_params(k):
        kk = jax.random.split(k, 4)
        return dict(
            w_qkv=dense(kk[0], D, 3 * D), b_qkv=jnp.zeros((1, 3 * D), jnp.float32),
            wo=dense(kk[1], D, D), bo=jnp.zeros((1, D), jnp.float32),
            w1=dense(kk[2], D, d_ff), b1=jnp.zeros((1, d_ff), jnp.float32),
            w2=dense(kk[3], d_ff, D), b2=jnp.zeros((1, D), jnp.float32),
            ln=ln_pack())

    def dec_params(k):
        kk = jax.random.split(k, 6)
        return dict(
            wq=dense(kk[0], D, D), bq=jnp.zeros((1, D), jnp.float32),
            w_kv=dense(kk[1], D, 2 * D), b_kv=jnp.zeros((1, 2 * D), jnp.float32),
            wo=dense(kk[2], D, D), bo=jnp.zeros((1, D), jnp.float32),
            w1=dense(kk[3], D, d_ff), b1=jnp.zeros((1, d_ff), jnp.float32),
            w2=dense(kk[4], d_ff, D), b2=jnp.zeros((1, D), jnp.float32),
            ln=ln_pack(),
            wproj=dense(kk[5], D, C), bproj=jnp.zeros((1, C), jnp.float32))

    ks = jax.random.split(key, 8)
    return dict(
        simple_w=dense(ks[0], Lout, seq_len),        # PyTorch (out, in) layout
        simple_b=jnp.zeros((Lout,), jnp.float32),
        affine_weight=jnp.ones((1, 1, C), jnp.float32),
        affine_bias=jnp.zeros((1, 1, C), jnp.float32),
        affine_weight2=jnp.ones((1, 1, C), jnp.float32),
        affine_bias2=jnp.zeros((1, 1, C), jnp.float32),
        distribution_weight=jnp.ones((1, 1, C), jnp.float32),
        distribution_bias=jnp.zeros((1, 1, C), jnp.float32),
        trade_off1=jnp.zeros((1, 1, C), jnp.float32),  # defined but unused
        trade_off2=jnp.ones((1, 1, C), jnp.float32),
        enc_conv_w=dense(ks[1], 3 * C, D),
        dec_conv_w=dense(ks[2], 3 * C, D),
        encoder=enc_params(ks[3]),
        encoder_pred=enc_params(ks[4]),
        decoder=dec_params(ks[5]),
    )


# ----------------------------------------------------------------------------
# Main
# ----------------------------------------------------------------------------

if __name__ == "__main__":
    cfg = dict(enc_in=4, dec_in=4, c_out=4, seq_len=8, label_len=4, pred_len=4,
               d_model=32, n_heads=4, d_ff=64, window_size=12)
    B = 2

    key = jax.random.PRNGKey(0)
    k1, k2, k3, k4, k5 = jax.random.split(key, 5)
    x_enc = jax.random.normal(k1, (B, cfg["seq_len"], cfg["enc_in"]), jnp.float32)
    x_dec = jax.random.normal(
        k2, (B, cfg["label_len"] + cfg["pred_len"], cfg["dec_in"]), jnp.float32)
    # time-mark features as small integer indices (month, day, weekday, hour)
    x_mark_enc = jax.random.randint(k3, (B, cfg["seq_len"], 4), 0, 7)
    x_mark_dec = jax.random.randint(
        k4, (B, cfg["label_len"] + cfg["pred_len"], 4), 0, 7)

    params = init_params(k5, cfg)

    fwd = jax.jit(functools.partial(separateformer_forward, cfg=cfg))
    outs = fwd(params, x_enc, x_mark_enc, x_dec, x_mark_dec)
    outs = jax.block_until_ready(outs)

    # basic sanity on shapes and finiteness
    assert outs[0].shape == (B, cfg["label_len"] + cfg["pred_len"], cfg["c_out"])
    assert outs[1].shape == (B, 1, cfg["c_out"])
    assert outs[2].shape == (B, 1, cfg["c_out"])
    assert outs[3].shape == (B, cfg["pred_len"], cfg["c_out"])
    assert outs[4].shape == (B, cfg["label_len"] + cfg["pred_len"], cfg["c_out"])
    assert outs[5].shape == (B, cfg["label_len"] + cfg["pred_len"], cfg["c_out"])
    assert all(bool(jnp.all(jnp.isfinite(o))) for o in outs)
    print("KERNEL_OK")
</pallas_src>

<mosaic_0001>
module attributes {stable_mosaic.version = 11 : i64} {
  func.func @_dec_pre_kernel(%arg0: i32, %arg1: memref<1x8x4xf32, #tpu.memory_space<vmem>>, %arg2: memref<4x4xf32, #tpu.memory_space<vmem>>, %arg3: memref<1x8x4xf32, #tpu.memory_space<vmem>>, %arg4: memref<1x1x4xf32, #tpu.memory_space<vmem>>, %arg5: memref<1x1x4xf32, #tpu.memory_space<vmem>>, %arg6: memref<1x8x4xf32, #tpu.memory_space<vmem>>, %arg7: memref<1x8x4xf32, #tpu.memory_space<vmem>>) attributes {dimension_semantics = [#tpu.dimension_semantics<parallel>], iteration_bounds = array<i64: 2>, scalar_prefetch = 0 : i64, scratch_operands = 0 : i64, tpu.core_type = #tpu.core_type<tc>, window_params = [{transform_indices = @transform_0, window_bounds = array<i64: 1, 8, 4>}, {pipeline_mode = #tpu.pipeline_mode<synchronous>, transform_indices = @transform_1, window_bounds = array<i64: 4, 4>}, {transform_indices = @transform_2, window_bounds = array<i64: 1, 8, 4>}, {transform_indices = @transform_3, window_bounds = array<i64: 1, 1, 4>}, {transform_indices = @transform_4, window_bounds = array<i64: 1, 1, 4>}, {transform_indices = @transform_5, window_bounds = array<i64: 1, 8, 4>}, {transform_indices = @transform_6, window_bounds = array<i64: 1, 8, 4>}]} {
    %c0 = arith.constant 0 : index
    %c0_0 = arith.constant 0 : index
    %c0_1 = arith.constant 0 : index
    %0 = vector.load %arg1[%c0, %c0_0, %c0_1] : memref<1x8x4xf32, #tpu.memory_space<vmem>>, vector<1x8x4xf32>
    %1 = vector.shape_cast %0 : vector<1x8x4xf32> to vector<8x4xf32>
    %2 = tpu.iota {dimensions = array<i32: 0>} : vector<8x4xi32>
    %c4_i32 = arith.constant 4 : i32
    %3 = vector.broadcast %c4_i32 : i32 to vector<8x4xi32>
    %4 = arith.cmpi slt, %2, %3 : vector<8x4xi32>
    %cst = arith.constant 0.000000e+00 : f32
    %5 = vector.broadcast %cst : f32 to vector<8x4xf32>
    %6 = arith.select %4, %1, %5 : vector<8x4xi1>, vector<8x4xf32>
    %cst_2 = arith.constant dense<0.000000e+00> : vector<4xf32>
    %7 = vector.multi_reduction <add>, %6, %cst_2 [0] : vector<8x4xf32> to vector<4xf32>
    %8 = vector.shape_cast %7 : vector<4xf32> to vector<1x4xf32>
    %cst_3 = arith.constant 4.000000e+00 : f32
    %9 = vector.broadcast %cst_3 : f32 to vector<1x4xf32>
    %10 = arith.divf %8, %9 : vector<1x4xf32>
    %11 = vector.shape_cast %10 : vector<1x4xf32> to vector<1x4xf32>
    %12 = vector.broadcast %11 : vector<1x4xf32> to vector<8x4xf32>
    %13 = arith.select %4, %1, %12 : vector<8x4xi1>, vector<8x4xf32>
    %c0_4 = arith.constant 0 : index
    %c0_5 = arith.constant 0 : index
    %14 = vector.load %arg2[%c0_4, %c0_5] : memref<4x4xf32, #tpu.memory_space<vmem>>, vector<4x4xf32>
    %15 = vector.extract_strided_slice %14 {offsets = [0, 0], sizes = [1, 4], strides = [1, 1]} : vector<4x4xf32> to vector<1x4xf32>
    %16 = vector.extract_strided_slice %14 {offsets = [1, 0], sizes = [1, 4], strides = [1, 1]} : vector<4x4xf32> to vector<1x4xf32>
    %17 = vector.extract_strided_slice %14 {offsets = [2, 0], sizes = [1, 4], strides = [1, 1]} : vector<4x4xf32> to vector<1x4xf32>
    %18 = vector.extract_strided_slice %14 {offsets = [3, 0], sizes = [1, 4], strides = [1, 1]} : vector<4x4xf32> to vector<1x4xf32>
    %cst_6 = arith.constant dense<0.000000e+00> : vector<4xf32>
    %19 = vector.multi_reduction <add>, %13, %cst_6 [0] : vector<8x4xf32> to vector<4xf32>
    %20 = vector.shape_cast %19 : vector<4xf32> to vector<1x4xf32>
    %cst_7 = arith.constant 8.000000e+00 : f32
    %21 = vector.broadcast %cst_7 : f32 to vector<1x4xf32>
    %22 = arith.divf %20, %21 : vector<1x4xf32>
    %23 = vector.broadcast %22 : vector<1x4xf32> to vector<8x4xf32>
    %24 = arith.subf %13, %23 : vector<8x4xf32>
    %25 = arith.mulf %24, %24 : vector<8x4xf32>
    %cst_8 = arith.constant dense<0.000000e+00> : vector<4xf32>
    %26 = vector.multi_reduction <add>, %25, %cst_8 [0] : vector<8x4xf32> to vector<4xf32>
    %27 = vector.shape_cast %26 : vector<4xf32> to vector<1x4xf32>
    %cst_9 = arith.constant 8.000000e+00 : f32
    %28 = vector.broadcast %cst_9 : f32 to vector<1x4xf32>
    %29 = arith.divf %27, %28 : vector<1x4xf32>
    %cst_10 = arith.constant 9.99999974E-6 : f32
    %30 = vector.broadcast %cst_10 : f32 to vector<1x4xf32>
    %31 = arith.addf %29, %30 : vector<1x4xf32>
    %32 = math.sqrt %31 : vector<1x4xf32>
    %33 = vector.broadcast %22 : vector<1x4xf32> to vector<8x4xf32>
    %34 = arith.subf %13, %33 : vector<8x4xf32>
    %35 = vector.broadcast %32 : vector<1x4xf32> to vector<8x4xf32>
    %36 = arith.divf %34, %35 : vector<8x4xf32>
    %37 = vector.broadcast %15 : vector<1x4xf32> to vector<8x4xf32>
    %38 = arith.mulf %36, %37 : vector<8x4xf32>
    %39 = vector.broadcast %16 : vector<1x4xf32> to vector<8x4xf32>
    %40 = arith.addf %38, %39 : vector<8x4xf32>
    %cst_11 = arith.constant 0.000000e+00 : f32
    %41 = vector.broadcast %cst_11 : f32 to vector<1x4xf32>
    %42 = vector.extract_strided_slice %40 {offsets = [0, 0], sizes = [7, 4], strides = [1, 1]} : vector<8x4xf32> to vector<7x4xf32>
    %43 = tpu.concatenate %41, %42 in 0 : vector<1x4xf32>, vector<7x4xf32> -> vector<8x4xf32>
    %44 = arith.addf %40, %43 : vector<8x4xf32>
    %cst_12 = arith.constant 0.000000e+00 : f32
    %45 = vector.broadcast %cst_12 : f32 to vector<2x4xf32>
    %46 = vector.extract_strided_slice %44 {offsets = [0, 0], sizes = [6, 4], strides = [1, 1]} : vector<8x4xf32> to vector<6x4xf32>
    %47 = tpu.concatenate %45, %46 in 0 : vector<2x4xf32>, vector<6x4xf32> -> vector<8x4xf32>
    %48 = arith.addf %44, %47 : vector<8x4xf32>
    %cst_13 = arith.constant 0.000000e+00 : f32
    %49 = vector.broadcast %cst_13 : f32 to vector<4x4xf32>
    %50 = vector.extract_strided_slice %48 {offsets = [0, 0], sizes = [4, 4], strides = [1, 1]} : vector<8x4xf32> to vector<4x4xf32>
    %51 = tpu.concatenate %49, %50 in 0 : vector<4x4xf32>, vector<4x4xf32> -> vector<8x4xf32>
    %52 = arith.addf %48, %51 : vector<8x4xf32>
    %53 = arith.mulf %40, %40 : vector<8x4xf32>
    %cst_14 = arith.constant 0.000000e+00 : f32
    %54 = vector.broadcast %cst_14 : f32 to vector<1x4xf32>
    %55 = vector.extract_strided_slice %53 {offsets = [0, 0], sizes = [7, 4], strides = [1, 1]} : vector<8x4xf32> to vector<7x4xf32>
    %56 = tpu.concatenate %54, %55 in 0 : vector<1x4xf32>, vector<7x4xf32> -> vector<8x4xf32>
    %57 = arith.addf %53, %56 : vector<8x4xf32>
    %cst_15 = arith.constant 0.000000e+00 : f32
    %58 = vector.broadcast %cst_15 : f32 to vector<2x4xf32>
    %59 = vector.extract_strided_slice %57 {offsets = [0, 0], sizes = [6, 4], strides = [1, 1]} : vector<8x4xf32> to vector<6x4xf32>
    %60 = tpu.concatenate %58, %59 in 0 : vector<2x4xf32>, vector<6x4xf32> -> vector<8x4xf32>
    %61 = arith.addf %57, %60 : vector<8x4xf32>
    %cst_16 = arith.constant 0.000000e+00 : f32
    %62 = vector.broadcast %cst_16 : f32 to vector<4x4xf32>
    %63 = vector.extract_strided_slice %61 {offsets = [0, 0], sizes = [4, 4], strides = [1, 1]} : vector<8x4xf32> to vector<4x4xf32>
    %64 = tpu.concatenate %62, %63 in 0 : vector<4x4xf32>, vector<4x4xf32> -> vector<8x4xf32>
    %65 = arith.addf %61, %64 : vector<8x4xf32>
    %66 = tpu.iota {dimensions = array<i32: 0>} : vector<8x4xi32>
    %67 = arith.sitofp %66 : vector<8x4xi32> to vector<8x4xf32>
    %cst_17 = arith.constant 0.000000e+00 : f32
    %68 = vector.broadcast %cst_17 : f32 to vector<8x4xf32>
    %69 = arith.subf %52, %68 : vector<8x4xf32>
    %cst_18 = arith.constant 0.000000e+00 : f32
    %70 = vector.broadcast %cst_18 : f32 to vector<8x4xf32>
    %71 = arith.subf %65, %70 : vector<8x4xf32>
    %cst_19 = arith.constant 1.000000e+00 : f32
    %72 = vector.broadcast %cst_19 : f32 to vector<8x4xf32>
    %73 = arith.addf %67, %72 : vector<8x4xf32>
    %cst_20 = arith.constant 8.000000e+00 : f32
    %74 = vector.broadcast %cst_20 : f32 to vector<8x4xf32>
    %75 = arith.minimumf %73, %74 : vector<8x4xf32>
    %76 = arith.divf %69, %75 : vector<8x4xf32>
    %77 = arith.divf %71, %75 : vector<8x4xf32>
    %78 = arith.mulf %76, %76 : vector<8x4xf32>
    %79 = arith.subf %77, %78 : vector<8x4xf32>
    %cst_21 = arith.constant 0.000000e+00 : f32
    %80 = vector.broadcast %cst_21 : f32 to vector<8x4xf32>
    %81 = arith.maximumf %79, %80 : vector<8x4xf32>
    %cst_22 = arith.constant 9.99999974E-6 : f32
    %82 = vector.broadcast %cst_22 : f32 to vector<8x4xf32>
    %83 = arith.addf %81, %82 : vector<8x4xf32>
    %84 = math.sqrt %83 : vector<8x4xf32>
    %85 = arith.subf %40, %76 : vector<8x4xf32>
    %86 = arith.divf %85, %84 : vector<8x4xf32>
    %87 = vector.broadcast %17 : vector<1x4xf32> to vector<8x4xf32>
    %88 = arith.mulf %86, %87 : vector<8x4xf32>
    %89 = vector.broadcast %18 : vector<1x4xf32> to vector<8x4xf32>
    %90 = arith.addf %88, %89 : vector<8x4xf32>
    %91 = vector.shape_cast %90 : vector<8x4xf32> to vector<1x8x4xf32>
    %c0_23 = arith.constant 0 : index
    %c0_24 = arith.constant 0 : index
    %c0_25 = arith.constant 0 : index
    %92 = vector.load %arg3[%c0_23, %c0_24, %c0_25] : memref<1x8x4xf32, #tpu.memory_space<vmem>>, vector<1x8x4xf32>
    tpu.vector_store %arg3[%c0_23, %c0_24, %c0_25], %91 {strides = array<i32>} : memref<1x8x4xf32, #tpu.memory_space<vmem>>, vector<1x8x4xf32>,
    %93 = vector.shape_cast %22 : vector<1x4xf32> to vector<1x1x4xf32>
    %c0_26 = arith.constant 0 : index
    %c0_27 = arith.constant 0 : index
    %c0_28 = arith.constant 0 : index
    %94 = vector.load %arg4[%c0_26, %c0_27, %c0_28] : memref<1x1x4xf32, #tpu.memory_space<vmem>>, vector<1x1x4xf32>
    tpu.vector_store %arg4[%c0_26, %c0_27, %c0_28], %93 {strides = array<i32>} : memref<1x1x4xf32, #tpu.memory_space<vmem>>, vector<1x1x4xf32>,
    %95 = vector.shape_cast %32 : vector<1x4xf32> to vector<1x1x4xf32>
    %c0_29 = arith.constant 0 : index
    %c0_30 = arith.constant 0 : index
    %c0_31 = arith.constant 0 : index
    %96 = vector.load %arg5[%c0_29, %c0_30, %c0_31] : memref<1x1x4xf32, #tpu.memory_space<vmem>>, vector<1x1x4xf32>
    tpu.vector_store %arg5[%c0_29, %c0_30, %c0_31], %95 {strides = array<i32>} : memref<1x1x4xf32, #tpu.memory_space<vmem>>, vector<1x1x4xf32>,
    %97 = vector.shape_cast %76 : vector<8x4xf32> to vector<1x8x4xf32>
    %c0_32 = arith.constant 0 : index
    %c0_33 = arith.constant 0 : index
    %c0_34 = arith.constant 0 : index
    %98 = vector.load %arg6[%c0_32, %c0_33, %c0_34] : memref<1x8x4xf32, #tpu.memory_space<vmem>>, vector<1x8x4xf32>
    tpu.vector_store %arg6[%c0_32, %c0_33, %c0_34], %97 {strides = array<i32>} : memref<1x8x4xf32, #tpu.memory_space<vmem>>, vector<1x8x4xf32>,
    %99 = vector.shape_cast %84 : vector<8x4xf32> to vector<1x8x4xf32>
    %c0_35 = arith.constant 0 : index
    %c0_36 = arith.constant 0 : index
    %c0_37 = arith.constant 0 : index
    %100 = vector.load %arg7[%c0_35, %c0_36, %c0_37] : memref<1x8x4xf32, #tpu.memory_space<vmem>>, vector<1x8x4xf32>
    tpu.vector_store %arg7[%c0_35, %c0_36, %c0_37], %99 {strides = array<i32>} : memref<1x8x4xf32, #tpu.memory_space<vmem>>, vector<1x8x4xf32>,
    return
  }
  func.func @transform_0(%arg0: i32) -> (i32, i32, i32) {
    %c0_i32 = arith.constant 0 : i32
    %c0_i32_0 = arith.constant 0 : i32
    %c0_i32_1 = arith.constant 0 : i32
    return %arg0, %c0_i32, %c0_i32_0 : i32, i32, i32
  }
  func.func @transform_1(%arg0: i32) -> (i32, i32) {
    %c0_i32 = arith.constant 0 : i32
    %c0_i32_0 = arith.constant 0 : i32
    %c0_i32_1 = arith.constant 0 : i32
    return %c0_i32, %c0_i32_0 : i32, i32
  }
  func.func @transform_2(%arg0: i32) -> (i32, i32, i32) {
    %c0_i32 = arith.constant 0 : i32
    %c0_i32_0 = arith.constant 0 : i32
    %c0_i32_1 = arith.constant 0 : i32
    return %arg0, %c0_i32, %c0_i32_0 : i32, i32, i32
  }
  func.func @transform_3(%arg0: i32) -> (i32, i32, i32) {
    %c0_i32 = arith.constant 0 : i32
    %c0_i32_0 = arith.constant 0 : i32
    %c0_i32_1 = arith.constant 0 : i32
    return %arg0, %c0_i32, %c0_i32_0 : i32, i32, i32
  }
  func.func @transform_4(%arg0: i32) -> (i32, i32, i32) {
    %c0_i32 = arith.constant 0 : i32
    %c0_i32_0 = arith.constant 0 : i32
    %c0_i32_1 = arith.constant 0 : i32
    return %arg0, %c0_i32, %c0_i32_0 : i32, i32, i32
  }
  func.func @transform_5(%arg0: i32) -> (i32, i32, i32) {
    %c0_i32 = arith.constant 0 : i32
    %c0_i32_0 = arith.constant 0 : i32
    %c0_i32_1 = arith.constant 0 : i32
    return %arg0, %c0_i32, %c0_i32_0 : i32, i32, i32
  }
  func.func @transform_6(%arg0: i32) -> (i32, i32, i32) {
    %c0_i32 = arith.constant 0 : i32
    %c0_i32_0 = arith.constant 0 : i32
    %c0_i32_1 = arith.constant 0 : i32
    return %arg0, %c0_i32, %c0_i32_0 : i32, i32, i32
  }
}

module attributes {stable_mosaic.version = 11 : i64} {
  func.func @_embed_encode_kernel(%arg0: i32, %arg1: memref<1x8x4xf32, #tpu.memory_space<vmem>>, %arg2: memref<1x8x32xf32, #tpu.memory_space<vmem>>, %arg3: memref<12x32xf32, #tpu.memory_space<vmem>>, %arg4: memref<32x96xf32, #tpu.memory_space<vmem>>, %arg5: memref<1x96xf32, #tpu.memory_space<vmem>>, %arg6: memref<32x32xf32, #tpu.memory_space<vmem>>, %arg7: memref<1x32xf32, #tpu.memory_space<vmem>>, %arg8: memref<32x64xf32, #tpu.memory_space<vmem>>, %arg9: memref<1x64xf32, #tpu.memory_space<vmem>>, %arg10: memref<64x32xf32, #tpu.memory_space<vmem>>, %arg11: memref<1x32xf32, #tpu.memory_space<vmem>>, %arg12: memref<4x32xf32, #tpu.memory_space<vmem>>, %arg13: memref<1x8x32xf32, #tpu.memory_space<vmem>>) attributes {dimension_semantics = [#tpu.dimension_semantics<parallel>], iteration_bounds = array<i64: 2>, scalar_prefetch = 0 : i64, scratch_operands = 0 : i64, tpu.core_type = #tpu.core_type<tc>, window_params = [{transform_indices = @transform_0, window_bounds = array<i64: 1, 8, 4>}, {transform_indices = @transform_1, window_bounds = array<i64: 1, 8, 32>}, {pipeline_mode = #tpu.pipeline_mode<synchronous>, transform_indices = @transform_2, window_bounds = array<i64: 12, 32>}, {pipeline_mode = #tpu.pipeline_mode<synchronous>, transform_indices = @transform_3, window_bounds = array<i64: 32, 96>}, {pipeline_mode = #tpu.pipeline_mode<synchronous>, transform_indices = @transform_4, window_bounds = array<i64: 1, 96>}, {pipeline_mode = #tpu.pipeline_mode<synchronous>, transform_indices = @transform_5, window_bounds = array<i64: 32, 32>}, {pipeline_mode = #tpu.pipeline_mode<synchronous>, transform_indices = @transform_6, window_bounds = array<i64: 1, 32>}, {pipeline_mode = #tpu.pipeline_mode<synchronous>, transform_indices = @transform_7, window_bounds = array<i64: 32, 64>}, {pipeline_mode = #tpu.pipeline_mode<synchronous>, transform_indices = @transform_8, window_bounds = array<i64: 1, 64>}, {pipeline_mode = #tpu.pipeline_mode<synchronous>, transform_indices = @transform_9, window_bounds = array<i64: 64, 32>}, {pipeline_mode = #tpu.pipeline_mode<synchronous>, transform_indices = @transform_10, window_bounds = array<i64: 1, 32>}, {pipeline_mode = #tpu.pipeline_mode<synchronous>, transform_indices = @transform_11, window_bounds = array<i64: 4, 32>}, {transform_indices = @transform_12, window_bounds = array<i64: 1, 8, 32>}]} {
    %c0 = arith.constant 0 : index
    %c0_0 = arith.constant 0 : index
    %c0_1 = arith.constant 0 : index
    %0 = vector.load %arg1[%c0, %c0_0, %c0_1] : memref<1x8x4xf32, #tpu.memory_space<vmem>>, vector<1x8x4xf32>
    %1 = vector.shape_cast %0 : vector<1x8x4xf32> to vector<8x4xf32>
    %c0_2 = arith.constant 0 : index
    %c0_3 = arith.constant 0 : index
    %c0_4 = arith.constant 0 : index
    %2 = vector.load %arg2[%c0_2, %c0_3, %c0_4] : memref<1x8x32xf32, #tpu.memory_space<vmem>>, vector<1x8x32xf32>
    %3 = vector.shape_cast %2 : vector<1x8x32xf32> to vector<8x32xf32>
    %c0_5 = arith.constant 0 : index
    %c0_6 = arith.constant 0 : index
    %4 = vector.load %arg3[%c0_5, %c0_6] : memref<12x32xf32, #tpu.memory_space<vmem>>, vector<12x32xf32>
    %5 = vector.extract_strided_slice %1 {offsets = [7, 0], sizes = [1, 4], strides = [1, 1]} : vector<8x4xf32> to vector<1x4xf32>
    %6 = vector.extract_strided_slice %1 {offsets = [0, 0], sizes = [7, 4], strides = [1, 1]} : vector<8x4xf32> to vector<7x4xf32>
    %7 = tpu.concatenate %5, %6 in 0 : vector<1x4xf32>, vector<7x4xf32> -> vector<8x4xf32>
    %8 = vector.extract_strided_slice %1 {offsets = [1, 0], sizes = [7, 4], strides = [1, 1]} : vector<8x4xf32> to vector<7x4xf32>
    %9 = vector.extract_strided_slice %1 {offsets = [0, 0], sizes = [1, 4], strides = [1, 1]} : vector<8x4xf32> to vector<1x4xf32>
    %10 = tpu.concatenate %8, %9 in 0 : vector<7x4xf32>, vector<1x4xf32> -> vector<8x4xf32>
    %11 = vector.extract_strided_slice %4 {offsets = [0, 0], sizes = [4, 32], strides = [1, 1]} : vector<12x32xf32> to vector<4x32xf32>
    %cst = arith.constant dense<0.000000e+00> : vector<8x32xf32>
    %12 = tpu.matmul %7, %11, %cst {dimension_numbers = #tpu.dot_dimension_numbers<[1], [0], [0], [1], [0, 0, 1, 1], [], []>} : vector<8x4xf32>, vector<4x32xf32>, vector<8x32xf32> -> vector<8x32xf32>
    %13 = vector.extract_strided_slice %4 {offsets = [4, 0], sizes = [4, 32], strides = [1, 1]} : vector<12x32xf32> to vector<4x32xf32>
    %cst_7 = arith.constant dense<0.000000e+00> : vector<8x32xf32>
    %14 = tpu.matmul %1, %13, %cst_7 {dimension_numbers = #tpu.dot_dimension_numbers<[1], [0], [0], [1], [0, 0, 1, 1], [], []>} : vector<8x4xf32>, vector<4x32xf32>, vector<8x32xf32> -> vector<8x32xf32>
    %15 = arith.addf %12, %14 : vector<8x32xf32>
    %16 = vector.extract_strided_slice %4 {offsets = [8, 0], sizes = [4, 32], strides = [1, 1]} : vector<12x32xf32> to vector<4x32xf32>
    %cst_8 = arith.constant dense<0.000000e+00> : vector<8x32xf32>
    %17 = tpu.matmul %10, %16, %cst_8 {dimension_numbers = #tpu.dot_dimension_numbers<[1], [0], [0], [1], [0, 0, 1, 1], [], []>} : vector<8x4xf32>, vector<4x32xf32>, vector<8x32xf32> -> vector<8x32xf32>
    %18 = arith.addf %15, %17 : vector<8x32xf32>
    %19 = arith.addf %18, %3 : vector<8x32xf32>
    %c0_9 = arith.constant 0 : index
    %c0_10 = arith.constant 0 : index
    %20 = vector.load %arg4[%c0_9, %c0_10] : memref<32x96xf32, #tpu.memory_space<vmem>>, vector<32x96xf32>
    %c0_11 = arith.constant 0 : index
    %c0_12 = arith.constant 0 : index
    %21 = vector.load %arg5[%c0_11, %c0_12] : memref<1x96xf32, #tpu.memory_space<vmem>>, vector<1x96xf32>
    %c0_13 = arith.constant 0 : index
    %c0_14 = arith.constant 0 : index
    %22 = vector.load %arg6[%c0_13, %c0_14] : memref<32x32xf32, #tpu.memory_space<vmem>>, vector<32x32xf32>
    %c0_15 = arith.constant 0 : index
    %c0_16 = arith.constant 0 : index
    %23 = vector.load %arg7[%c0_15, %c0_16] : memref<1x32xf32, #tpu.memory_space<vmem>>, vector<1x32xf32>
    %c0_17 = arith.constant 0 : index
    %c0_18 = arith.constant 0 : index
    %24 = vector.load %arg8[%c0_17, %c0_18] : memref<32x64xf32, #tpu.memory_space<vmem>>, vector<32x64xf32>
    %c0_19 = arith.constant 0 : index
    %c0_20 = arith.constant 0 : index
    %25 = vector.load %arg9[%c0_19, %c0_20] : memref<1x64xf32, #tpu.memory_space<vmem>>, vector<1x64xf32>
    %c0_21 = arith.constant 0 : index
    %c0_22 = arith.constant 0 : index
    %26 = vector.load %arg10[%c0_21, %c0_22] : memref<64x32xf32, #tpu.memory_space<vmem>>, vector<64x32xf32>
    %c0_23 = arith.constant 0 : index
    %c0_24 = arith.constant 0 : index
    %27 = vector.load %arg11[%c0_23, %c0_24] : memref<1x32xf32, #tpu.memory_space<vmem>>, vector<1x32xf32>
    %c0_25 = arith.constant 0 : index
    %c0_26 = arith.constant 0 : index
    %28 = vector.load %arg12[%c0_25, %c0_26] : memref<4x32xf32, #tpu.memory_space<vmem>>, vector<4x32xf32>
    %cst_27 = arith.constant dense<0.000000e+00> : vector<8x96xf32>
    %29 = tpu.matmul %19, %20, %cst_27 {dimension_numbers = #tpu.dot_dimension_numbers<[1], [0], [0], [1], [0, 0, 1, 1], [], []>} : vector<8x32xf32>, vector<32x96xf32>, vector<8x96xf32> -> vector<8x96xf32>
    %30 = vector.broadcast %21 : vector<1x96xf32> to vector<8x96xf32>
    %31 = arith.addf %29, %30 : vector<8x96xf32>
    %32 = vector.extract_strided_slice %31 {offsets = [0, 0], sizes = [8, 32], strides = [1, 1]} : vector<8x96xf32> to vector<8x32xf32>
    %33 = vector.extract_strided_slice %31 {offsets = [0, 32], sizes = [8, 32], strides = [1, 1]} : vector<8x96xf32> to vector<8x32xf32>
    %34 = vector.extract_strided_slice %31 {offsets = [0, 64], sizes = [8, 32], strides = [1, 1]} : vector<8x96xf32> to vector<8x32xf32>
    %35 = vector.extract_strided_slice %32 {offsets = [0, 0], sizes = [8, 8], strides = [1, 1]} : vector<8x32xf32> to vector<8x8xf32>
    %36 = vector.extract_strided_slice %33 {offsets = [0, 0], sizes = [8, 8], strides = [1, 1]} : vector<8x32xf32> to vector<8x8xf32>
    %37 = vector.extract_strided_slice %34 {offsets = [0, 0], sizes = [8, 8], strides = [1, 1]} : vector<8x32xf32> to vector<8x8xf32>
    %cst_28 = arith.constant dense<0.000000e+00> : vector<8x8xf32>
    %38 = tpu.matmul %35, %36, %cst_28 {dimension_numbers = #tpu.dot_dimension_numbers<[1], [1], [0], [0], [0, 0, 1, 0], [], []>} : vector<8x8xf32>, vector<8x8xf32>, vector<8x8xf32> -> vector<8x8xf32>
    %cst_29 = arith.constant 0.353553385 : f32
    %39 = vector.broadcast %cst_29 : f32 to vector<8x8xf32>
    %40 = arith.mulf %38, %39 : vector<8x8xf32>
    %cst_30 = arith.constant dense<0xFF800000> : vector<8xf32>
    %41 = vector.multi_reduction <maximumf>, %40, %cst_30 [1] : vector<8x8xf32> to vector<8xf32>
    %42 = vector.shape_cast %41 : vector<8xf32> to vector<8x1xf32>
    %43 = vector.broadcast %42 : vector<8x1xf32> to vector<8x8xf32>
    %44 = arith.subf %40, %43 : vector<8x8xf32>
    %45 = math.exp %44 : vector<8x8xf32>
    %cst_31 = arith.constant dense<0.000000e+00> : vector<8xf32>
    %46 = vector.multi_reduction <add>, %45, %cst_31 [1] : vector<8x8xf32> to vector<8xf32>
    %47 = vector.shape_cast %46 : vector<8xf32> to vector<8x1xf32>
    %48 = vector.broadcast %47 : vector<8x1xf32> to vector<8x8xf32>
    %49 = arith.divf %45, %48 : vector<8x8xf32>
    %cst_32 = arith.constant dense<0.000000e+00> : vector<8x8xf32>
    %50 = tpu.matmul %49, %37, %cst_32 {dimension_numbers = #tpu.dot_dimension_numbers<[1], [0], [0], [1], [0, 0, 1, 1], [], []>} : vector<8x8xf32>, vector<8x8xf32>, vector<8x8xf32> -> vector<8x8xf32>
    %51 = vector.extract_strided_slice %32 {offsets = [0, 8], sizes = [8, 8], strides = [1, 1]} : vector<8x32xf32> to vector<8x8xf32>
    %52 = vector.extract_strided_slice %33 {offsets = [0, 8], sizes = [8, 8], strides = [1, 1]} : vector<8x32xf32> to vector<8x8xf32>
    %53 = vector.extract_strided_slice %34 {offsets = [0, 8], sizes = [8, 8], strides = [1, 1]} : vector<8x32xf32> to vector<8x8xf32>
    %cst_33 = arith.constant dense<0.000000e+00> : vector<8x8xf32>
    %54 = tpu.matmul %51, %52, %cst_33 {dimension_numbers = #tpu.dot_dimension_numbers<[1], [1], [0], [0], [0, 0, 1, 0], [], []>} : vector<8x8xf32>, vector<8x8xf32>, vector<8x8xf32> -> vector<8x8xf32>
    %cst_34 = arith.constant 0.353553385 : f32
    %55 = vector.broadcast %cst_34 : f32 to vector<8x8xf32>
    %56 = arith.mulf %54, %55 : vector<8x8xf32>
    %cst_35 = arith.constant dense<0xFF800000> : vector<8xf32>
    %57 = vector.multi_reduction <maximumf>, %56, %cst_35 [1] : vector<8x8xf32> to vector<8xf32>
    %58 = vector.shape_cast %57 : vector<8xf32> to vector<8x1xf32>
    %59 = vector.broadcast %58 : vector<8x1xf32> to vector<8x8xf32>
    %60 = arith.subf %56, %59 : vector<8x8xf32>
    %61 = math.exp %60 : vector<8x8xf32>
    %cst_36 = arith.constant dense<0.000000e+00> : vector<8xf32>
    %62 = vector.multi_reduction <add>, %61, %cst_36 [1] : vector<8x8xf32> to vector<8xf32>
    %63 = vector.shape_cast %62 : vector<8xf32> to vector<8x1xf32>
    %64 = vector.broadcast %63 : vector<8x1xf32> to vector<8x8xf32>
    %65 = arith.divf %61, %64 : vector<8x8xf32>
    %cst_37 = arith.constant dense<0.000000e+00> : vector<8x8xf32>
    %66 = tpu.matmul %65, %53, %cst_37 {dimension_numbers = #tpu.dot_dimension_numbers<[1], [0], [0], [1], [0, 0, 1, 1], [], []>} : vector<8x8xf32>, vector<8x8xf32>, vector<8x8xf32> -> vector<8x8xf32>
    %67 = vector.extract_strided_slice %32 {offsets = [0, 16], sizes = [8, 8], strides = [1, 1]} : vector<8x32xf32> to vector<8x8xf32>
    %68 = vector.extract_strided_slice %33 {offsets = [0, 16], sizes = [8, 8], strides = [1, 1]} : vector<8x32xf32> to vector<8x8xf32>
    %69 = vector.extract_strided_slice %34 {offsets = [0, 16], sizes = [8, 8], strides = [1, 1]} : vector<8x32xf32> to vector<8x8xf32>
    %cst_38 = arith.constant dense<0.000000e+00> : vector<8x8xf32>
    %70 = tpu.matmul %67, %68, %cst_38 {dimension_numbers = #tpu.dot_dimension_numbers<[1], [1], [0], [0], [0, 0, 1, 0], [], []>} : vector<8x8xf32>, vector<8x8xf32>, vector<8x8xf32> -> vector<8x8xf32>
    %cst_39 = arith.constant 0.353553385 : f32
    %71 = vector.broadcast %cst_39 : f32 to vector<8x8xf32>
    %72 = arith.mulf %70, %71 : vector<8x8xf32>
    %cst_40 = arith.constant dense<0xFF800000> : vector<8xf32>
    %73 = vector.multi_reduction <maximumf>, %72, %cst_40 [1] : vector<8x8xf32> to vector<8xf32>
    %74 = vector.shape_cast %73 : vector<8xf32> to vector<8x1xf32>
    %75 = vector.broadcast %74 : vector<8x1xf32> to vector<8x8xf32>
    %76 = arith.subf %72, %75 : vector<8x8xf32>
    %77 = math.exp %76 : vector<8x8xf32>
    %cst_41 = arith.constant dense<0.000000e+00> : vector<8xf32>
    %78 = vector.multi_reduction <add>, %77, %cst_41 [1] : vector<8x8xf32> to vector<8xf32>
    %79 = vector.shape_cast %78 : vector<8xf32> to vector<8x1xf32>
    %80 = vector.broadcast %79 : vector<8x1xf32> to vector<8x8xf32>
    %81 = arith.divf %77, %80 : vector<8x8xf32>
    %cst_42 = arith.constant dense<0.000000e+00> : vector<8x8xf32>
    %82 = tpu.matmul %81, %69, %cst_42 {dimension_numbers = #tpu.dot_dimension_numbers<[1], [0], [0], [1], [0, 0, 1, 1], [], []>} : vector<8x8xf32>, vector<8x8xf32>, vector<8x8xf32> -> vector<8x8xf32>
    %83 = vector.extract_strided_slice %32 {offsets = [0, 24], sizes = [8, 8], strides = [1, 1]} : vector<8x32xf32> to vector<8x8xf32>
    %84 = vector.extract_strided_slice %33 {offsets = [0, 24], sizes = [8, 8], strides = [1, 1]} : vector<8x32xf32> to vector<8x8xf32>
    %85 = vector.extract_strided_slice %34 {offsets = [0, 24], sizes = [8, 8], strides = [1, 1]} : vector<8x32xf32> to vector<8x8xf32>
    %cst_43 = arith.constant dense<0.000000e+00> : vector<8x8xf32>
    %86 = tpu.matmul %83, %84, %cst_43 {dimension_numbers = #tpu.dot_dimension_numbers<[1], [1], [0], [0], [0, 0, 1, 0], [], []>} : vector<8x8xf32>, vector<8x8xf32>, vector<8x8xf32> -> vector<8x8xf32>
    %cst_44 = arith.constant 0.353553385 : f32
    %87 = vector.broadcast %cst_44 : f32 to vector<8x8xf32>
    %88 = arith.mulf %86, %87 : vector<8x8xf32>
    %cst_45 = arith.constant dense<0xFF800000> : vector<8xf32>
    %89 = vector.multi_reduction <maximumf>, %88, %cst_45 [1] : vector<8x8xf32> to vector<8xf32>
    %90 = vector.shape_cast %89 : vector<8xf32> to vector<8x1xf32>
    %91 = vector.broadcast %90 : vector<8x1xf32> to vector<8x8xf32>
    %92 = arith.subf %88, %91 : vector<8x8xf32>
    %93 = math.exp %92 : vector<8x8xf32>
    %cst_46 = arith.constant dense<0.000000e+00> : vector<8xf32>
    %94 = vector.multi_reduction <add>, %93, %cst_46 [1] : vector<8x8xf32> to vector<8xf32>
    %95 = vector.shape_cast %94 : vector<8xf32> to vector<8x1xf32>
    %96 = vector.broadcast %95 : vector<8x1xf32> to vector<8x8xf32>
    %97 = arith.divf %93, %96 : vector<8x8xf32>
    %cst_47 = arith.constant dense<0.000000e+00> : vector<8x8xf32>
    %98 = tpu.matmul %97, %85, %cst_47 {dimension_numbers = #tpu.dot_dimension_numbers<[1], [0], [0], [1], [0, 0, 1, 1], [], []>} : vector<8x8xf32>, vector<8x8xf32>, vector<8x8xf32> -> vector<8x8xf32>
    %99 = tpu.concatenate %50, %66, %82, %98 in 1 : vector<8x8xf32>, vector<8x8xf32>, vector<8x8xf32>, vector<8x8xf32> -> vector<8x32xf32>
    %cst_48 = arith.constant dense<0.000000e+00> : vector<8x32xf32>
    %100 = tpu.matmul %99, %22, %cst_48 {dimension_numbers = #tpu.dot_dimension_numbers<[1], [0], [0], [1], [0, 0, 1, 1], [], []>} : vector<8x32xf32>, vector<32x32xf32>, vector<8x32xf32> -> vector<8x32xf32>
    %101 = vector.broadcast %23 : vector<1x32xf32> to vector<8x32xf32>
    %102 = arith.addf %100, %101 : vector<8x32xf32>
    %103 = arith.addf %19, %102 : vector<8x32xf32>
    %104 = vector.extract_strided_slice %28 {offsets = [0, 0], sizes = [1, 32], strides = [1, 1]} : vector<4x32xf32> to vector<1x32xf32>
    %105 = vector.extract_strided_slice %28 {offsets = [1, 0], sizes = [1, 32], strides = [1, 1]} : vector<4x32xf32> to vector<1x32xf32>
    %cst_49 = arith.constant dense<0.000000e+00> : vector<8xf32>
    %106 = vector.multi_reduction <add>, %103, %cst_49 [1] : vector<8x32xf32> to vector<8xf32>
    %107 = vector.shape_cast %106 : vector<8xf32> to vector<8x1xf32>
    %cst_50 = arith.constant 3.200000e+01 : f32
    %108 = vector.broadcast %cst_50 : f32 to vector<8x1xf32>
    %109 = arith.divf %107, %108 : vector<8x1xf32>
    %110 = vector.broadcast %109 : vector<8x1xf32> to vector<8x32xf32>
    %111 = arith.subf %103, %110 : vector<8x32xf32>
    %112 = arith.mulf %111, %111 : vector<8x32xf32>
    %cst_51 = arith.constant dense<0.000000e+00> : vector<8xf32>
    %113 = vector.multi_reduction <add>, %112, %cst_51 [1] : vector<8x32xf32> to vector<8xf32>
    %114 = vector.shape_cast %113 : vector<8xf32> to vector<8x1xf32>
    %cst_52 = arith.constant 3.200000e+01 : f32
    %115 = vector.broadcast %cst_52 : f32 to vector<8x1xf32>
    %116 = arith.divf %114, %115 : vector<8x1xf32>
    %117 = vector.broadcast %109 : vector<8x1xf32> to vector<8x32xf32>
    %118 = arith.subf %103, %117 : vector<8x32xf32>
    %cst_53 = arith.constant 9.99999974E-6 : f32
    %119 = vector.broadcast %cst_53 : f32 to vector<8x1xf32>
    %120 = arith.addf %116, %119 : vector<8x1xf32>
    %121 = math.rsqrt %120 : vector<8x1xf32>
    %122 = vector.broadcast %121 : vector<8x1xf32> to vector<8x32xf32>
    %123 = arith.mulf %118, %122 : vector<8x32xf32>
    %124 = vector.broadcast %104 : vector<1x32xf32> to vector<8x32xf32>
    %125 = arith.mulf %123, %124 : vector<8x32xf32>
    %126 = vector.broadcast %105 : vector<1x32xf32> to vector<8x32xf32>
    %127 = arith.addf %125, %126 : vector<8x32xf32>
    %cst_54 = arith.constant dense<0.000000e+00> : vector<8x64xf32>
    %128 = tpu.matmul %127, %24, %cst_54 {dimension_numbers = #tpu.dot_dimension_numbers<[1], [0], [0], [1], [0, 0, 1, 1], [], []>} : vector<8x32xf32>, vector<32x64xf32>, vector<8x64xf32> -> vector<8x64xf32>
    %129 = vector.broadcast %25 : vector<1x64xf32> to vector<8x64xf32>
    %130 = arith.addf %128, %129 : vector<8x64xf32>
    %131 = arith.mulf %130, %130 : vector<8x64xf32>
    %132 = arith.mulf %130, %131 : vector<8x64xf32>
    %cst_55 = arith.constant 4.471500e-02 : f32
    %133 = vector.broadcast %cst_55 : f32 to vector<8x64xf32>
    %134 = arith.mulf %133, %132 : vector<8x64xf32>
    %135 = arith.addf %130, %134 : vector<8x64xf32>
    %cst_56 = arith.constant 0.797884583 : f32
    %136 = vector.broadcast %cst_56 : f32 to vector<8x64xf32>
    %137 = arith.mulf %136, %135 : vector<8x64xf32>
    %138 = math.tanh %137 : vector<8x64xf32>
    %cst_57 = arith.constant 1.000000e+00 : f32
    %139 = vector.broadcast %cst_57 : f32 to vector<8x64xf32>
    %140 = arith.addf %139, %138 : vector<8x64xf32>
    %cst_58 = arith.constant 5.000000e-01 : f32
    %141 = vector.broadcast %cst_58 : f32 to vector<8x64xf32>
    %142 = arith.mulf %141, %140 : vector<8x64xf32>
    %143 = arith.mulf %130, %142 : vector<8x64xf32>
    %cst_59 = arith.constant dense<0.000000e+00> : vector<8x32xf32>
    %144 = tpu.matmul %143, %26, %cst_59 {dimension_numbers = #tpu.dot_dimension_numbers<[1], [0], [0], [1], [0, 0, 1, 1], [], []>} : vector<8x64xf32>, vector<64x32xf32>, vector<8x32xf32> -> vector<8x32xf32>
    %145 = vector.broadcast %27 : vector<1x32xf32> to vector<8x32xf32>
    %146 = arith.addf %144, %145 : vector<8x32xf32>
    %147 = arith.addf %127, %146 : vector<8x32xf32>
    %148 = vector.extract_strided_slice %28 {offsets = [2, 0], sizes = [1, 32], strides = [1, 1]} : vector<4x32xf32> to vector<1x32xf32>
    %149 = vector.extract_strided_slice %28 {offsets = [3, 0], sizes = [1, 32], strides = [1, 1]} : vector<4x32xf32> to vector<1x32xf32>
    %cst_60 = arith.constant dense<0.000000e+00> : vector<8xf32>
    %150 = vector.multi_reduction <add>, %147, %cst_60 [1] : vector<8x32xf32> to vector<8xf32>
    %151 = vector.shape_cast %150 : vector<8xf32> to vector<8x1xf32>
    %cst_61 = arith.constant 3.200000e+01 : f32
    %152 = vector.broadcast %cst_61 : f32 to vector<8x1xf32>
    %153 = arith.divf %151, %152 : vector<8x1xf32>
    %154 = vector.broadcast %153 : vector<8x1xf32> to vector<8x32xf32>
    %155 = arith.subf %147, %154 : vector<8x32xf32>
    %156 = arith.mulf %155, %155 : vector<8x32xf32>
    %cst_62 = arith.constant dense<0.000000e+00> : vector<8xf32>
    %157 = vector.multi_reduction <add>, %156, %cst_62 [1] : vector<8x32xf32> to vector<8xf32>
    %158 = vector.shape_cast %157 : vector<8xf32> to vector<8x1xf32>
    %cst_63 = arith.constant 3.200000e+01 : f32
    %159 = vector.broadcast %cst_63 : f32 to vector<8x1xf32>
    %160 = arith.divf %158, %159 : vector<8x1xf32>
    %161 = vector.broadcast %153 : vector<8x1xf32> to vector<8x32xf32>
    %162 = arith.subf %147, %161 : vector<8x32xf32>
    %cst_64 = arith.constant 9.99999974E-6 : f32
    %163 = vector.broadcast %cst_64 : f32 to vector<8x1xf32>
    %164 = arith.addf %160, %163 : vector<8x1xf32>
    %165 = math.rsqrt %164 : vector<8x1xf32>
    %166 = vector.broadcast %165 : vector<8x1xf32> to vector<8x32xf32>
    %167 = arith.mulf %162, %166 : vector<8x32xf32>
    %168 = vector.broadcast %148 : vector<1x32xf32> to vector<8x32xf32>
    %169 = arith.mulf %167, %168 : vector<8x32xf32>
    %170 = vector.broadcast %149 : vector<1x32xf32> to vector<8x32xf32>
    %171 = arith.addf %169, %170 : vector<8x32xf32>
    %172 = vector.shape_cast %171 : vector<8x32xf32> to vector<1x8x32xf32>
    %c0_65 = arith.constant 0 : index
    %c0_66 = arith.constant 0 : index
    %c0_67 = arith.constant 0 : index
    %173 = vector.load %arg13[%c0_65, %c0_66, %c0_67] : memref<1x8x32xf32, #tpu.memory_space<vmem>>, vector<1x8x32xf32>
    tpu.vector_store %arg13[%c0_65, %c0_66, %c0_67], %172 {strides = array<i32>} : memref<1x8x32xf32, #tpu.memory_space<vmem>>, vector<1x8x32xf32>,
    return
  }
  func.func @transform_0(%arg0: i32) -> (i32, i32, i32) {
    %c0_i32 = arith.constant 0 : i32
    %c0_i32_0 = arith.constant 0 : i32
    %c0_i32_1 = arith.constant 0 : i32
    return %arg0, %c0_i32, %c0_i32_0 : i32, i32, i32
  }
  func.func @transform_1(%arg0: i32) -> (i32, i32, i32) {
    %c0_i32 = arith.constant 0 : i32
    %c0_i32_0 = arith.constant 0 : i32
    %c0_i32_1 = arith.constant 0 : i32
    return %arg0, %c0_i32, %c0_i32_0 : i32, i32, i32
  }
  func.func @transform_2(%arg0: i32) -> (i32, i32) {
    %c0_i32 = arith.constant 0 : i32
    %c0_i32_0 = arith.constant 0 : i32
    %c0_i32_1 = arith.constant 0 : i32
    return %c0_i32, %c0_i32_0 : i32, i32
  }
  func.func @transform_3(%arg0: i32) -> (i32, i32) {
    %c0_i32 = arith.constant 0 : i32
    %c0_i32_0 = arith.constant 0 : i32
    %c0_i32_1 = arith.constant 0 : i32
    return %c0_i32, %c0_i32_0 : i32, i32
  }
  func.func @transform_4(%arg0: i32) -> (i32, i32) {
    %c0_i32 = arith.constant 0 : i32
    %c0_i32_0 = arith.constant 0 : i32
    %c0_i32_1 = arith.constant 0 : i32
    return %c0_i32, %c0_i32_0 : i32, i32
  }
  func.func @transform_5(%arg0: i32) -> (i32, i32) {
    %c0_i32 = arith.constant 0 : i32
    %c0_i32_0 = arith.constant 0 : i32
    %c0_i32_1 = arith.constant 0 : i32
    return %c0_i32, %c0_i32_0 : i32, i32
  }
  func.func @transform_6(%arg0: i32) -> (i32, i32) {
    %c0_i32 = arith.constant 0 : i32
    %c0_i32_0 = arith.constant 0 : i32
    %c0_i32_1 = arith.constant 0 : i32
    return %c0_i32, %c0_i32_0 : i32, i32
  }
  func.func @transform_7(%arg0: i32) -> (i32, i32) {
    %c0_i32 = arith.constant 0 : i32
    %c0_i32_0 = arith.constant 0 : i32
    %c0_i32_1 = arith.constant 0 : i32
    return %c0_i32, %c0_i32_0 : i32, i32
  }
  func.func @transform_8(%arg0: i32) -> (i32, i32) {
    %c0_i32 = arith.constant 0 : i32
    %c0_i32_0 = arith.constant 0 : i32
    %c0_i32_1 = arith.constant 0 : i32
    return %c0_i32, %c0_i32_0 : i32, i32
  }
  func.func @transform_9(%arg0: i32) -> (i32, i32) {
    %c0_i32 = arith.constant 0 : i32
    %c0_i32_0 = arith.constant 0 : i32
    %c0_i32_1 = arith.constant 0 : i32
    return %c0_i32, %c0_i32_0 : i32, i32
  }
  func.func @transform_10(%arg0: i32) -> (i32, i32) {
    %c0_i32 = arith.constant 0 : i32
    %c0_i32_0 = arith.constant 0 : i32
    %c0_i32_1 = arith.constant 0 : i32
    return %c0_i32, %c0_i32_0 : i32, i32
  }
  func.func @transform_11(%arg0: i32) -> (i32, i32) {
    %c0_i32 = arith.constant 0 : i32
    %c0_i32_0 = arith.constant 0 : i32
    %c0_i32_1 = arith.constant 0 : i32
    return %c0_i32, %c0_i32_0 : i32, i32
  }
  func.func @transform_12(%arg0: i32) -> (i32, i32, i32) {
    %c0_i32 = arith.constant 0 : i32
    %c0_i32_0 = arith.constant 0 : i32
    %c0_i32_1 = arith.constant 0 : i32
    return %arg0, %c0_i32, %c0_i32_0 : i32, i32, i32
  }
}

module attributes {stable_mosaic.version = 11 : i64} {
  func.func @_enc_pre_kernel(%arg0: i32, %arg1: memref<1x8x4xf32, #tpu.memory_space<vmem>>, %arg2: memref<2x4xf32, #tpu.memory_space<vmem>>, %arg3: memref<8x8xf32, #tpu.memory_space<vmem>>, %arg4: memref<8x1xf32, #tpu.memory_space<vmem>>, %arg5: memref<1x8x4xf32, #tpu.memory_space<vmem>>, %arg6: memref<1x8x4xf32, #tpu.memory_space<vmem>>, %arg7: memref<1x1x4xf32, #tpu.memory_space<vmem>>, %arg8: memref<1x1x4xf32, #tpu.memory_space<vmem>>) attributes {dimension_semantics = [#tpu.dimension_semantics<parallel>], iteration_bounds = array<i64: 2>, scalar_prefetch = 0 : i64, scratch_operands = 0 : i64, tpu.core_type = #tpu.core_type<tc>, window_params = [{transform_indices = @transform_0, window_bounds = array<i64: 1, 8, 4>}, {pipeline_mode = #tpu.pipeline_mode<synchronous>, transform_indices = @transform_1, window_bounds = array<i64: 2, 4>}, {pipeline_mode = #tpu.pipeline_mode<synchronous>, transform_indices = @transform_2, window_bounds = array<i64: 8, 8>}, {pipeline_mode = #tpu.pipeline_mode<synchronous>, transform_indices = @transform_3, window_bounds = array<i64: 8, 1>}, {transform_indices = @transform_4, window_bounds = array<i64: 1, 8, 4>}, {transform_indices = @transform_5, window_bounds = array<i64: 1, 8, 4>}, {transform_indices = @transform_6, window_bounds = array<i64: 1, 1, 4>}, {transform_indices = @transform_7, window_bounds = array<i64: 1, 1, 4>}]} {
    %c0 = arith.constant 0 : index
    %c0_0 = arith.constant 0 : index
    %c0_1 = arith.constant 0 : index
    %0 = vector.load %arg1[%c0, %c0_0, %c0_1] : memref<1x8x4xf32, #tpu.memory_space<vmem>>, vector<1x8x4xf32>
    %1 = vector.shape_cast %0 : vector<1x8x4xf32> to vector<8x4xf32>
    %cst = arith.constant 0.000000e+00 : f32
    %2 = vector.broadcast %cst : f32 to vector<1x4xf32>
    %3 = vector.extract_strided_slice %1 {offsets = [0, 0], sizes = [7, 4], strides = [1, 1]} : vector<8x4xf32> to vector<7x4xf32>
    %4 = tpu.concatenate %2, %3 in 0 : vector<1x4xf32>, vector<7x4xf32> -> vector<8x4xf32>
    %5 = arith.addf %1, %4 : vector<8x4xf32>
    %cst_2 = arith.constant 0.000000e+00 : f32
    %6 = vector.broadcast %cst_2 : f32 to vector<2x4xf32>
    %7 = vector.extract_strided_slice %5 {offsets = [0, 0], sizes = [6, 4], strides = [1, 1]} : vector<8x4xf32> to vector<6x4xf32>
    %8 = tpu.concatenate %6, %7 in 0 : vector<2x4xf32>, vector<6x4xf32> -> vector<8x4xf32>
    %9 = arith.addf %5, %8 : vector<8x4xf32>
    %cst_3 = arith.constant 0.000000e+00 : f32
    %10 = vector.broadcast %cst_3 : f32 to vector<4x4xf32>
    %11 = vector.extract_strided_slice %9 {offsets = [0, 0], sizes = [4, 4], strides = [1, 1]} : vector<8x4xf32> to vector<4x4xf32>
    %12 = tpu.concatenate %10, %11 in 0 : vector<4x4xf32>, vector<4x4xf32> -> vector<8x4xf32>
    %13 = arith.addf %9, %12 : vector<8x4xf32>
    %14 = tpu.iota {dimensions = array<i32: 0>} : vector<8x4xi32>
    %15 = arith.sitofp %14 : vector<8x4xi32> to vector<8x4xf32>
    %16 = vector.extract_strided_slice %13 {offsets = [7, 0], sizes = [1, 4], strides = [1, 1]} : vector<8x4xf32> to vector<1x4xf32>
    %17 = vector.shape_cast %16 : vector<1x4xf32> to vector<1x4xf32>
    %18 = vector.broadcast %17 : vector<1x4xf32> to vector<8x4xf32>
    %c4_i32 = arith.constant 4 : i32
    %19 = vector.broadcast %c4_i32 : i32 to vector<8x4xi32>
    %20 = arith.cmpi sle, %14, %19 : vector<8x4xi32>
    %cst_4 = arith.constant 0.000000e+00 : f32
    %21 = vector.broadcast %cst_4 : f32 to vector<3x4xf32>
    %22 = vector.extract_strided_slice %13 {offsets = [3, 0], sizes = [5, 4], strides = [1, 1]} : vector<8x4xf32> to vector<5x4xf32>
    %23 = tpu.concatenate %22, %21 in 0 : vector<5x4xf32>, vector<3x4xf32> -> vector<8x4xf32>
    %24 = arith.select %20, %23, %18 : vector<8x4xi1>, vector<8x4xf32>
    %cst_5 = arith.constant 0.000000e+00 : f32
    %25 = vector.broadcast %cst_5 : f32 to vector<4x4xf32>
    %26 = vector.extract_strided_slice %13 {offsets = [0, 0], sizes = [4, 4], strides = [1, 1]} : vector<8x4xf32> to vector<4x4xf32>
    %27 = tpu.concatenate %25, %26 in 0 : vector<4x4xf32>, vector<4x4xf32> -> vector<8x4xf32>
    %cst_6 = arith.constant 3.000000e+00 : f32
    %28 = vector.broadcast %cst_6 : f32 to vector<8x4xf32>
    %29 = arith.subf %28, %15 : vector<8x4xf32>
    %cst_7 = arith.constant 0.000000e+00 : f32
    %30 = vector.broadcast %cst_7 : f32 to vector<8x4xf32>
    %31 = arith.maximumf %29, %30 : vector<8x4xf32>
    %cst_8 = arith.constant 3.000000e+00 : f32
    %32 = vector.broadcast %cst_8 : f32 to vector<8x4xf32>
    %33 = arith.addf %15, %32 : vector<8x4xf32>
    %cst_9 = arith.constant 7.000000e+00 : f32
    %34 = vector.broadcast %cst_9 : f32 to vector<8x4xf32>
    %35 = arith.subf %33, %34 : vector<8x4xf32>
    %cst_10 = arith.constant 0.000000e+00 : f32
    %36 = vector.broadcast %cst_10 : f32 to vector<8x4xf32>
    %37 = arith.maximumf %35, %36 : vector<8x4xf32>
    %38 = vector.extract_strided_slice %1 {offsets = [0, 0], sizes = [1, 4], strides = [1, 1]} : vector<8x4xf32> to vector<1x4xf32>
    %39 = vector.shape_cast %38 : vector<1x4xf32> to vector<1x4xf32>
    %40 = vector.broadcast %39 : vector<1x4xf32> to vector<8x4xf32>
    %41 = vector.extract_strided_slice %1 {offsets = [7, 0], sizes = [1, 4], strides = [1, 1]} : vector<8x4xf32> to vector<1x4xf32>
    %42 = vector.shape_cast %41 : vector<1x4xf32> to vector<1x4xf32>
    %43 = vector.broadcast %42 : vector<1x4xf32> to vector<8x4xf32>
    %44 = arith.subf %24, %27 : vector<8x4xf32>
    %45 = arith.mulf %31, %40 : vector<8x4xf32>
    %46 = arith.addf %44, %45 : vector<8x4xf32>
    %47 = arith.mulf %37, %43 : vector<8x4xf32>
    %48 = arith.addf %46, %47 : vector<8x4xf32>
    %cst_11 = arith.constant 7.000000e+00 : f32
    %49 = vector.broadcast %cst_11 : f32 to vector<8x4xf32>
    %50 = arith.divf %48, %49 : vector<8x4xf32>
    %51 = arith.subf %1, %50 : vector<8x4xf32>
    %c0_12 = arith.constant 0 : index
    %c0_13 = arith.constant 0 : index
    %52 = vector.load %arg3[%c0_12, %c0_13] : memref<8x8xf32, #tpu.memory_space<vmem>>, vector<8x8xf32>
    %cst_14 = arith.constant dense<0.000000e+00> : vector<8x4xf32>
    %53 = tpu.matmul %52, %51, %cst_14 {dimension_numbers = #tpu.dot_dimension_numbers<[1], [0], [0], [1], [0, 0, 1, 1], [], []>} : vector<8x8xf32>, vector<8x4xf32>, vector<8x4xf32> -> vector<8x4xf32>
    %c0_15 = arith.constant 0 : index
    %c0_16 = arith.constant 0 : index
    %54 = vector.load %arg4[%c0_15, %c0_16] : memref<8x1xf32, #tpu.memory_space<vmem>>, vector<8x1xf32>
    %55 = vector.broadcast %54 : vector<8x1xf32> to vector<8x4xf32>
    %56 = arith.addf %53, %55 : vector<8x4xf32>
    %57 = vector.shape_cast %56 : vector<8x4xf32> to vector<1x8x4xf32>
    %c0_17 = arith.constant 0 : index
    %c0_18 = arith.constant 0 : index
    %c0_19 = arith.constant 0 : index
    %58 = vector.load %arg6[%c0_17, %c0_18, %c0_19] : memref<1x8x4xf32, #tpu.memory_space<vmem>>, vector<1x8x4xf32>
    tpu.vector_store %arg6[%c0_17, %c0_18, %c0_19], %57 {strides = array<i32>} : memref<1x8x4xf32, #tpu.memory_space<vmem>>, vector<1x8x4xf32>,
    %c0_20 = arith.constant 0 : index
    %c0_21 = arith.constant 0 : index
    %59 = vector.load %arg2[%c0_20, %c0_21] : memref<2x4xf32, #tpu.memory_space<vmem>>, vector<2x4xf32>
    %60 = vector.extract_strided_slice %59 {offsets = [0, 0], sizes = [1, 4], strides = [1, 1]} : vector<2x4xf32> to vector<1x4xf32>
    %61 = vector.extract_strided_slice %59 {offsets = [1, 0], sizes = [1, 4], strides = [1, 1]} : vector<2x4xf32> to vector<1x4xf32>
    %cst_22 = arith.constant dense<0.000000e+00> : vector<4xf32>
    %62 = vector.multi_reduction <add>, %50, %cst_22 [0] : vector<8x4xf32> to vector<4xf32>
    %63 = vector.shape_cast %62 : vector<4xf32> to vector<1x4xf32>
    %cst_23 = arith.constant 8.000000e+00 : f32
    %64 = vector.broadcast %cst_23 : f32 to vector<1x4xf32>
    %65 = arith.divf %63, %64 : vector<1x4xf32>
    %66 = vector.broadcast %65 : vector<1x4xf32> to vector<8x4xf32>
    %67 = arith.subf %50, %66 : vector<8x4xf32>
    %68 = arith.mulf %67, %67 : vector<8x4xf32>
    %cst_24 = arith.constant dense<0.000000e+00> : vector<4xf32>
    %69 = vector.multi_reduction <add>, %68, %cst_24 [0] : vector<8x4xf32> to vector<4xf32>
    %70 = vector.shape_cast %69 : vector<4xf32> to vector<1x4xf32>
    %cst_25 = arith.constant 8.000000e+00 : f32
    %71 = vector.broadcast %cst_25 : f32 to vector<1x4xf32>
    %72 = arith.divf %70, %71 : vector<1x4xf32>
    %cst_26 = arith.constant 9.99999974E-6 : f32
    %73 = vector.broadcast %cst_26 : f32 to vector<1x4xf32>
    %74 = arith.addf %72, %73 : vector<1x4xf32>
    %75 = math.sqrt %74 : vector<1x4xf32>
    %76 = vector.broadcast %65 : vector<1x4xf32> to vector<8x4xf32>
    %77 = arith.subf %50, %76 : vector<8x4xf32>
    %78 = vector.broadcast %75 : vector<1x4xf32> to vector<8x4xf32>
    %79 = arith.divf %77, %78 : vector<8x4xf32>
    %80 = vector.broadcast %60 : vector<1x4xf32> to vector<8x4xf32>
    %81 = arith.mulf %79, %80 : vector<8x4xf32>
    %82 = vector.broadcast %61 : vector<1x4xf32> to vector<8x4xf32>
    %83 = arith.addf %81, %82 : vector<8x4xf32>
    %cst_27 = arith.constant 0.000000e+00 : f32
    %84 = vector.broadcast %cst_27 : f32 to vector<1x4xf32>
    %85 = vector.extract_strided_slice %83 {offsets = [0, 0], sizes = [7, 4], strides = [1, 1]} : vector<8x4xf32> to vector<7x4xf32>
    %86 = tpu.concatenate %84, %85 in 0 : vector<1x4xf32>, vector<7x4xf32> -> vector<8x4xf32>
    %87 = arith.addf %83, %86 : vector<8x4xf32>
    %cst_28 = arith.constant 0.000000e+00 : f32
    %88 = vector.broadcast %cst_28 : f32 to vector<2x4xf32>
    %89 = vector.extract_strided_slice %87 {offsets = [0, 0], sizes = [6, 4], strides = [1, 1]} : vector<8x4xf32> to vector<6x4xf32>
    %90 = tpu.concatenate %88, %89 in 0 : vector<2x4xf32>, vector<6x4xf32> -> vector<8x4xf32>
    %91 = arith.addf %87, %90 : vector<8x4xf32>
    %cst_29 = arith.constant 0.000000e+00 : f32
    %92 = vector.broadcast %cst_29 : f32 to vector<4x4xf32>
    %93 = vector.extract_strided_slice %91 {offsets = [0, 0], sizes = [4, 4], strides = [1, 1]} : vector<8x4xf32> to vector<4x4xf32>
    %94 = tpu.concatenate %92, %93 in 0 : vector<4x4xf32>, vector<4x4xf32> -> vector<8x4xf32>
    %95 = arith.addf %91, %94 : vector<8x4xf32>
    %96 = arith.mulf %83, %83 : vector<8x4xf32>
    %cst_30 = arith.constant 0.000000e+00 : f32
    %97 = vector.broadcast %cst_30 : f32 to vector<1x4xf32>
    %98 = vector.extract_strided_slice %96 {offsets = [0, 0], sizes = [7, 4], strides = [1, 1]} : vector<8x4xf32> to vector<7x4xf32>
    %99 = tpu.concatenate %97, %98 in 0 : vector<1x4xf32>, vector<7x4xf32> -> vector<8x4xf32>
    %100 = arith.addf %96, %99 : vector<8x4xf32>
    %cst_31 = arith.constant 0.000000e+00 : f32
    %101 = vector.broadcast %cst_31 : f32 to vector<2x4xf32>
    %102 = vector.extract_strided_slice %100 {offsets = [0, 0], sizes = [6, 4], strides = [1, 1]} : vector<8x4xf32> to vector<6x4xf32>
    %103 = tpu.concatenate %101, %102 in 0 : vector<2x4xf32>, vector<6x4xf32> -> vector<8x4xf32>
    %104 = arith.addf %100, %103 : vector<8x4xf32>
    %cst_32 = arith.constant 0.000000e+00 : f32
    %105 = vector.broadcast %cst_32 : f32 to vector<4x4xf32>
    %106 = vector.extract_strided_slice %104 {offsets = [0, 0], sizes = [4, 4], strides = [1, 1]} : vector<8x4xf32> to vector<4x4xf32>
    %107 = tpu.concatenate %105, %106 in 0 : vector<4x4xf32>, vector<4x4xf32> -> vector<8x4xf32>
    %108 = arith.addf %104, %107 : vector<8x4xf32>
    %109 = tpu.iota {dimensions = array<i32: 0>} : vector<8x4xi32>
    %110 = arith.sitofp %109 : vector<8x4xi32> to vector<8x4xf32>
    %cst_33 = arith.constant 0.000000e+00 : f32
    %111 = vector.broadcast %cst_33 : f32 to vector<8x4xf32>
    %112 = arith.subf %95, %111 : vector<8x4xf32>
    %cst_34 = arith.constant 0.000000e+00 : f32
    %113 = vector.broadcast %cst_34 : f32 to vector<8x4xf32>
    %114 = arith.subf %108, %113 : vector<8x4xf32>
    %cst_35 = arith.constant 1.000000e+00 : f32
    %115 = vector.broadcast %cst_35 : f32 to vector<8x4xf32>
    %116 = arith.addf %110, %115 : vector<8x4xf32>
    %cst_36 = arith.constant 8.000000e+00 : f32
    %117 = vector.broadcast %cst_36 : f32 to vector<8x4xf32>
    %118 = arith.minimumf %116, %117 : vector<8x4xf32>
    %119 = arith.divf %112, %118 : vector<8x4xf32>
    %120 = arith.divf %114, %118 : vector<8x4xf32>
    %121 = arith.mulf %119, %119 : vector<8x4xf32>
    %122 = arith.subf %120, %121 : vector<8x4xf32>
    %cst_37 = arith.constant 0.000000e+00 : f32
    %123 = vector.broadcast %cst_37 : f32 to vector<8x4xf32>
    %124 = arith.maximumf %122, %123 : vector<8x4xf32>
    %cst_38 = arith.constant 9.99999974E-6 : f32
    %125 = vector.broadcast %cst_38 : f32 to vector<8x4xf32>
    %126 = arith.addf %124, %125 : vector<8x4xf32>
    %127 = math.sqrt %126 : vector<8x4xf32>
    %128 = arith.subf %83, %119 : vector<8x4xf32>
    %129 = arith.divf %128, %127 : vector<8x4xf32>
    %130 = vector.shape_cast %129 : vector<8x4xf32> to vector<1x8x4xf32>
    %c0_39 = arith.constant 0 : index
    %c0_40 = arith.constant 0 : index
    %c0_41 = arith.constant 0 : index
    %131 = vector.load %arg5[%c0_39, %c0_40, %c0_41] : memref<1x8x4xf32, #tpu.memory_space<vmem>>, vector<1x8x4xf32>
    tpu.vector_store %arg5[%c0_39, %c0_40, %c0_41], %130 {strides = array<i32>} : memref<1x8x4xf32, #tpu.memory_space<vmem>>, vector<1x8x4xf32>,
    %132 = vector.extract_strided_slice %119 {offsets = [7, 0], sizes = [1, 4], strides = [1, 1]} : vector<8x4xf32> to vector<1x4xf32>
    %133 = vector.shape_cast %132 : vector<1x4xf32> to vector<1x1x4xf32>
    %c0_42 = arith.constant 0 : index
    %c0_43 = arith.constant 0 : index
    %c0_44 = arith.constant 0 : index
    %134 = vector.load %arg7[%c0_42, %c0_43, %c0_44] : memref<1x1x4xf32, #tpu.memory_space<vmem>>, vector<1x1x4xf32>
    tpu.vector_store %arg7[%c0_42, %c0_43, %c0_44], %133 {strides = array<i32>} : memref<1x1x4xf32, #tpu.memory_space<vmem>>, vector<1x1x4xf32>,
    %135 = vector.extract_strided_slice %127 {offsets = [7, 0], sizes = [1, 4], strides = [1, 1]} : vector<8x4xf32> to vector<1x4xf32>
    %136 = vector.shape_cast %135 : vector<1x4xf32> to vector<1x1x4xf32>
    %c0_45 = arith.constant 0 : index
    %c0_46 = arith.constant 0 : index
    %c0_47 = arith.constant 0 : index
    %137 = vector.load %arg8[%c0_45, %c0_46, %c0_47] : memref<1x1x4xf32, #tpu.memory_space<vmem>>, vector<1x1x4xf32>
    tpu.vector_store %arg8[%c0_45, %c0_46, %c0_47], %136 {strides = array<i32>} : memref<1x1x4xf32, #tpu.memory_space<vmem>>, vector<1x1x4xf32>,
    return
  }
  func.func @transform_0(%arg0: i32) -> (i32, i32, i32) {
    %c0_i32 = arith.constant 0 : i32
    %c0_i32_0 = arith.constant 0 : i32
    %c0_i32_1 = arith.constant 0 : i32
    return %arg0, %c0_i32, %c0_i32_0 : i32, i32, i32
  }
  func.func @transform_1(%arg0: i32) -> (i32, i32) {
    %c0_i32 = arith.constant 0 : i32
    %c0_i32_0 = arith.constant 0 : i32
    %c0_i32_1 = arith.constant 0 : i32
    return %c0_i32, %c0_i32_0 : i32, i32
  }
  func.func @transform_2(%arg0: i32) -> (i32, i32) {
    %c0_i32 = arith.constant 0 : i32
    %c0_i32_0 = arith.constant 0 : i32
    %c0_i32_1 = arith.constant 0 : i32
    return %c0_i32, %c0_i32_0 : i32, i32
  }
  func.func @transform_3(%arg0: i32) -> (i32, i32) {
    %c0_i32 = arith.constant 0 : i32
    %c0_i32_0 = arith.constant 0 : i32
    %c0_i32_1 = arith.constant 0 : i32
    return %c0_i32, %c0_i32_0 : i32, i32
  }
  func.func @transform_4(%arg0: i32) -> (i32, i32, i32) {
    %c0_i32 = arith.constant 0 : i32
    %c0_i32_0 = arith.constant 0 : i32
    %c0_i32_1 = arith.constant 0 : i32
    return %arg0, %c0_i32, %c0_i32_0 : i32, i32, i32
  }
  func.func @transform_5(%arg0: i32) -> (i32, i32, i32) {
    %c0_i32 = arith.constant 0 : i32
    %c0_i32_0 = arith.constant 0 : i32
    %c0_i32_1 = arith.constant 0 : i32
    return %arg0, %c0_i32, %c0_i32_0 : i32, i32, i32
  }
  func.func @transform_6(%arg0: i32) -> (i32, i32, i32) {
    %c0_i32 = arith.constant 0 : i32
    %c0_i32_0 = arith.constant 0 : i32
    %c0_i32_1 = arith.constant 0 : i32
    return %arg0, %c0_i32, %c0_i32_0 : i32, i32, i32
  }
  func.func @transform_7(%arg0: i32) -> (i32, i32, i32) {
    %c0_i32 = arith.constant 0 : i32
    %c0_i32_0 = arith.constant 0 : i32
    %c0_i32_1 = arith.constant 0 : i32
    return %arg0, %c0_i32, %c0_i32_0 : i32, i32, i32
  }
}

module attributes {stable_mosaic.version = 11 : i64} {
  func.func @_decoder_denorm_kernel(%arg0: i32, %arg1: memref<1x8x32xf32, #tpu.memory_space<vmem>>, %arg2: memref<1x8x32xf32, #tpu.memory_space<vmem>>, %arg3: memref<32x32xf32, #tpu.memory_space<vmem>>, %arg4: memref<1x32xf32, #tpu.memory_space<vmem>>, %arg5: memref<32x64xf32, #tpu.memory_space<vmem>>, %arg6: memref<1x64xf32, #tpu.memory_space<vmem>>, %arg7: memref<32x32xf32, #tpu.memory_space<vmem>>, %arg8: memref<1x32xf32, #tpu.memory_space<vmem>>, %arg9: memref<32x64xf32, #tpu.memory_space<vmem>>, %arg10: memref<1x64xf32, #tpu.memory_space<vmem>>, %arg11: memref<64x32xf32, #tpu.memory_space<vmem>>, %arg12: memref<1x32xf32, #tpu.memory_space<vmem>>, %arg13: memref<4x32xf32, #tpu.memory_space<vmem>>, %arg14: memref<32x4xf32, #tpu.memory_space<vmem>>, %arg15: memref<1x4xf32, #tpu.memory_space<vmem>>, %arg16: memref<1x8x4xf32, #tpu.memory_space<vmem>>, %arg17: memref<1x8x4xf32, #tpu.memory_space<vmem>>, %arg18: memref<1x8x4xf32, #tpu.memory_space<vmem>>, %arg19: memref<1x2x4xf32, #tpu.memory_space<vmem>>, %arg20: memref<5x4xf32, #tpu.memory_space<vmem>>, %arg21: memref<1x8x4xf32, #tpu.memory_space<vmem>>, %arg22: memref<1x8x4xf32, #tpu.memory_space<vmem>>) attributes {dimension_semantics = [#tpu.dimension_semantics<parallel>], iteration_bounds = array<i64: 2>, scalar_prefetch = 0 : i64, scratch_operands = 0 : i64, tpu.core_type = #tpu.core_type<tc>, window_params = [{transform_indices = @transform_0, window_bounds = array<i64: 1, 8, 32>}, {transform_indices = @transform_1, window_bounds = array<i64: 1, 8, 32>}, {pipeline_mode = #tpu.pipeline_mode<synchronous>, transform_indices = @transform_2, window_bounds = array<i64: 32, 32>}, {pipeline_mode = #tpu.pipeline_mode<synchronous>, transform_indices = @transform_3, window_bounds = array<i64: 1, 32>}, {pipeline_mode = #tpu.pipeline_mode<synchronous>, transform_indices = @transform_4, window_bounds = array<i64: 32, 64>}, {pipeline_mode = #tpu.pipeline_mode<synchronous>, transform_indices = @transform_5, window_bounds = array<i64: 1, 64>}, {pipeline_mode = #tpu.pipeline_mode<synchronous>, transform_indices = @transform_6, window_bounds = array<i64: 32, 32>}, {pipeline_mode = #tpu.pipeline_mode<synchronous>, transform_indices = @transform_7, window_bounds = array<i64: 1, 32>}, {pipeline_mode = #tpu.pipeline_mode<synchronous>, transform_indices = @transform_8, window_bounds = array<i64: 32, 64>}, {pipeline_mode = #tpu.pipeline_mode<synchronous>, transform_indices = @transform_9, window_bounds = array<i64: 1, 64>}, {pipeline_mode = #tpu.pipeline_mode<synchronous>, transform_indices = @transform_10, window_bounds = array<i64: 64, 32>}, {pipeline_mode = #tpu.pipeline_mode<synchronous>, transform_indices = @transform_11, window_bounds = array<i64: 1, 32>}, {pipeline_mode = #tpu.pipeline_mode<synchronous>, transform_indices = @transform_12, window_bounds = array<i64: 4, 32>}, {pipeline_mode = #tpu.pipeline_mode<synchronous>, transform_indices = @transform_13, window_bounds = array<i64: 32, 4>}, {pipeline_mode = #tpu.pipeline_mode<synchronous>, transform_indices = @transform_14, window_bounds = array<i64: 1, 4>}, {transform_indices = @transform_15, window_bounds = array<i64: 1, 8, 4>}, {transform_indices = @transform_16, window_bounds = array<i64: 1, 8, 4>}, {transform_indices = @transform_17, window_bounds = array<i64: 1, 8, 4>}, {transform_indices = @transform_18, window_bounds = array<i64: 1, 2, 4>}, {pipeline_mode = #tpu.pipeline_mode<synchronous>, transform_indices = @transform_19, window_bounds = array<i64: 5, 4>}, {transform_indices = @transform_20, window_bounds = array<i64: 1, 8, 4>}, {transform_indices = @transform_21, window_bounds = array<i64: 1, 8, 4>}]} {
    %c0 = arith.constant 0 : index
    %c0_0 = arith.constant 0 : index
    %c0_1 = arith.constant 0 : index
    %0 = vector.load %arg1[%c0, %c0_0, %c0_1] : memref<1x8x32xf32, #tpu.memory_space<vmem>>, vector<1x8x32xf32>
    %1 = vector.shape_cast %0 : vector<1x8x32xf32> to vector<8x32xf32>
    %c0_2 = arith.constant 0 : index
    %c0_3 = arith.constant 0 : index
    %c0_4 = arith.constant 0 : index
    %2 = vector.load %arg2[%c0_2, %c0_3, %c0_4] : memref<1x8x32xf32, #tpu.memory_space<vmem>>, vector<1x8x32xf32>
    %3 = vector.shape_cast %2 : vector<1x8x32xf32> to vector<8x32xf32>
    %c0_5 = arith.constant 0 : index
    %c0_6 = arith.constant 0 : index
    %4 = vector.load %arg3[%c0_5, %c0_6] : memref<32x32xf32, #tpu.memory_space<vmem>>, vector<32x32xf32>
    %cst = arith.constant dense<0.000000e+00> : vector<8x32xf32>
    %5 = tpu.matmul %3, %4, %cst {dimension_numbers = #tpu.dot_dimension_numbers<[1], [0], [0], [1], [0, 0, 1, 1], [], []>} : vector<8x32xf32>, vector<32x32xf32>, vector<8x32xf32> -> vector<8x32xf32>
    %c0_7 = arith.constant 0 : index
    %c0_8 = arith.constant 0 : index
    %6 = vector.load %arg4[%c0_7, %c0_8] : memref<1x32xf32, #tpu.memory_space<vmem>>, vector<1x32xf32>
    %7 = vector.broadcast %6 : vector<1x32xf32> to vector<8x32xf32>
    %8 = arith.addf %5, %7 : vector<8x32xf32>
    %c0_9 = arith.constant 0 : index
    %c0_10 = arith.constant 0 : index
    %9 = vector.load %arg5[%c0_9, %c0_10] : memref<32x64xf32, #tpu.memory_space<vmem>>, vector<32x64xf32>
    %cst_11 = arith.constant dense<0.000000e+00> : vector<8x64xf32>
    %10 = tpu.matmul %1, %9, %cst_11 {dimension_numbers = #tpu.dot_dimension_numbers<[1], [0], [0], [1], [0, 0, 1, 1], [], []>} : vector<8x32xf32>, vector<32x64xf32>, vector<8x64xf32> -> vector<8x64xf32>
    %c0_12 = arith.constant 0 : index
    %c0_13 = arith.constant 0 : index
    %11 = vector.load %arg6[%c0_12, %c0_13] : memref<1x64xf32, #tpu.memory_space<vmem>>, vector<1x64xf32>
    %12 = vector.broadcast %11 : vector<1x64xf32> to vector<8x64xf32>
    %13 = arith.addf %10, %12 : vector<8x64xf32>
    %14 = vector.extract_strided_slice %13 {offsets = [0, 0], sizes = [8, 32], strides = [1, 1]} : vector<8x64xf32> to vector<8x32xf32>
    %15 = vector.extract_strided_slice %13 {offsets = [0, 32], sizes = [8, 32], strides = [1, 1]} : vector<8x64xf32> to vector<8x32xf32>
    %16 = vector.extract_strided_slice %8 {offsets = [0, 0], sizes = [8, 8], strides = [1, 1]} : vector<8x32xf32> to vector<8x8xf32>
    %17 = vector.extract_strided_slice %14 {offsets = [0, 0], sizes = [8, 8], strides = [1, 1]} : vector<8x32xf32> to vector<8x8xf32>
    %18 = vector.extract_strided_slice %15 {offsets = [0, 0], sizes = [8, 8], strides = [1, 1]} : vector<8x32xf32> to vector<8x8xf32>
    %cst_14 = arith.constant dense<0.000000e+00> : vector<8x8xf32>
    %19 = tpu.matmul %16, %17, %cst_14 {dimension_numbers = #tpu.dot_dimension_numbers<[1], [1], [0], [0], [0, 0, 1, 0], [], []>} : vector<8x8xf32>, vector<8x8xf32>, vector<8x8xf32> -> vector<8x8xf32>
    %cst_15 = arith.constant 0.353553385 : f32
    %20 = vector.broadcast %cst_15 : f32 to vector<8x8xf32>
    %21 = arith.mulf %19, %20 : vector<8x8xf32>
    %cst_16 = arith.constant dense<0xFF800000> : vector<8xf32>
    %22 = vector.multi_reduction <maximumf>, %21, %cst_16 [1] : vector<8x8xf32> to vector<8xf32>
    %23 = vector.shape_cast %22 : vector<8xf32> to vector<8x1xf32>
    %24 = vector.broadcast %23 : vector<8x1xf32> to vector<8x8xf32>
    %25 = arith.subf %21, %24 : vector<8x8xf32>
    %26 = math.exp %25 : vector<8x8xf32>
    %cst_17 = arith.constant dense<0.000000e+00> : vector<8xf32>
    %27 = vector.multi_reduction <add>, %26, %cst_17 [1] : vector<8x8xf32> to vector<8xf32>
    %28 = vector.shape_cast %27 : vector<8xf32> to vector<8x1xf32>
    %29 = vector.broadcast %28 : vector<8x1xf32> to vector<8x8xf32>
    %30 = arith.divf %26, %29 : vector<8x8xf32>
    %cst_18 = arith.constant dense<0.000000e+00> : vector<8x8xf32>
    %31 = tpu.matmul %30, %18, %cst_18 {dimension_numbers = #tpu.dot_dimension_numbers<[1], [0], [0], [1], [0, 0, 1, 1], [], []>} : vector<8x8xf32>, vector<8x8xf32>, vector<8x8xf32> -> vector<8x8xf32>
    %32 = vector.extract_strided_slice %8 {offsets = [0, 8], sizes = [8, 8], strides = [1, 1]} : vector<8x32xf32> to vector<8x8xf32>
    %33 = vector.extract_strided_slice %14 {offsets = [0, 8], sizes = [8, 8], strides = [1, 1]} : vector<8x32xf32> to vector<8x8xf32>
    %34 = vector.extract_strided_slice %15 {offsets = [0, 8], sizes = [8, 8], strides = [1, 1]} : vector<8x32xf32> to vector<8x8xf32>
    %cst_19 = arith.constant dense<0.000000e+00> : vector<8x8xf32>
    %35 = tpu.matmul %32, %33, %cst_19 {dimension_numbers = #tpu.dot_dimension_numbers<[1], [1], [0], [0], [0, 0, 1, 0], [], []>} : vector<8x8xf32>, vector<8x8xf32>, vector<8x8xf32> -> vector<8x8xf32>
    %cst_20 = arith.constant 0.353553385 : f32
    %36 = vector.broadcast %cst_20 : f32 to vector<8x8xf32>
    %37 = arith.mulf %35, %36 : vector<8x8xf32>
    %cst_21 = arith.constant dense<0xFF800000> : vector<8xf32>
    %38 = vector.multi_reduction <maximumf>, %37, %cst_21 [1] : vector<8x8xf32> to vector<8xf32>
    %39 = vector.shape_cast %38 : vector<8xf32> to vector<8x1xf32>
    %40 = vector.broadcast %39 : vector<8x1xf32> to vector<8x8xf32>
    %41 = arith.subf %37, %40 : vector<8x8xf32>
    %42 = math.exp %41 : vector<8x8xf32>
    %cst_22 = arith.constant dense<0.000000e+00> : vector<8xf32>
    %43 = vector.multi_reduction <add>, %42, %cst_22 [1] : vector<8x8xf32> to vector<8xf32>
    %44 = vector.shape_cast %43 : vector<8xf32> to vector<8x1xf32>
    %45 = vector.broadcast %44 : vector<8x1xf32> to vector<8x8xf32>
    %46 = arith.divf %42, %45 : vector<8x8xf32>
    %cst_23 = arith.constant dense<0.000000e+00> : vector<8x8xf32>
    %47 = tpu.matmul %46, %34, %cst_23 {dimension_numbers = #tpu.dot_dimension_numbers<[1], [0], [0], [1], [0, 0, 1, 1], [], []>} : vector<8x8xf32>, vector<8x8xf32>, vector<8x8xf32> -> vector<8x8xf32>
    %48 = vector.extract_strided_slice %8 {offsets = [0, 16], sizes = [8, 8], strides = [1, 1]} : vector<8x32xf32> to vector<8x8xf32>
    %49 = vector.extract_strided_slice %14 {offsets = [0, 16], sizes = [8, 8], strides = [1, 1]} : vector<8x32xf32> to vector<8x8xf32>
    %50 = vector.extract_strided_slice %15 {offsets = [0, 16], sizes = [8, 8], strides = [1, 1]} : vector<8x32xf32> to vector<8x8xf32>
    %cst_24 = arith.constant dense<0.000000e+00> : vector<8x8xf32>
    %51 = tpu.matmul %48, %49, %cst_24 {dimension_numbers = #tpu.dot_dimension_numbers<[1], [1], [0], [0], [0, 0, 1, 0], [], []>} : vector<8x8xf32>, vector<8x8xf32>, vector<8x8xf32> -> vector<8x8xf32>
    %cst_25 = arith.constant 0.353553385 : f32
    %52 = vector.broadcast %cst_25 : f32 to vector<8x8xf32>
    %53 = arith.mulf %51, %52 : vector<8x8xf32>
    %cst_26 = arith.constant dense<0xFF800000> : vector<8xf32>
    %54 = vector.multi_reduction <maximumf>, %53, %cst_26 [1] : vector<8x8xf32> to vector<8xf32>
    %55 = vector.shape_cast %54 : vector<8xf32> to vector<8x1xf32>
    %56 = vector.broadcast %55 : vector<8x1xf32> to vector<8x8xf32>
    %57 = arith.subf %53, %56 : vector<8x8xf32>
    %58 = math.exp %57 : vector<8x8xf32>
    %cst_27 = arith.constant dense<0.000000e+00> : vector<8xf32>
    %59 = vector.multi_reduction <add>, %58, %cst_27 [1] : vector<8x8xf32> to vector<8xf32>
    %60 = vector.shape_cast %59 : vector<8xf32> to vector<8x1xf32>
    %61 = vector.broadcast %60 : vector<8x1xf32> to vector<8x8xf32>
    %62 = arith.divf %58, %61 : vector<8x8xf32>
    %cst_28 = arith.constant dense<0.000000e+00> : vector<8x8xf32>
    %63 = tpu.matmul %62, %50, %cst_28 {dimension_numbers = #tpu.dot_dimension_numbers<[1], [0], [0], [1], [0, 0, 1, 1], [], []>} : vector<8x8xf32>, vector<8x8xf32>, vector<8x8xf32> -> vector<8x8xf32>
    %64 = vector.extract_strided_slice %8 {offsets = [0, 24], sizes = [8, 8], strides = [1, 1]} : vector<8x32xf32> to vector<8x8xf32>
    %65 = vector.extract_strided_slice %14 {offsets = [0, 24], sizes = [8, 8], strides = [1, 1]} : vector<8x32xf32> to vector<8x8xf32>
    %66 = vector.extract_strided_slice %15 {offsets = [0, 24], sizes = [8, 8], strides = [1, 1]} : vector<8x32xf32> to vector<8x8xf32>
    %cst_29 = arith.constant dense<0.000000e+00> : vector<8x8xf32>
    %67 = tpu.matmul %64, %65, %cst_29 {dimension_numbers = #tpu.dot_dimension_numbers<[1], [1], [0], [0], [0, 0, 1, 0], [], []>} : vector<8x8xf32>, vector<8x8xf32>, vector<8x8xf32> -> vector<8x8xf32>
    %cst_30 = arith.constant 0.353553385 : f32
    %68 = vector.broadcast %cst_30 : f32 to vector<8x8xf32>
    %69 = arith.mulf %67, %68 : vector<8x8xf32>
    %cst_31 = arith.constant dense<0xFF800000> : vector<8xf32>
    %70 = vector.multi_reduction <maximumf>, %69, %cst_31 [1] : vector<8x8xf32> to vector<8xf32>
    %71 = vector.shape_cast %70 : vector<8xf32> to vector<8x1xf32>
    %72 = vector.broadcast %71 : vector<8x1xf32> to vector<8x8xf32>
    %73 = arith.subf %69, %72 : vector<8x8xf32>
    %74 = math.exp %73 : vector<8x8xf32>
    %cst_32 = arith.constant dense<0.000000e+00> : vector<8xf32>
    %75 = vector.multi_reduction <add>, %74, %cst_32 [1] : vector<8x8xf32> to vector<8xf32>
    %76 = vector.shape_cast %75 : vector<8xf32> to vector<8x1xf32>
    %77 = vector.broadcast %76 : vector<8x1xf32> to vector<8x8xf32>
    %78 = arith.divf %74, %77 : vector<8x8xf32>
    %cst_33 = arith.constant dense<0.000000e+00> : vector<8x8xf32>
    %79 = tpu.matmul %78, %66, %cst_33 {dimension_numbers = #tpu.dot_dimension_numbers<[1], [0], [0], [1], [0, 0, 1, 1], [], []>} : vector<8x8xf32>, vector<8x8xf32>, vector<8x8xf32> -> vector<8x8xf32>
    %80 = tpu.concatenate %31, %47, %63, %79 in 1 : vector<8x8xf32>, vector<8x8xf32>, vector<8x8xf32>, vector<8x8xf32> -> vector<8x32xf32>
    %c0_34 = arith.constant 0 : index
    %c0_35 = arith.constant 0 : index
    %81 = vector.load %arg7[%c0_34, %c0_35] : memref<32x32xf32, #tpu.memory_space<vmem>>, vector<32x32xf32>
    %cst_36 = arith.constant dense<0.000000e+00> : vector<8x32xf32>
    %82 = tpu.matmul %80, %81, %cst_36 {dimension_numbers = #tpu.dot_dimension_numbers<[1], [0], [0], [1], [0, 0, 1, 1], [], []>} : vector<8x32xf32>, vector<32x32xf32>, vector<8x32xf32> -> vector<8x32xf32>
    %c0_37 = arith.constant 0 : index
    %c0_38 = arith.constant 0 : index
    %83 = vector.load %arg8[%c0_37, %c0_38] : memref<1x32xf32, #tpu.memory_space<vmem>>, vector<1x32xf32>
    %84 = vector.broadcast %83 : vector<1x32xf32> to vector<8x32xf32>
    %85 = arith.addf %82, %84 : vector<8x32xf32>
    %c0_39 = arith.constant 0 : index
    %c0_40 = arith.constant 0 : index
    %86 = vector.load %arg13[%c0_39, %c0_40] : memref<4x32xf32, #tpu.memory_space<vmem>>, vector<4x32xf32>
    %87 = arith.addf %3, %85 : vector<8x32xf32>
    %88 = vector.extract_strided_slice %86 {offsets = [0, 0], sizes = [1, 32], strides = [1, 1]} : vector<4x32xf32> to vector<1x32xf32>
    %89 = vector.extract_strided_slice %86 {offsets = [1, 0], sizes = [1, 32], strides = [1, 1]} : vector<4x32xf32> to vector<1x32xf32>
    %cst_41 = arith.constant dense<0.000000e+00> : vector<8xf32>
    %90 = vector.multi_reduction <add>, %87, %cst_41 [1] : vector<8x32xf32> to vector<8xf32>
    %91 = vector.shape_cast %90 : vector<8xf32> to vector<8x1xf32>
    %cst_42 = arith.constant 3.200000e+01 : f32
    %92 = vector.broadcast %cst_42 : f32 to vector<8x1xf32>
    %93 = arith.divf %91, %92 : vector<8x1xf32>
    %94 = vector.broadcast %93 : vector<8x1xf32> to vector<8x32xf32>
    %95 = arith.subf %87, %94 : vector<8x32xf32>
    %96 = arith.mulf %95, %95 : vector<8x32xf32>
    %cst_43 = arith.constant dense<0.000000e+00> : vector<8xf32>
    %97 = vector.multi_reduction <add>, %96, %cst_43 [1] : vector<8x32xf32> to vector<8xf32>
    %98 = vector.shape_cast %97 : vector<8xf32> to vector<8x1xf32>
    %cst_44 = arith.constant 3.200000e+01 : f32
    %99 = vector.broadcast %cst_44 : f32 to vector<8x1xf32>
    %100 = arith.divf %98, %99 : vector<8x1xf32>
    %101 = vector.broadcast %93 : vector<8x1xf32> to vector<8x32xf32>
    %102 = arith.subf %87, %101 : vector<8x32xf32>
    %cst_45 = arith.constant 9.99999974E-6 : f32
    %103 = vector.broadcast %cst_45 : f32 to vector<8x1xf32>
    %104 = arith.addf %100, %103 : vector<8x1xf32>
    %105 = math.rsqrt %104 : vector<8x1xf32>
    %106 = vector.broadcast %105 : vector<8x1xf32> to vector<8x32xf32>
    %107 = arith.mulf %102, %106 : vector<8x32xf32>
    %108 = vector.broadcast %88 : vector<1x32xf32> to vector<8x32xf32>
    %109 = arith.mulf %107, %108 : vector<8x32xf32>
    %110 = vector.broadcast %89 : vector<1x32xf32> to vector<8x32xf32>
    %111 = arith.addf %109, %110 : vector<8x32xf32>
    %c0_46 = arith.constant 0 : index
    %c0_47 = arith.constant 0 : index
    %112 = vector.load %arg9[%c0_46, %c0_47] : memref<32x64xf32, #tpu.memory_space<vmem>>, vector<32x64xf32>
    %cst_48 = arith.constant dense<0.000000e+00> : vector<8x64xf32>
    %113 = tpu.matmul %111, %112, %cst_48 {dimension_numbers = #tpu.dot_dimension_numbers<[1], [0], [0], [1], [0, 0, 1, 1], [], []>} : vector<8x32xf32>, vector<32x64xf32>, vector<8x64xf32> -> vector<8x64xf32>
    %c0_49 = arith.constant 0 : index
    %c0_50 = arith.constant 0 : index
    %114 = vector.load %arg10[%c0_49, %c0_50] : memref<1x64xf32, #tpu.memory_space<vmem>>, vector<1x64xf32>
    %115 = vector.broadcast %114 : vector<1x64xf32> to vector<8x64xf32>
    %116 = arith.addf %113, %115 : vector<8x64xf32>
    %cst_51 = arith.constant 0.000000e+00 : f32
    %117 = vector.broadcast %cst_51 : f32 to vector<8x64xf32>
    %118 = arith.cmpf ogt, %116, %117 : vector<8x64xf32>
    %cst_52 = arith.constant 0.000000e+00 : f32
    %119 = vector.broadcast %cst_52 : f32 to vector<8x64xf32>
    %120 = arith.minimumf %116, %119 : vector<8x64xf32>
    %121 = math.exp %120 : vector<8x64xf32>
    %cst_53 = arith.constant 1.000000e+00 : f32
    %122 = vector.broadcast %cst_53 : f32 to vector<8x64xf32>
    %123 = arith.subf %121, %122 : vector<8x64xf32>
    %124 = arith.select %118, %116, %123 : vector<8x64xi1>, vector<8x64xf32>
    %c0_54 = arith.constant 0 : index
    %c0_55 = arith.constant 0 : index
    %125 = vector.load %arg11[%c0_54, %c0_55] : memref<64x32xf32, #tpu.memory_space<vmem>>, vector<64x32xf32>
    %cst_56 = arith.constant dense<0.000000e+00> : vector<8x32xf32>
    %126 = tpu.matmul %124, %125, %cst_56 {dimension_numbers = #tpu.dot_dimension_numbers<[1], [0], [0], [1], [0, 0, 1, 1], [], []>} : vector<8x64xf32>, vector<64x32xf32>, vector<8x32xf32> -> vector<8x32xf32>
    %c0_57 = arith.constant 0 : index
    %c0_58 = arith.constant 0 : index
    %127 = vector.load %arg12[%c0_57, %c0_58] : memref<1x32xf32, #tpu.memory_space<vmem>>, vector<1x32xf32>
    %128 = vector.broadcast %127 : vector<1x32xf32> to vector<8x32xf32>
    %129 = arith.addf %126, %128 : vector<8x32xf32>
    %130 = arith.addf %111, %129 : vector<8x32xf32>
    %131 = vector.extract_strided_slice %86 {offsets = [2, 0], sizes = [1, 32], strides = [1, 1]} : vector<4x32xf32> to vector<1x32xf32>
    %132 = vector.extract_strided_slice %86 {offsets = [3, 0], sizes = [1, 32], strides = [1, 1]} : vector<4x32xf32> to vector<1x32xf32>
    %cst_59 = arith.constant dense<0.000000e+00> : vector<8xf32>
    %133 = vector.multi_reduction <add>, %130, %cst_59 [1] : vector<8x32xf32> to vector<8xf32>
    %134 = vector.shape_cast %133 : vector<8xf32> to vector<8x1xf32>
    %cst_60 = arith.constant 3.200000e+01 : f32
    %135 = vector.broadcast %cst_60 : f32 to vector<8x1xf32>
    %136 = arith.divf %134, %135 : vector<8x1xf32>
    %137 = vector.broadcast %136 : vector<8x1xf32> to vector<8x32xf32>
    %138 = arith.subf %130, %137 : vector<8x32xf32>
    %139 = arith.mulf %138, %138 : vector<8x32xf32>
    %cst_61 = arith.constant dense<0.000000e+00> : vector<8xf32>
    %140 = vector.multi_reduction <add>, %139, %cst_61 [1] : vector<8x32xf32> to vector<8xf32>
    %141 = vector.shape_cast %140 : vector<8xf32> to vector<8x1xf32>
    %cst_62 = arith.constant 3.200000e+01 : f32
    %142 = vector.broadcast %cst_62 : f32 to vector<8x1xf32>
    %143 = arith.divf %141, %142 : vector<8x1xf32>
    %144 = vector.broadcast %136 : vector<8x1xf32> to vector<8x32xf32>
    %145 = arith.subf %130, %144 : vector<8x32xf32>
    %cst_63 = arith.constant 9.99999974E-6 : f32
    %146 = vector.broadcast %cst_63 : f32 to vector<8x1xf32>
    %147 = arith.addf %143, %146 : vector<8x1xf32>
    %148 = math.rsqrt %147 : vector<8x1xf32>
    %149 = vector.broadcast %148 : vector<8x1xf32> to vector<8x32xf32>
    %150 = arith.mulf %145, %149 : vector<8x32xf32>
    %151 = vector.broadcast %131 : vector<1x32xf32> to vector<8x32xf32>
    %152 = arith.mulf %150, %151 : vector<8x32xf32>
    %153 = vector.broadcast %132 : vector<1x32xf32> to vector<8x32xf32>
    %154 = arith.addf %152, %153 : vector<8x32xf32>
    %c0_64 = arith.constant 0 : index
    %c0_65 = arith.constant 0 : index
    %155 = vector.load %arg14[%c0_64, %c0_65] : memref<32x4xf32, #tpu.memory_space<vmem>>, vector<32x4xf32>
    %cst_66 = arith.constant dense<0.000000e+00> : vector<8x4xf32>
    %156 = tpu.matmul %154, %155, %cst_66 {dimension_numbers = #tpu.dot_dimension_numbers<[1], [0], [0], [1], [0, 0, 1, 1], [], []>} : vector<8x32xf32>, vector<32x4xf32>, vector<8x4xf32> -> vector<8x4xf32>
    %c0_67 = arith.constant 0 : index
    %c0_68 = arith.constant 0 : index
    %157 = vector.load %arg15[%c0_67, %c0_68] : memref<1x4xf32, #tpu.memory_space<vmem>>, vector<1x4xf32>
    %158 = vector.broadcast %157 : vector<1x4xf32> to vector<8x4xf32>
    %159 = arith.addf %156, %158 : vector<8x4xf32>
    %c0_69 = arith.constant 0 : index
    %c0_70 = arith.constant 0 : index
    %160 = vector.load %arg20[%c0_69, %c0_70] : memref<5x4xf32, #tpu.memory_space<vmem>>, vector<5x4xf32>
    %161 = vector.extract_strided_slice %160 {offsets = [0, 0], sizes = [1, 4], strides = [1, 1]} : vector<5x4xf32> to vector<1x4xf32>
    %162 = vector.extract_strided_slice %160 {offsets = [1, 0], sizes = [1, 4], strides = [1, 1]} : vector<5x4xf32> to vector<1x4xf32>
    %163 = vector.extract_strided_slice %160 {offsets = [2, 0], sizes = [1, 4], strides = [1, 1]} : vector<5x4xf32> to vector<1x4xf32>
    %164 = vector.extract_strided_slice %160 {offsets = [3, 0], sizes = [1, 4], strides = [1, 1]} : vector<5x4xf32> to vector<1x4xf32>
    %165 = vector.extract_strided_slice %160 {offsets = [4, 0], sizes = [1, 4], strides = [1, 1]} : vector<5x4xf32> to vector<1x4xf32>
    %c0_71 = arith.constant 0 : index
    %c0_72 = arith.constant 0 : index
    %c0_73 = arith.constant 0 : index
    %166 = vector.load %arg19[%c0_71, %c0_72, %c0_73] : memref<1x2x4xf32, #tpu.memory_space<vmem>>, vector<1x2x4xf32>
    %167 = vector.shape_cast %166 : vector<1x2x4xf32> to vector<2x4xf32>
    %168 = vector.extract_strided_slice %167 {offsets = [0, 0], sizes = [1, 4], strides = [1, 1]} : vector<2x4xf32> to vector<1x4xf32>
    %169 = vector.extract_strided_slice %167 {offsets = [1, 0], sizes = [1, 4], strides = [1, 1]} : vector<2x4xf32> to vector<1x4xf32>
    %170 = vector.broadcast %162 : vector<1x4xf32> to vector<8x4xf32>
    %171 = arith.subf %159, %170 : vector<8x4xf32>
    %cst_74 = arith.constant 1.000000e-10 : f32
    %172 = vector.broadcast %cst_74 : f32 to vector<1x4xf32>
    %173 = arith.addf %161, %172 : vector<1x4xf32>
    %174 = vector.broadcast %173 : vector<1x4xf32> to vector<8x4xf32>
    %175 = arith.divf %171, %174 : vector<8x4xf32>
    %c0_75 = arith.constant 0 : index
    %c0_76 = arith.constant 0 : index
    %c0_77 = arith.constant 0 : index
    %176 = vector.load %arg16[%c0_75, %c0_76, %c0_77] : memref<1x8x4xf32, #tpu.memory_space<vmem>>, vector<1x8x4xf32>
    %177 = vector.shape_cast %176 : vector<1x8x4xf32> to vector<8x4xf32>
    %178 = arith.mulf %175, %177 : vector<8x4xf32>
    %c0_78 = arith.constant 0 : index
    %c0_79 = arith.constant 0 : index
    %c0_80 = arith.constant 0 : index
    %179 = vector.load %arg17[%c0_78, %c0_79, %c0_80] : memref<1x8x4xf32, #tpu.memory_space<vmem>>, vector<1x8x4xf32>
    %180 = vector.shape_cast %179 : vector<1x8x4xf32> to vector<8x4xf32>
    %181 = arith.addf %178, %180 : vector<8x4xf32>
    %182 = vector.broadcast %164 : vector<1x4xf32> to vector<8x4xf32>
    %183 = arith.subf %181, %182 : vector<8x4xf32>
    %cst_81 = arith.constant 1.000000e-10 : f32
    %184 = vector.broadcast %cst_81 : f32 to vector<1x4xf32>
    %185 = arith.addf %163, %184 : vector<1x4xf32>
    %186 = vector.broadcast %185 : vector<1x4xf32> to vector<8x4xf32>
    %187 = arith.divf %183, %186 : vector<8x4xf32>
    %188 = vector.broadcast %169 : vector<1x4xf32> to vector<8x4xf32>
    %189 = arith.mulf %187, %188 : vector<8x4xf32>
    %190 = vector.broadcast %168 : vector<1x4xf32> to vector<8x4xf32>
    %191 = arith.addf %189, %190 : vector<8x4xf32>
    %192 = vector.shape_cast %191 : vector<8x4xf32> to vector<1x8x4xf32>
    %c0_82 = arith.constant 0 : index
    %c0_83 = arith.constant 0 : index
    %c0_84 = arith.constant 0 : index
    %193 = vector.load %arg22[%c0_82, %c0_83, %c0_84] : memref<1x8x4xf32, #tpu.memory_space<vmem>>, vector<1x8x4xf32>
    tpu.vector_store %arg22[%c0_82, %c0_83, %c0_84], %192 {strides = array<i32>} : memref<1x8x4xf32, #tpu.memory_space<vmem>>, vector<1x8x4xf32>,
    %c0_85 = arith.constant 0 : index
    %c0_86 = arith.constant 0 : index
    %c0_87 = arith.constant 0 : index
    %194 = vector.load %arg18[%c0_85, %c0_86, %c0_87] : memref<1x8x4xf32, #tpu.memory_space<vmem>>, vector<1x8x4xf32>
    %195 = vector.shape_cast %194 : vector<1x8x4xf32> to vector<8x4xf32>
    %196 = vector.broadcast %165 : vector<1x4xf32> to vector<8x4xf32>
    %197 = arith.mulf %196, %195 : vector<8x4xf32>
    %198 = arith.addf %191, %197 : vector<8x4xf32>
    %199 = vector.shape_cast %198 : vector<8x4xf32> to vector<1x8x4xf32>
    %c0_88 = arith.constant 0 : index
    %c0_89 = arith.constant 0 : index
    %c0_90 = arith.constant 0 : index
    %200 = vector.load %arg21[%c0_88, %c0_89, %c0_90] : memref<1x8x4xf32, #tpu.memory_space<vmem>>, vector<1x8x4xf32>
    tpu.vector_store %arg21[%c0_88, %c0_89, %c0_90], %199 {strides = array<i32>} : memref<1x8x4xf32, #tpu.memory_space<vmem>>, vector<1x8x4xf32>,
    return
  }
  func.func @transform_0(%arg0: i32) -> (i32, i32, i32) {
    %c0_i32 = arith.constant 0 : i32
    %c0_i32_0 = arith.constant 0 : i32
    %c0_i32_1 = arith.constant 0 : i32
    return %arg0, %c0_i32, %c0_i32_0 : i32, i32, i32
  }
  func.func @transform_1(%arg0: i32) -> (i32, i32, i32) {
    %c0_i32 = arith.constant 0 : i32
    %c0_i32_0 = arith.constant 0 : i32
    %c0_i32_1 = arith.constant 0 : i32
    return %arg0, %c0_i32, %c0_i32_0 : i32, i32, i32
  }
  func.func @transform_2(%arg0: i32) -> (i32, i32) {
    %c0_i32 = arith.constant 0 : i32
    %c0_i32_0 = arith.constant 0 : i32
    %c0_i32_1 = arith.constant 0 : i32
    return %c0_i32, %c0_i32_0 : i32, i32
  }
  func.func @transform_3(%arg0: i32) -> (i32, i32) {
    %c0_i32 = arith.constant 0 : i32
    %c0_i32_0 = arith.constant 0 : i32
    %c0_i32_1 = arith.constant 0 : i32
    return %c0_i32, %c0_i32_0 : i32, i32
  }
  func.func @transform_4(%arg0: i32) -> (i32, i32) {
    %c0_i32 = arith.constant 0 : i32
    %c0_i32_0 = arith.constant 0 : i32
    %c0_i32_1 = arith.constant 0 : i32
    return %c0_i32, %c0_i32_0 : i32, i32
  }
  func.func @transform_5(%arg0: i32) -> (i32, i32) {
    %c0_i32 = arith.constant 0 : i32
    %c0_i32_0 = arith.constant 0 : i32
    %c0_i32_1 = arith.constant 0 : i32
    return %c0_i32, %c0_i32_0 : i32, i32
  }
  func.func @transform_6(%arg0: i32) -> (i32, i32) {
    %c0_i32 = arith.constant 0 : i32
    %c0_i32_0 = arith.constant 0 : i32
    %c0_i32_1 = arith.constant 0 : i32
    return %c0_i32, %c0_i32_0 : i32, i32
  }
  func.func @transform_7(%arg0: i32) -> (i32, i32) {
    %c0_i32 = arith.constant 0 : i32
    %c0_i32_0 = arith.constant 0 : i32
    %c0_i32_1 = arith.constant 0 : i32
    return %c0_i32, %c0_i32_0 : i32, i32
  }
  func.func @transform_8(%arg0: i32) -> (i32, i32) {
    %c0_i32 = arith.constant 0 : i32
    %c0_i32_0 = arith.constant 0 : i32
    %c0_i32_1 = arith.constant 0 : i32
    return %c0_i32, %c0_i32_0 : i32, i32
  }
  func.func @transform_9(%arg0: i32) -> (i32, i32) {
    %c0_i32 = arith.constant 0 : i32
    %c0_i32_0 = arith.constant 0 : i32
    %c0_i32_1 = arith.constant 0 : i32
    return %c0_i32, %c0_i32_0 : i32, i32
  }
  func.func @transform_10(%arg0: i32) -> (i32, i32) {
    %c0_i32 = arith.constant 0 : i32
    %c0_i32_0 = arith.constant 0 : i32
    %c0_i32_1 = arith.constant 0 : i32
    return %c0_i32, %c0_i32_0 : i32, i32
  }
  func.func @transform_11(%arg0: i32) -> (i32, i32) {
    %c0_i32 = arith.constant 0 : i32
    %c0_i32_0 = arith.constant 0 : i32
    %c0_i32_1 = arith.constant 0 : i32
    return %c0_i32, %c0_i32_0 : i32, i32
  }
  func.func @transform_12(%arg0: i32) -> (i32, i32) {
    %c0_i32 = arith.constant 0 : i32
    %c0_i32_0 = arith.constant 0 : i32
    %c0_i32_1 = arith.constant 0 : i32
    return %c0_i32, %c0_i32_0 : i32, i32
  }
  func.func @transform_13(%arg0: i32) -> (i32, i32) {
    %c0_i32 = arith.constant 0 : i32
    %c0_i32_0 = arith.constant 0 : i32
    %c0_i32_1 = arith.constant 0 : i32
    return %c0_i32, %c0_i32_0 : i32, i32
  }
  func.func @transform_14(%arg0: i32) -> (i32, i32) {
    %c0_i32 = arith.constant 0 : i32
    %c0_i32_0 = arith.constant 0 : i32
    %c0_i32_1 = arith.constant 0 : i32
    return %c0_i32, %c0_i32_0 : i32, i32
  }
  func.func @transform_15(%arg0: i32) -> (i32, i32, i32) {
    %c0_i32 = arith.constant 0 : i32
    %c0_i32_0 = arith.constant 0 : i32
    %c0_i32_1 = arith.constant 0 : i32
    return %arg0, %c0_i32, %c0_i32_0 : i32, i32, i32
  }
  func.func @transform_16(%arg0: i32) -> (i32, i32, i32) {
    %c0_i32 = arith.constant 0 : i32
    %c0_i32_0 = arith.constant 0 : i32
    %c0_i32_1 = arith.constant 0 : i32
    return %arg0, %c0_i32, %c0_i32_0 : i32, i32, i32
  }
  func.func @transform_17(%arg0: i32) -> (i32, i32, i32) {
    %c0_i32 = arith.constant 0 : i32
    %c0_i32_0 = arith.constant 0 : i32
    %c0_i32_1 = arith.constant 0 : i32
    return %arg0, %c0_i32, %c0_i32_0 : i32, i32, i32
  }
  func.func @transform_18(%arg0: i32) -> (i32, i32, i32) {
    %c0_i32 = arith.constant 0 : i32
    %c0_i32_0 = arith.constant 0 : i32
    %c0_i32_1 = arith.constant 0 : i32
    return %arg0, %c0_i32, %c0_i32_0 : i32, i32, i32
  }
  func.func @transform_19(%arg0: i32) -> (i32, i32) {
    %c0_i32 = arith.constant 0 : i32
    %c0_i32_0 = arith.constant 0 : i32
    %c0_i32_1 = arith.constant 0 : i32
    return %c0_i32, %c0_i32_0 : i32, i32
  }
  func.func @transform_20(%arg0: i32) -> (i32, i32, i32) {
    %c0_i32 = arith.constant 0 : i32
    %c0_i32_0 = arith.constant 0 : i32
    %c0_i32_1 = arith.constant 0 : i32
    return %arg0, %c0_i32, %c0_i32_0 : i32, i32, i32
  }
  func.func @transform_21(%arg0: i32) -> (i32, i32, i32) {
    %c0_i32 = arith.constant 0 : i32
    %c0_i32_0 = arith.constant 0 : i32
    %c0_i32_1 = arith.constant 0 : i32
    return %arg0, %c0_i32, %c0_i32_0 : i32, i32, i32
  }
}

</mosaic_0001>

<bundles_post_ra>
// kernel: separateformer_forward.6
= control target key start
LH: loop header
LB: loop body
LE: loop exit
PB: predicated region body
PF: predicated region fallthrough
CT: control target
= control target key end

     0   :  { %s704_s21 = smov 0   ;;  %s786_s0 = inlined_call_operand.vmem [shape: f32[2,8,4], index: 0, kind: input, shape index: {}]   ;;  %s787_s1 = inlined_call_operand.vmem [shape: f32[4,4], index: 1, kind: input, shape index: {}]   ;;  %s788_s2 = inlined_call_operand.vmem [shape: f32[2,8,4], index: 2, kind: output, shape index: {0}]   ;;  %s789_s3 = inlined_call_operand.vmem [shape: f32[2,1,4], index: 3, kind: output, shape index: {1}]   ;;  %s790_s4 = inlined_call_operand.vmem [shape: f32[2,1,4], index: 4, kind: output, shape index: {2}]   ;;  %s791_s5 = inlined_call_operand.vmem [shape: f32[2,8,4], index: 5, kind: output, shape index: {3}]   ;;  %s792_s6 = inlined_call_operand.vmem [shape: f32[2,8,4], index: 6, kind: output, shape index: {4}]  }
   0x1 LB: > { %s624_s22 = sadd.s32 4294967295, %s665_s21   ;;  %p628_p0 = scmp.ge.s32.totalorder %s665_s21, 1  ;;  %s665_s21 = sphi %s704_s21, %s17_s21  }
   0x2   : > { %p220_p1 = scmp.lt.s32.totalorder %s665_s21, 3 }
   0x4   : > { %p221_p2 = pnand %p628_p0, %p220_p1 }
   0x5   : > { %p262_p3 = scmp.lt.s32.totalorder (!%p221_p2), %s624_s22, 1 }
   0x6   : > { %224 = sbr.rel (%p221_p2) target bundleno = 183 (0xb7), region = 28 }
   0xb   : > { %v285_v0 = vlaneseq  ;;  %v667_v1 = vmov 4.0   ;;  %s794_s22 = smov (!%p262_p3, %s624_s22), 1  ;;  %vm289_vm1 = vcmask 31744   ;;  %v668_v9 = vmov 8.0  }
   0xc   : > { %645 = vrcp.f32 %v667_v1  ;;  %s717_s23 = sshll.u32 %s794_s22, 3  ;;  %v745_v1 = vld [vmem:[%s787_s1] sm:$0xf]  ;;  %vm367_vm10 = vcmask 1040384   ;;  %vm373_vm13 = vcmask 1041408   ;;  %vm379_vm15 = vcmask 1043456   ;;  %s272_s10 = scalar_lea.vmem %s789_s3, %s794_s22 }
   0xd   : > { %v714_v2 = vshrl.u32 %v285_v0, 7  ;;  %s265_s26 = scalar_lea.vmem %s786_s0, %s717_s23  ;;  %647 = vrcp.f32 %v668_v9  ;;  %s279_s7 = scalar_lea.vmem %s791_s5, %s717_s23 }
   0xe   : > { %v284_v3 = vld [vmem:[%s265_s26] sm:$0xff]  ;;  %s275_s13 = scalar_lea.vmem %s790_s4, %s794_s22  ;;  %s283_s16 = scalar_lea.vmem %s792_s6, %s717_s23 }
   0xf   : > { %vm287_vm0 = vcmp.lt.s32.totalorder %v714_v2, 4  ;;  %v398_v53 = vcvt.s32.f32 %v714_v2  ;;  %s269_s19 = scalar_lea.vmem %s788_s2, %s717_s23 }
  0x10   : > { %v288_v5 = vsel %vm287_vm0, %v284_v3, 0.0 }
  0x11   : > { %v290_v6 = vsel %vm289_vm1, %v288_v5, 0.0  ;;  %v399_v57 = vadd.f32 1.0, %v398_v53 }
  0x12   : > { %v646_v4 = vpop.eup %645  ;;  %v291_v8 = vrot.slane %v290_v6, 4 }
  0x13   : > { %v298_v7 = vmul.f32 4.0, %v646_v4  ;;  %v648_v15 = vpop.eup %647  ;;  %vm302_vm2 = vweird.f32 %v646_v4  ;;  %v400_v58 = vmin.f32 %v399_v57, 8.0 }
  0x14   : > { %v292_v11 = vadd.f32 %v291_v8, %v290_v6  ;;  %v315_v19 = vmul.f32 8.0, %v648_v15  ;;  %vm319_vm3 = vweird.f32 %v648_v15  ;;  %v360_v6 = vperm.slane %v745_v1, 0 }
  0x15   : > { %v299_v10 = vsub.f32 1.0, %v298_v7  ;;  %vm406_vm11 = vweird.f32 %v400_v58 }
  0x16   : > { %v293_v13 = vrot.slane %v292_v11, 2  ;;  %v316_v22 = vsub.f32 1.0, %v315_v19 }
  0x17   : > { %v300_v12 = vmul.f32 %v646_v4, %v299_v10  ;;  %v362_v10 = vperm.slane %v745_v1, 1 }
  0x18   : > { %v294_v16 = vadd.f32 %v293_v13, %v292_v11  ;;  %v317_v26 = vmul.f32 %v648_v15, %v316_v22 }
  0x19   : > { %v301_v14 = vadd.f32 %v646_v4, %v300_v12 }
  0x1a   : > { %v295_v17 = vrot.slane %v294_v16, 1  ;;  %v318_v29 = vadd.f32 %v648_v15, %v317_v26 }
  0x1b   : > { %v303_v18 = vsel %vm302_vm2, %v646_v4, %v301_v14  ;;  %vm454_vm2 = vcmask 24576  }
  0x1c   : > { %v296_v20 = vadd.f32 %v295_v17, %v294_v16  ;;  %v320_v32 = vsel %vm319_vm3, %v648_v15, %v318_v29 }
  0x1e   : > { %v304_v21 = vmul.f32 %v303_v18, %v296_v20 }
  0x20   : > { %v305_v23 = vsel %vm287_vm0, %v284_v3, %v304_v21  ;;  %v412_v21 = vand.u32 2147483648, %v400_v58 }
  0x21   : > { %v307_v24 = vsel %vm289_vm1, %v305_v23, 0.0 }
  0x22   : > { %v308_v25 = vrot.slane %v307_v24, 4  ;;  %v413_v29 = vor.u32 1.1754944e-38, %v412_v21 }
  0x24   : > { %v309_v27 = vadd.f32 %v308_v25, %v307_v24  ;;  %v410_v25 = vand.u32 2147483647, %v400_v58 }
  0x26   : > { %v310_v28 = vrot.slane %v309_v27, 2  ;;  %vm411_vm0 = vcmp.eq.f32.partialorder %v410_v25, 8.507059e+37 }
  0x28   : > { %v311_v30 = vadd.f32 %v310_v28, %v309_v27 }
  0x2a   : > { %v312_v31 = vrot.slane %v311_v30, 1 }
  0x2c   : > { %v313_v33 = vadd.f32 %v312_v31, %v311_v30 }
  0x2e   : > { %v730_v34 = vmul.f32 %v320_v32, %v313_v33 }
  0x30   : > { %v322_v35 = vsub.f32 %v305_v23, %v730_v34  ;;  %455 = vst.msk [vmem:[%s272_s10] sm:$0x1] %vm454_vm2, %v730_v34 }
  0x32   : > { %v323_v36 = vmul.f32 %v322_v35, %v322_v35 }
  0x34   : > { %v324_v37 = vsel %vm289_vm1, %v323_v36, 0.0 }
  0x35   : > { %v325_v38 = vrot.slane %v324_v37, 4 }
  0x37   : > { %v326_v39 = vadd.f32 %v325_v38, %v324_v37 }
  0x39   : > { %v327_v40 = vrot.slane %v326_v39, 2 }
  0x3b   : > { %v328_v41 = vadd.f32 %v327_v40, %v326_v39 }
  0x3d   : > { %v329_v42 = vrot.slane %v328_v41, 1 }
  0x3f   : > { %v330_v43 = vadd.f32 %v329_v42, %v328_v41 }
  0x41   : > { %v331_v44 = vmul.f32 %v330_v43, %v320_v32 }
  0x43   : > { %v332_v45 = vadd.f32 1e-05, %v331_v44 }
  0x45   : > { %649 = vrsqrt.f32 %v332_v45  ;;  %vm340_vm4 = vcmp.eq.f32.partialorder %v332_v45, inf  ;;  %v343_v52 = vand.u32 2147483648, %v332_v45  ;;  %vm342_vm5 = vcmp.eq.f32.partialorder %v332_v45, 0.0 }
  0x4b   : > { %v650_v46 = vpop.eup %649 }
  0x4c   : > { %v334_v47 = vmul.f32 %v650_v46, %v332_v45 }
  0x4e   : > { %v335_v48 = vmul.f32 %v650_v46, %v334_v47 }
  0x50   : > { %v336_v49 = vmul.f32 0.5, %v335_v48 }
  0x52   : > { %v337_v50 = vsub.f32 1.5, %v336_v49 }
  0x54   : > { %v338_v51 = vmul.f32 %v650_v46, %v337_v50 }
  0x56   : > { %v339_v54 = vmul.f32 %v338_v51, %v332_v45 }
  0x58   : > { %v341_v55 = vsel %vm340_vm4, %v332_v45, %v339_v54 }
  0x59   : > { %v735_v56 = vsel %vm342_vm5, %v343_v52, %v341_v55 }
  0x5a   : > { %651 = vrcp.f32 %v735_v56  ;;  %v356_v61 = vand.u32 2147483648, %v735_v56  ;;  %vm350_vm6 = vweird.f32 %v735_v56  ;;  %v354_v63 = vand.u32 2147483647, %v735_v56  ;;  %456 = vst.msk [vmem:[%s275_s13] sm:$0x1] %vm454_vm2, %v735_v56 }
  0x5b   : > { %653 = vrcp.f32 %v400_v58 }
  0x5c   : > { %v357_v2 = vor.u32 1.1754944e-38, %v356_v61  ;;  %vm355_vm9 = vcmp.eq.f32.partialorder %v354_v63, 8.507059e+37 }
  0x60   : > { %v652_v59 = vpop.eup %651 }
  0x61   : > { %v346_v60 = vmul.f32 %v652_v59, %v735_v56  ;;  %vm351_vm7 = vweird.f32 %v652_v59  ;;  %v654_v3 = vpop.eup %653 }
  0x62   : > { %vm352_vm8 = vmor %vm350_vm6, %vm351_vm7  ;;  %v402_v8 = vmul.f32 %v654_v3, %v400_v58  ;;  %vm407_vm12 = vweird.f32 %v654_v3 }
  0x63   : > { %v347_v62 = vsub.f32 1.0, %v346_v60  ;;  %vm408_vm14 = vmor %vm406_vm11, %vm407_vm12 }
  0x64   : > { %v403_v12 = vsub.f32 1.0, %v402_v8 }
  0x65   : > { %v348_v0 = vmul.f32 %v652_v59, %v347_v62 }
  0x66   : > { %v404_v16 = vmul.f32 %v654_v3, %v403_v12 }
  0x67   : > { %v349_v4 = vadd.f32 %v652_v59, %v348_v0 }
  0x68   : > { %v405_v24 = vadd.f32 %v654_v3, %v404_v16 }
  0x69   : > { %v353_v5 = vsel %vm352_vm8, %v652_v59, %v349_v4 }
  0x6a   : > { %v358_v7 = vsel %vm355_vm9, %v357_v2, %v353_v5  ;;  %v409_v31 = vsel %vm408_vm14, %v654_v3, %v405_v24  ;;  %v449_v3 = vperm.slane %v745_v1, 2 }
  0x6b   : > { %v359_v9 = vmul.f32 %v358_v7, %v322_v35  ;;  %v414_v37 = vsel %vm411_vm0, %v413_v29, %v409_v31 }
  0x6d   : > { %v361_v11 = vmul.f32 %v360_v6, %v359_v9  ;;  %v451_v6 = vperm.slane %v745_v1, 3 }
  0x6f   : > { %v749_v13 = vadd.f32 %v362_v10, %v361_v11 }
  0x71   : > { %v365_v14 = vrot.slane %v749_v13, 7  ;;  %v382_v15 = vmul.f32 %v749_v13, %v749_v13 }
  0x73   : > { %v368_v17 = vsel %vm367_vm10, 0.0, %v365_v14  ;;  %v384_v18 = vrot.slane %v382_v15, 7 }
  0x74   : > { %v369_v19 = vadd.f32 %v368_v17, %v749_v13 }
  0x75   : > { %v386_v20 = vsel %vm367_vm10, 0.0, %v384_v18 }
  0x76   : > { %v371_v22 = vrot.slane %v369_v19, 6  ;;  %v387_v23 = vadd.f32 %v386_v20, %v382_v15 }
  0x78   : > { %v374_v26 = vsel %vm373_vm13, 0.0, %v371_v22  ;;  %v389_v27 = vrot.slane %v387_v23, 6 }
  0x79   : > { %v375_v28 = vadd.f32 %v374_v26, %v369_v19 }
  0x7a   : > { %v391_v30 = vsel %vm373_vm13, 0.0, %v389_v27 }
  0x7b   : > { %v377_v32 = vrot.slane %v375_v28, 4  ;;  %v392_v33 = vadd.f32 %v391_v30, %v387_v23 }
  0x7d   : > { %v380_v35 = vsel %vm379_vm15, 0.0, %v377_v32  ;;  %v394_v36 = vrot.slane %v392_v33, 4 }
  0x7e   : > { %v381_v38 = vadd.f32 %v380_v35, %v375_v28 }
  0x7f   : > { %v396_v39 = vsel %vm379_vm15, 0.0, %v394_v36 }
  0x80   : > { %v397_v40 = vadd.f32 %v396_v39, %v392_v33  ;;  %v415_v41 = vmul.f32 %v414_v37, %v381_v38 }
  0x82   : > { %v416_v42 = vmul.f32 %v414_v37, %v397_v40  ;;  %v417_v43 = vmul.f32 %v415_v41, %v415_v41  ;;  %457 = vst.msk [vmem:[%s279_s7] sm:$0xff] %vm289_vm1, %v415_v41  ;;  %v433_v63 = vsub.f32 %v749_v13, %v415_v41 }
  0x84   : > { %v418_v44 = vsub.f32 %v416_v42, %v417_v43 }
  0x86   : > { %v419_v45 = vmax.f32 %v418_v44, 0.0 }
  0x88   : > { %v420_v46 = vadd.f32 1e-05, %v419_v45 }
  0x8a   : > { %655 = vrsqrt.f32 %v420_v46  ;;  %vm428_vm3 = vcmp.eq.f32.partialorder %v420_v46, inf  ;;  %v431_v53 = vand.u32 2147483648, %v420_v46  ;;  %vm430_vm4 = vcmp.eq.f32.partialorder %v420_v46, 0.0 }
  0x90   : > { %v656_v47 = vpop.eup %655 }
  0x91   : > { %v422_v48 = vmul.f32 %v656_v47, %v420_v46 }
  0x93   : > { %v423_v49 = vmul.f32 %v656_v47, %v422_v48 }
  0x95   : > { %v424_v50 = vmul.f32 0.5, %v423_v49 }
  0x97   : > { %v425_v51 = vsub.f32 1.5, %v424_v50 }
  0x99   : > { %v426_v52 = vmul.f32 %v656_v47, %v425_v51 }
  0x9b   : > { %v427_v54 = vmul.f32 %v426_v52, %v420_v46 }
  0x9d   : > { %v429_v55 = vsel %vm428_vm3, %v420_v46, %v427_v54 }
  0x9e   : > { %v432_v57 = vsel %vm430_vm4, %v431_v53, %v429_v55 }
  0x9f   : > { %657 = vrcp.f32 %v432_v57  ;;  %458 = vst.msk [vmem:[%s283_s16] sm:$0xff] %vm289_vm1, %v432_v57  ;;  %v445_v34 = vand.u32 2147483648, %v432_v57  ;;  %vm439_vm5 = vweird.f32 %v432_v57  ;;  %v443_v56 = vand.u32 2147483647, %v432_v57 }
  0xa1   : > { %v446_v62 = vor.u32 1.1754944e-38, %v445_v34  ;;  %vm444_vm8 = vcmp.eq.f32.partialorder %v443_v56, 8.507059e+37 }
  0xa5   : > { %v658_v58 = vpop.eup %657 }
  0xa6   : > { %v435_v59 = vmul.f32 %v658_v58, %v432_v57  ;;  %vm440_vm6 = vweird.f32 %v658_v58 }
  0xa7   : > { %vm441_vm7 = vmor %vm439_vm5, %vm440_vm6 }
  0xa8   : > { %v436_v60 = vsub.f32 1.0, %v435_v59 }
  0xaa   : > { %v437_v61 = vmul.f32 %v658_v58, %v436_v60 }
  0xac   : > { %v438_v0 = vadd.f32 %v658_v58, %v437_v61 }
  0xae   : > { %v442_v2 = vsel %vm441_vm7, %v658_v58, %v438_v0 }
  0xaf   : > { %v447_v4 = vsel %vm444_vm8, %v446_v62, %v442_v2 }
  0xb0   : > { %v448_v5 = vmul.f32 %v447_v4, %v433_v63 }
  0xb2   : > { %v450_v7 = vmul.f32 %v449_v3, %v448_v5 }
  0xb4   : > { %v452_v8 = vadd.f32 %v451_v6, %v450_v7 }
  0xb6   : > { %453 = vst.msk [vmem:[%s269_s19] sm:$0xff] %vm289_vm1, %v452_v8 }
  0xb7 PF: > { %s17_s21 = sadd.s32 1, %s665_s21  }
  0xb8   : > { %p14_p4 = scmp.ge.s32.totalorder %s17_s21, 4  }
  0xba   :  { %16 = sbr.rel (!%p14_p4) target bundleno = 1 (0x1), region = 106 }

// kernel: separateformer_forward.5
= control target key start
LH: loop header
LB: loop body
LE: loop exit
PB: predicated region body
PF: predicated region fallthrough
CT: control target
= control target key end

     0   :  { %13 = vsyncpa [#allocation3], 0  ;;  %s1079_s0 = inlined_call_operand.vmem [shape: f32[2,8,4], index: 0, kind: input, shape index: {}]   ;;  %s1080_s1 = inlined_call_operand.vmem [shape: f32[2,4], index: 1, kind: input, shape index: {}]   ;;  %s1081_s2 = inlined_call_operand.vmem [shape: f32[8,8], index: 2, kind: input, shape index: {}]   ;;  %s1082_s3 = inlined_call_operand.vmem [shape: f32[8,1], index: 3, kind: input, shape index: {}]   ;;  %s1083_s4 = inlined_call_operand.vmem [shape: f32[2,8,4], index: 4, kind: output, shape index: {0}]   ;;  %s1084_s5 = inlined_call_operand.vmem [shape: f32[2,8,4], index: 5, kind: output, shape index: {1}]   ;;  %s1085_s6 = inlined_call_operand.hbm [shape: f32[2,1,4], index: 6, kind: output, shape index: {2}]   ;;  %s1086_s7 = inlined_call_operand.hbm [shape: f32[2,1,4], index: 7, kind: output, shape index: {3}]  }
   0x1   :  { %15 = vsyncpa [#allocation3 + $0x1], 0 }
   0x2   :  { %16 = vsyncpa [#allocation5], 0 }
   0x3   :  { %18 = vsyncpa [#allocation5 + $0x1], 0  ;;  %s920_s24 = smov 0   ;;  %s922_s25 = smov 0  }
   0x4   :  { %s924_s26 = smov 0   ;;  %s926_s27 = smov 0  }
   0x5 LB: > { %s941_s28 = sadd.s32 4294967295, %s875_s27   ;;  %s708_s29 = sadd.s32 4294967294, %s875_s27   ;;  %s875_s27 = sphi %s926_s27, %s1092_s27   ;;  %s871_s26 = sphi %s924_s26, %s1091_s26   ;;  %s867_s25 = sphi %s922_s25, %s1090_s25   ;;  %s863_s24 = sphi %s920_s24, %s1089_s24  }
   0x6   : > { %s945_s30 = sadd.s32 1, %s875_s27   ;;  %s172_s8 = sadd.s32 1, %s871_s26 }
   0x7   : > { %s169_s9 = ssub.s32 %s875_s27, %s945_s30  ;;  %p182_p0 = scmp.ne.s32.totalorder %s871_s26, %s867_s25 }
   0x8   : > { %p170_p1 = scmp.eq.s32.totalorder %s169_s9, 0  ;;  %p183_p2 = scmp.eq.s32.totalorder %s941_s28, 1 }
   0x9   : > { %p188_p3 = scmp.ne.s32.totalorder %s867_s25, %s863_s24  ;;  %p189_p4 = scmp.eq.s32.totalorder %s708_s29, 1 }
   0xa   : > { %s956_s10 = scalar_select %p170_p1, %s871_s26, %s172_s8  }
   0xb   : > { %p958_p5 = por %p183_p2, %p182_p0  ;;  %p962_p6 = por %p189_p4, %p188_p3 }
   0xc   : > { %p711_p7 = scmp.ge.s32.totalorder %s875_s27, 1  ;;  %p249_p8 = scmp.lt.s32.totalorder %s875_s27, 3 }
   0xe   : > { %p250_p9 = pnand %p711_p7, %p249_p8 }
   0xf   : > { %p291_p10 = scmp.lt.s32.totalorder (!%p250_p9), %s941_s28, 1  ;;  %s1006_s29 = sand.u32 (!%p250_p9), 1, %s867_s25  }
  0x10   : > { %253 = sbr.rel (%p250_p9) target bundleno = 199 (0xc7), region = 36  ;;  %s284_s15 = scalar_lea.vmem (!%p250_p9), [#allocation2], %s1006_s29 }
  0x11   : > { %s562_s16 = sshll.u32 (!%p250_p9), %s284_s15, 4  ;;  %s542_s18 = scalar_lea.sflag (!%p250_p9), [#allocation3], %s1006_s29  ;;  %s563_s16 = int_to_ptr.vmem [resolvable:$true] %s562_s16 }
  0x12   : > { %s801_s23 = scalar_lea.hbm (!%p250_p9), %s1085_s6, 2 }
  0x15   : > { %s292_s13 = scalar_select %p291_p10, %s941_s28, 1  ;;  %v322_v0 = vlaneseq  ;;  %v877_v1 = vmov 7.0   ;;  %vm307_vm0 = vcmask 1040384   ;;  %vm313_vm1 = vcmask 1041408   ;;  %v358_v41 = vld [vmem:[%s1082_s3] sm:$0xff] }
  0x16   : > { %767 = vrcp.f32 %v877_v1  ;;  %vm319_vm2 = vcmask 1043456   ;;  %v878_v19 = vmov 8.0   ;;  %vm330_vm4 = vcmask 1044480   ;;  %v357_v47 = vld [vmem:[%s1081_s2] sm:$0xff] }
  0x17   : > { %s970_s14 = sshll.u32 %s292_s13, 3  ;;  %v323_v3 = vshrl.u32 %v322_v0, 7  ;;  %769 = vrcp.f32 %v878_v19  ;;  %v879_v40 = vmov 0   ;;  %vm388_vm6 = vcmask 31744   ;;  %s560_s13 = scalar_lea.hbm %s1085_s6, %s941_s28 }
  0x18   : > { %s294_s17 = scalar_lea.vmem %s1079_s0, %s970_s14  ;;  %766 = vset.pattern.permute.xlu0 %v879_v40  ;;  %vm364_vm7 = vcmask 64512  }
  0x19   : > { %v303_v2 = vld [vmem:[%s294_s17] sm:$0xff]  ;;  %v977_v8 = vcvt.s32.f32 %v323_v3  ;;  %vm326_vm3 = vcmp.le.s32.totalorder %v323_v3, 4  ;;  %361 = vperm.xlu0 %766, %v358_v41   ;;  %s564_s17 = sshll.u32 %s560_s13, 4  ;;  %s565_s17 = int_to_ptr.hbm [resolvable:$true] %s564_s17 }
  0x1a   : > { %v305_v4 = vrot.slane %v303_v2, 7  ;;  %v341_v22 = vperm.slane %v303_v2, 0  ;;  %v342_v23 = vperm.slane %v303_v2, 7  ;;  %s795_s19 = sshra.s32 %s565_s17, 4  ;;  %s796_s19 = int_to_ptr.hbm [resolvable:$true] %s795_s19 }
  0x1b   : > { %v338_v12 = vadd.f32 3.0, %v977_v8  ;;  %v336_v14 = vsub.f32 3.0, %v977_v8  ;;  %s797_s20 = scalar_lea.hbm %s796_s19, 1  ;;  %p802_p0 = scmp.lt.s32.totalorder %s796_s19, %s1085_s6 }
  0x1c   : > { %v308_v5 = vsel %vm307_vm0, 0.0, %v305_v4  ;;  %v768_v6 = vpop.eup %767  ;;  %p798_p11 = scmp.ne.s32.totalorder %s796_s19, %s797_s20  ;;  %p803_p1 = scmp.lt.s32.totalorder %s801_s23, %s797_s20 }
  0x1d   : > { %v309_v7 = vadd.f32 %v308_v5, %v303_v2  ;;  %v349_v10 = vmul.f32 7.0, %v768_v6  ;;  %v715_v17 = vadd.f32 -7.0, %v338_v12  ;;  %v337_v21 = vmax.f32 %v336_v14, 0.0  ;;  %v770_v32 = vpop.eup %769 }
  0x1e   : > { %vm353_vm5 = vweird.f32 %v768_v6  ;;  %v399_v38 = vmul.f32 8.0, %v770_v32  ;;  %vm403_vm8 = vweird.f32 %v770_v32  ;;  %p799_p12 = pnand %p798_p11, %p958_p5  ;;  %p804_p2 = por %p803_p1, %p802_p0 }
  0x1f   : > { %v311_v9 = vrot.slane %v309_v7, 6  ;;  %v350_v16 = vsub.f32 1.0, %v349_v10  ;;  %v340_v28 = vmax.f32 %v715_v17, 0.0  ;;  %v344_v31 = vmul.f32 %v341_v22, %v337_v21 }
  0x20   : > { %v400_v44 = vsub.f32 1.0, %v399_v38  ;;  %p800_p13 = pneg %p799_p12 }
  0x21   : > { %v314_v11 = vsel %vm313_vm1, 0.0, %v311_v9  ;;  %v351_v24 = vmul.f32 %v768_v6, %v350_v16  ;;  %v346_v36 = vmul.f32 %v342_v23, %v340_v28  ;;  %v479_v16 = vadd.f32 1.0, %v977_v8 }
  0x22   : > { %v315_v13 = vadd.f32 %v314_v11, %v309_v7  ;;  %v401_v49 = vmul.f32 %v770_v32, %v400_v44  ;;  %p805_p3 = pnand %p804_p2, %p800_p13 }
  0x23   : > { %v352_v34 = vadd.f32 %v768_v6, %v351_v24  ;;  %v480_v17 = vmin.f32 %v479_v16, 8.0  ;;  %v390_v24 = vld [vmem:[%s1080_s1] sm:$0x3] }
  0x24   : > { %v317_v15 = vrot.slane %v315_v13, 4  ;;  %v402_v52 = vadd.f32 %v770_v32, %v401_v49  ;;  %v444_v28 = vperm.slane %v390_v24, 0 }
  0x25   : > { %v354_v39 = vsel %vm353_vm5, %v768_v6, %v352_v34  ;;  %vm486_vm15 = vweird.f32 %v480_v17 }
  0x26   : > { %v320_v18 = vsel %vm319_vm2, 0.0, %v317_v15  ;;  %v404_v55 = vsel %vm403_vm8, %v770_v32, %v402_v52  ;;  %v446_v32 = vperm.slane %v390_v24, 1 }
  0x27   : > { %v321_v20 = vadd.f32 %v320_v18, %v315_v13 }
  0x29   : > { %v325_v25 = vperm.slane %v321_v20, 7  ;;  %v328_v26 = vrot.slane %v321_v20, 3  ;;  %v333_v27 = vrot.slane %v321_v20, 4 }
  0x2b   : > { %v331_v29 = vsel %vm330_vm4, %v328_v26, 0.0  ;;  %v335_v30 = vsel %vm319_vm2, 0.0, %v333_v27 }
  0x2c   : > { %v332_v33 = vsel %vm326_vm3, %v331_v29, %v325_v25 }
  0x2d   : > { %v343_v35 = vsub.f32 %v332_v33, %v335_v30 }
  0x2f   : > { %v345_v37 = vadd.f32 %v344_v31, %v343_v35 }
  0x31   : > { %v347_v42 = vadd.f32 %v346_v36, %v345_v37 }
  0x33   : > { %v355_v43 = vmul.f32 %v354_v39, %v347_v42 }
  0x35   : > { %v356_v45 = vsub.f32 %v303_v2, %v355_v43  ;;  %v391_v46 = vsel %vm388_vm6, %v355_v43, 0.0 }
  0x36   : > { %v392_v48 = vrot.slane %v391_v46, 4 }
  0x37   : > { %383 = vmatpush.msra.mxu0 %v356_v45 }
  0x38   : > { %v393_v50 = vadd.f32 %v392_v48, %v391_v46  ;;  %716 = vmatmul.msk.f32.vlgmr.msra.gmra.mxu0 %vm364_vm7, %v357_v47  ;;  %v490_v47 = vand.u32 2147483647, %v480_v17 }
  0x3a   : > { %v394_v51 = vrot.slane %v393_v50, 2  ;;  %vm491_vm5 = vcmp.eq.f32.partialorder %v490_v47, 8.507059e+37 }
  0x3c   : > { %v395_v53 = vadd.f32 %v394_v51, %v393_v50 }
  0x3e   : > { %v396_v54 = vrot.slane %v395_v53, 1 }
  0x40   : > { %v397_v56 = vadd.f32 %v396_v54, %v395_v53 }
  0x42   : > { %v405_v57 = vmul.f32 %v404_v55, %v397_v56 }
  0x44   : > { %v406_v58 = vsub.f32 %v355_v43, %v405_v57  ;;  %v492_v43 = vand.u32 2147483648, %v480_v17 }
  0x46   : > { %v407_v59 = vmul.f32 %v406_v58, %v406_v58  ;;  %v493_v51 = vor.u32 1.1754944e-38, %v492_v43 }
  0x48   : > { %v408_v60 = vsel %vm388_vm6, %v407_v59, 0.0 }
  0x49   : > { %v409_v61 = vrot.slane %v408_v60, 4 }
  0x4b   : > { %v410_v62 = vadd.f32 %v409_v61, %v408_v60 }
  0x4d   : > { %v411_v63 = vrot.slane %v410_v62, 2 }
  0x4f   : > { %v412_v0 = vadd.f32 %v411_v63, %v410_v62 }
  0x51   : > { %v413_v1 = vrot.slane %v412_v0, 1 }
  0x53   : > { %v414_v2 = vadd.f32 %v413_v1, %v412_v0 }
  0x55   : > { %v415_v3 = vmul.f32 %v414_v2, %v404_v55 }
  0x57   : > { %v416_v4 = vadd.f32 1e-05, %v415_v3 }
  0x59   : > { %771 = vrsqrt.f32 %v416_v4  ;;  %vm424_vm9 = vcmp.eq.f32.partialorder %v416_v4, inf  ;;  %v427_v12 = vand.u32 2147483648, %v416_v4  ;;  %vm426_vm10 = vcmp.eq.f32.partialorder %v416_v4, 0.0 }
  0x5f   : > { %v772_v5 = vpop.eup %771 }
  0x60   : > { %v418_v6 = vmul.f32 %v772_v5, %v416_v4 }
  0x62   : > { %v419_v7 = vmul.f32 %v772_v5, %v418_v6 }
  0x64   : > { %v420_v9 = vmul.f32 0.5, %v419_v7 }
  0x66   : > { %v421_v10 = vsub.f32 1.5, %v420_v9 }
  0x68   : > { %v422_v11 = vmul.f32 %v772_v5, %v421_v10 }
  0x6a   : > { %v423_v13 = vmul.f32 %v422_v11, %v416_v4 }
  0x6c   : > { %v425_v14 = vsel %vm424_vm9, %v416_v4, %v423_v13 }
  0x6d   : > { %v428_v15 = vsel %vm426_vm10, %v427_v12, %v425_v14 }
  0x6e   : > { %773 = vrcp.f32 %v428_v15  ;;  %v440_v20 = vand.u32 2147483648, %v428_v15  ;;  %vm434_vm11 = vweird.f32 %v428_v15  ;;  %v438_v22 = vand.u32 2147483647, %v428_v15 }
  0x6f   : > { %775 = vrcp.f32 %v480_v17 }
  0x70   : > { %v441_v25 = vor.u32 1.1754944e-38, %v440_v20  ;;  %vm439_vm14 = vcmp.eq.f32.partialorder %v438_v22, 8.507059e+37 }
  0x74   : > { %v774_v18 = vpop.eup %773 }
  0x75   : > { %v430_v19 = vmul.f32 %v774_v18, %v428_v15  ;;  %vm435_vm12 = vweird.f32 %v774_v18  ;;  %v776_v26 = vpop.eup %775 }
  0x76   : > { %vm436_vm13 = vmor %vm434_vm11, %vm435_vm12  ;;  %v482_v30 = vmul.f32 %v776_v26, %v480_v17  ;;  %vm487_vm3 = vweird.f32 %v776_v26 }
  0x77   : > { %v431_v21 = vsub.f32 1.0, %v430_v19  ;;  %vm488_vm4 = vmor %vm486_vm15, %vm487_vm3 }
  0x78   : > { %v483_v34 = vsub.f32 1.0, %v482_v30 }
  0x79   : > { %v432_v23 = vmul.f32 %v774_v18, %v431_v21 }
  0x7a   : > { %v484_v38 = vmul.f32 %v776_v26, %v483_v34 }
  0x7b   : > { %v433_v27 = vadd.f32 %v774_v18, %v432_v23 }
  0x7c   : > { %v485_v46 = vadd.f32 %v776_v26, %v484_v38 }
  0x7d   : > { %v437_v8 = vsel %vm436_vm13, %v774_v18, %v433_v27 }
  0x7e   : > { %v442_v29 = vsel %vm439_vm14, %v441_v25, %v437_v8  ;;  %v489_v53 = vsel %vm488_vm4, %v776_v26, %v485_v46 }
  0x7f   : > { %v443_v31 = vmul.f32 %v442_v29, %v406_v58  ;;  %v494_v58 = vsel %vm491_vm5, %v493_v51, %v489_v53 }
  0x81   : > { %v445_v33 = vmul.f32 %v444_v28, %v443_v31 }
  0x83   : > { %v996_v35 = vadd.f32 %v446_v32, %v445_v33 }
  0x85   : > { %v449_v36 = vrot.slane %v996_v35, 7  ;;  %v463_v37 = vmul.f32 %v996_v35, %v996_v35 }
  0x87   : > { %v451_v39 = vsel %vm307_vm0, 0.0, %v449_v36  ;;  %v465_v40 = vrot.slane %v463_v37, 7 }
  0x88   : > { %v452_v41 = vadd.f32 %v451_v39, %v996_v35 }
  0x89   : > { %v467_v42 = vsel %vm307_vm0, 0.0, %v465_v40  ;;  %vm530_vm0 = vcmask 31751  }
  0x8a   : > { %v454_v44 = vrot.slane %v452_v41, 6  ;;  %v468_v45 = vadd.f32 %v467_v42, %v463_v37 }
  0x8c   : > { %v456_v48 = vsel %vm313_vm1, 0.0, %v454_v44  ;;  %v470_v49 = vrot.slane %v468_v45, 6 }
  0x8d   : > { %v457_v50 = vadd.f32 %v456_v48, %v452_v41 }
  0x8e   : > { %v472_v52 = vsel %vm313_vm1, 0.0, %v470_v49 }
  0x8f   : > { %v459_v54 = vrot.slane %v457_v50, 4  ;;  %v473_v55 = vadd.f32 %v472_v52, %v468_v45 }
  0x91   : > { %v461_v56 = vsel %vm319_vm2, 0.0, %v459_v54  ;;  %v475_v57 = vrot.slane %v473_v55, 4 }
  0x92   : > { %v462_v59 = vadd.f32 %v461_v56, %v457_v50 }
  0x93   : > { %v477_v60 = vsel %vm319_vm2, 0.0, %v475_v57 }
  0x94   : > { %v478_v61 = vadd.f32 %v477_v60, %v473_v55  ;;  %v1015_v62 = vmul.f32 %v494_v58, %v462_v59 }
  0x96   : > { %v496_v63 = vmul.f32 %v494_v58, %v478_v61  ;;  %v497_v0 = vmul.f32 %v1015_v62, %v1015_v62  ;;  %531 = vst.msk [vmem:[%s284_s15 - $0x7] sm:$0x80] %vm530_vm0, %v1015_v62 }
  0x98   : > { %v498_v1 = vsub.f32 %v496_v63, %v497_v0 }
  0x9a   : > { %v499_v2 = vmax.f32 %v498_v1, 0.0 }
  0x9b   : > { %808 = shalt.err (!%p805_p3)
}
  0x9c   : > { %719 = dma.vmem_to_hbm [thread:$0]  (%p958_p5), %s563_s16, 16, %s565_s17, %s542_s18   ;;  %v500_v3 = vadd.f32 1e-05, %v499_v2  ;;  %v362_v15 = vpop.permute.xlu0 %361 }
  0x9d   : > { %s573_s19 = scalar_lea.hbm %s1086_s7, %s941_s28  ;;  %s290_s20 = scalar_lea.vmem [#allocation4], %s1006_s29 }
  0x9e   : > { %777 = vrsqrt.f32 %v500_v3  ;;  %vm508_vm1 = vcmp.eq.f32.partialorder %v500_v3, inf  ;;  %v511_v11 = vand.u32 2147483648, %v500_v3  ;;  %s575_s21 = sshll.u32 %s290_s20, 4  ;;  %s577_s22 = sshll.u32 %s573_s19, 4  ;;  %vm510_vm2 = vcmp.eq.f32.partialorder %v500_v3, 0.0  ;;  %s576_s21 = int_to_ptr.vmem [resolvable:$true] %s575_s21  ;;  %s578_s22 = int_to_ptr.hbm [resolvable:$true] %s577_s22 }
  0x9f   : > { %s546_s16 = scalar_lea.sflag [#allocation5], %s1006_s29  ;;  %s823_s28 = sshra.s32 %s578_s22, 4  ;;  %s824_s28 = int_to_ptr.hbm [resolvable:$true] %s823_s28 }
  0xa0   : > { %s825_s17 = scalar_lea.hbm %s824_s28, 1  ;;  %s829_s8 = scalar_lea.hbm %s1086_s7, 2 }
  0xa1   : > { %p826_p4 = scmp.ne.s32.totalorder %s824_s28, %s825_s17  ;;  %p830_p9 = scmp.lt.s32.totalorder %s824_s28, %s1086_s7 }
  0xa2   : > { %p831_p10 = scmp.lt.s32.totalorder %s829_s8, %s825_s17 }
  0xa3   : > { %p827_p7 = pnand %p826_p4, %p958_p5 }
  0xa4   : > { %v778_v4 = vpop.eup %777  ;;  %p832_p11 = por %p831_p10, %p830_p9 }
  0xa5   : > { %v502_v5 = vmul.f32 %v778_v4, %v500_v3  ;;  %p828_p8 = pneg %p827_p7 }
  0xa7   : > { %v503_v6 = vmul.f32 %v778_v4, %v502_v5  ;;  %p833_p12 = pnand %p832_p11, %p828_p8 }
  0xa9   : > { %v504_v7 = vmul.f32 0.5, %v503_v6 }
  0xab   : > { %v505_v9 = vsub.f32 1.5, %v504_v7 }
  0xad   : > { %v506_v10 = vmul.f32 %v778_v4, %v505_v9 }
  0xaf   : > { %v507_v12 = vmul.f32 %v506_v10, %v500_v3 }
  0xb1   : > { %v509_v13 = vsel %vm508_vm1, %v500_v3, %v507_v12 }
  0xb2   : > { %v512_v14 = vsel %vm510_vm2, %v511_v11, %v509_v13 }
  0xb3   : > { %779 = vrcp.f32 %v512_v14  ;;  %532 = vst.msk [vmem:[%s290_s20 - $0x7] sm:$0x80] %vm530_vm0, %v512_v14 }
  0xb4   : > { %836 = shalt.err (!%p833_p12)
}
  0xb5   : > { %720 = dma.vmem_to_hbm [thread:$0]  (%p958_p5), %s576_s21, 16, %s578_s22, %s546_s16   ;;  %v385_v16 = vpop.f32.mrf.mxu0  ;;  %v525_v20 = vand.u32 2147483648, %v512_v14  ;;  %vm519_vm7 = vweird.f32 %v512_v14  ;;  %v523_v22 = vand.u32 2147483647, %v512_v14  ;;  %v513_v25 = vsub.f32 %v996_v35, %v1015_v62 }
  0xb6   : > { %s302_s19 = scalar_lea.vmem %s1084_s5, %s970_s14  ;;  %v386_v17 = vadd.f32 %v385_v16, %v362_v15  ;;  %s298_s21 = scalar_lea.vmem %s1083_s4, %s970_s14 }
  0xb7   : > { %v526_v24 = vor.u32 1.1754944e-38, %v525_v20  ;;  %vm524_vm10 = vcmp.eq.f32.partialorder %v523_v22, 8.507059e+37 }
  0xb8   : > { %389 = vst.msk [vmem:[%s302_s19] sm:$0xff] %vm388_vm6, %v386_v17 }
  0xb9   : > { %v780_v18 = vpop.eup %779 }
  0xba   : > { %v515_v19 = vmul.f32 %v780_v18, %v512_v14  ;;  %vm520_vm8 = vweird.f32 %v780_v18 }
  0xbb   : > { %vm521_vm9 = vmor %vm519_vm7, %vm520_vm8 }
  0xbc   : > { %v516_v21 = vsub.f32 1.0, %v515_v19 }
  0xbe   : > { %v517_v23 = vmul.f32 %v780_v18, %v516_v21 }
  0xc0   : > { %v518_v26 = vadd.f32 %v780_v18, %v517_v23 }
  0xc2   : > { %v522_v27 = vsel %vm521_vm9, %v780_v18, %v518_v26 }
  0xc3   : > { %v527_v8 = vsel %vm524_vm10, %v526_v24, %v522_v27 }
  0xc4   : > { %v528_v28 = vmul.f32 %v527_v8, %v513_v25 }
  0xc6   : > { %529 = vst.msk [vmem:[%s298_s21] sm:$0xff] %vm388_vm6, %v528_v28 }
  0xc7 PF: > { %p730_p5 = scmp.ge.s32.totalorder %s875_s27, 2  ;;  %s603_s22 = sand.u32 1, %s863_s24  }
  0xc8   : > { %s604_s16 = scalar_lea.sflag [#allocation3], %s603_s22 }
  0xc9   : > { %p724_p13 = pnand %p730_p5, %p962_p6 }
  0xcb   : > { %p725_p0 = pneg %p724_p13 }
  0xcd   : > { %854 = dma.done.wait (%p725_p0), %s604_s16, 16  }
  0xce   : > { %856 = vsyncadd (%p725_p0), %s604_s16, 4294967280  ;;  %s613_s28 = scalar_lea.sflag [#allocation5], %s603_s22 }
  0xcf   : > { %858 = dma.done.wait (%p725_p0), %s613_s28, 16  }
  0xd0   : > { %860 = vsyncadd (%p725_p0), %s613_s28, 4294967280  ;;  %p21_p1 = scmp.ge.s32.totalorder %s945_s30, 4   ;;  %s1089_s24 = smov %s867_s25 }
  0xd1   : > { %s1090_s25 = smov %s871_s26  ;;  %s1091_s26 = smov %s956_s10 }
  0xd2   : > { %s1092_s27 = smov %s945_s30  ;;  %23 = sbr.rel (!%p21_p1) target bundleno = 5 (0x5), region = 112 }
  0xd7   :  { %618 = vsyncpa [#allocation3], 1 }
  0xd8   :  { %620 = vsyncpa [#allocation3 + $0x1], 1 }
  0xd9   :  { %621 = vsyncpa [#allocation5], 1 }
  0xda   :  { %623 = vsyncpa [#allocation5 + $0x1], 1 }

// kernel: separateformer_forward.8
= control target key start
LH: loop header
LB: loop body
LE: loop exit
PB: predicated region body
PF: predicated region fallthrough
CT: control target
= control target key end

     0   :  { %s1291_s21 = smov 0   ;;  %s1468_s0 = inlined_call_operand.vmem [shape: f32[2,8,4], index: 0, kind: input, shape index: {}]   ;;  %s1469_s1 = inlined_call_operand.vmem [shape: f32[2,8,32], index: 1, kind: input, shape index: {}]   ;;  %s1470_s2 = inlined_call_operand.vmem [shape: f32[12,32], index: 2, kind: input, shape index: {}]   ;;  %s1471_s3 = inlined_call_operand.vmem [shape: f32[32,96], index: 3, kind: input, shape index: {}]   ;;  %s1472_s4 = inlined_call_operand.vmem [shape: f32[1,96], index: 4, kind: input, shape index: {}]   ;;  %s1473_s5 = inlined_call_operand.vmem [shape: f32[32,32], index: 5, kind: input, shape index: {}]   ;;  %s1474_s6 = inlined_call_operand.vmem [shape: f32[1,32], index: 6, kind: input, shape index: {}]   ;;  %s1475_s7 = inlined_call_operand.vmem [shape: f32[32,64], index: 7, kind: input, shape index: {}]   ;;  %s1476_s8 = inlined_call_operand.vmem [shape: f32[1,64], index: 8, kind: input, shape index: {}]   ;;  %s1477_s9 = inlined_call_operand.vmem [shape: f32[64,32], index: 9, kind: input, shape index: {}]   ;;  %s1478_s10 = inlined_call_operand.vmem [shape: f32[1,32], index: 10, kind: input, shape index: {}]   ;;  %s1479_s11 = inlined_call_operand.vmem [shape: f32[4,32], index: 11, kind: input, shape index: {}]   ;;  %s1480_s12 = inlined_call_operand.vmem [shape: f32[2,8,32], index: 12, kind: output, shape index: {}]  }
   0x1 LB: > { %s1120_s22 = sadd.s32 4294967295, %s1209_s21   ;;  %p1124_p0 = scmp.ge.s32.totalorder %s1209_s21, 1  ;;  %s1209_s21 = sphi %s1291_s21, %s22_s21  }
   0x2   : > { %p370_p1 = scmp.lt.s32.totalorder %s1209_s21, 3 }
   0x4   : > { %p371_p2 = pnand %p1124_p0, %p370_p1 }
   0x5   : > { %p414_p3 = scmp.lt.s32.totalorder (!%p371_p2), %s1120_s22, 1  ;;  %s1211_s28 = smov (!%p371_p2), 104  }
   0x6   : > { %374 = sbr.rel (%p371_p2) target bundleno = 2025 (0x7e9), region = 68  ;;  %s1212_s29 = smov (!%p371_p2), 72  }
   0x7   : > { %s1214_s13 = smov (!%p371_p2), 80   ;;  %s1215_s14 = smov (!%p371_p2), 96  }
   0x8   : > { %s1216_s15 = smov (!%p371_p2), 120   ;;  %s1217_s16 = smov (!%p371_p2), 112  }
   0x9   : > { %s1218_s17 = smov (!%p371_p2), 64   ;;  %s1219_s18 = smov (!%p371_p2), 56  }
   0xa   : > { %s1220_s19 = smov (!%p371_p2), 48   ;;  %s1221_s20 = smov (!%p371_p2), 40  }
   0xb   : > { %v429_v0 = vld [vmem:[%s1470_s2 + $0x8] sm:$0xf]  ;;  %vm444_vm0 = vcmask 1043456   ;;  %v428_v1 = vld [vmem:[%s1470_s2] sm:$0xff]  ;;  %s1482_s22 = smov (!%p414_p3, %s1120_s22), 1  ;;  %vm441_vm1 = vcmask 31744  }
   0xc   : > { %1132 = vmatpush.msk.msra.mxu3 %vm444_vm0, %v429_v0  ;;  %v440_v2 = vrot.slane %v428_v1, 4  ;;  %1130 = vmatpush.msk.msra.mxu1 %vm444_vm0, %v428_v1  ;;  %s1305_s27 = sshll.u32 %s1482_s22, 3  ;;  %v523_v6 = vld [vmem:[%s1471_s3 + $0x18] sm:$0xff]  ;;  %v522_v7 = vld [vmem:[%s1471_s3 + $0x10] sm:$0xff]  ;;  %v521_v8 = vld [vmem:[%s1471_s3 + $0x8] sm:$0xff]  ;;  %vm548_vm2 = vcmask 261120  }
   0xd   : > { %s417_s30 = scalar_lea.vmem %s1468_s0, %s1305_s27  ;;  %v520_v9 = vld [vmem:[%s1471_s3] sm:$0xff]  ;;  %s421_s24 = scalar_lea.vmem %s1469_s1, %s1305_s27  ;;  %vm575_vm3 = vcmask 64512  }
   0xe   : > { %1128 = vmatpush.msk.msra.mxu0 %vm444_vm0, %v440_v2  ;;  %v426_v3 = vld [vmem:[%s417_s30] sm:$0xff]  ;;  %564 = vmatpush.msrb.mxu3 %v523_v6  ;;  %s1213_s30 = smov 88   ;;  %s1222_s22 = smov 8  }
   0xf   : > { %v435_v4 = vrot.slane %v426_v3, 1  ;;  %1129 = vmatmul.msk.f32.vlgmr.msra.gmra.mxu0 %vm441_vm1, %v426_v3  ;;  %v431_v5 = vrot.slane %v426_v3, 7  ;;  %v427_v13 = vld [vmem:[%s421_s24] sm:$0xff]  ;;  %s1223_s23 = smov 16   ;;  %s1224_s24 = smov 24  }
  0x10   : > { %565 = vmatpush.msrb.mxu3 %v522_v7  ;;  %v1175_v17 = vld [vmem:[%s1472_s4] ss:$0 sm:$0xff] }
  0x11   : > { %1133 = vmatmul.msk.f32.vlgmr.msra.gmra.mxu3 %vm441_vm1, %v435_v4  ;;  %1131 = vmatmul.msk.f32.vlgmr.msra.gmra.mxu1 %vm441_vm1, %v431_v5 }
  0x12   : > { %566 = vmatpush.msrb.mxu3 %v521_v8 }
  0x14   : > { %567 = vmatpush.msrb.mxu3 %v520_v9 }
  0x8c   : > { %v464_v10 = vpop.f32.mrf.mxu0 }
  0x8e   : > { %v489_v11 = vpop.f32.mrf.mxu1 }
  0x8f   : > { %v490_v12 = vadd.f32 %v489_v11, %v464_v10 }
  0x94   : > { %v515_v14 = vpop.f32.mrf.mxu3 }
  0x95   : > { %v518_v15 = vadd.f32 %v515_v14, %v490_v12 }
  0x97   : > { %v1327_v16 = vadd.f32 %v518_v15, %v427_v13 }
  0x99   : > { %1134 = vmatmul.msk.f32.vlgmr.msrb.gmra.mxu3 %vm548_vm2, %v1327_v16 }
 0x11c   : > { %v569_v18 = vpop.f32.mrf.mxu3 }
 0x11d   : > { %v1334_v19 = vadd.f32 %v1175_v17, %v569_v18 }
 0x11f   : > { %809 = vrot.lane.b32.xlu2 %v1334_v19, %s1211_s28  ;;  %811 = vrot.lane.b32.xlu1 %v1334_v19, %s1212_s29 }
 0x120   : > { %653 = vrot.lane.b32.xlu0 %v1334_v19, %s1213_s30 }
 0x127   : > { %732 = vrot.lane.b32.xlu2 %v1334_v19, %s1214_s13  ;;  %573 = vrot.lane.b32.xlu1 %v1334_v19, %s1215_s14 }
 0x128   : > { %651 = vrot.lane.b32.xlu0 %v1334_v19, %s1216_s15 }
 0x130   : > { %730 = vrot.lane.b32.xlu0 %v1334_v19, %s1217_s16 }
 0x179   : > { %v810_v20 = vpop.permute.xlu2 %809 }
 0x181   : > { %v733_v24 = vpop.permute.xlu2 %732 }
 0x191   : > { %v812_v21 = vpop.permute.xlu1 %811 }
 0x192   : > { %v654_v22 = vpop.permute.xlu0 %653 }
 0x193   : > { %1138 = vmatpush.xpose.msk.msra.mxu2 %vm575_vm3, %v654_v22 }
 0x197   : > { %1144 = vmatpush.xpose.msk.msrb.mxu2 %vm575_vm3, %v812_v21 }
 0x199   : > { %v574_v23 = vpop.permute.xlu1 %573 }
 0x19a   : > { %v652_v25 = vpop.permute.xlu0 %651  ;;  %1135 = vmatpush.xpose.msk.msrb.mxu0 %vm575_vm3, %v574_v23 }
 0x19b   : > { %1139 = vmatmul.msk.f32.vlgmr.msra.gmra.mxu2 %vm575_vm3, %v652_v25 }
 0x19d   : > { %1136 = vmatmul.msk.f32.vlgmr.msrb.gmra.mxu0 %vm575_vm3, %v1334_v19 }
 0x19e   : > { %1141 = vmatpush.xpose.msk.msra.mxu0 %vm575_vm3, %v733_v24 }
 0x1a2   : > { %v731_v26 = vpop.permute.xlu0 %730 }
 0x1a3   : > { %1145 = vmatmul.msk.f32.vlgmr.msrb.gmra.mxu2 %vm575_vm3, %v810_v20 }
 0x1a5   : > { %1142 = vmatmul.msk.f32.vlgmr.msra.gmra.mxu0 %vm575_vm3, %v731_v26 }
 0x21a   : > { %v597_v27 = vpop.f32.mrf.mxu0 }
 0x21b   : > { %v600_v28 = vmul.f32 0.35355338, %v597_v27 }
 0x21d   : > { %v601_v29 = vsel %vm575_vm3, %v600_v28, -inf }
 0x21e   : > { %v676_v30 = vpop.f32.mrf.mxu2  ;;  %602 = vmax.xlane.f32.xlu2 %v601_v29 }
 0x21f   : > { %v679_v31 = vmul.f32 0.35355338, %v676_v30 }
 0x221   : > { %v680_v32 = vsel %vm575_vm3, %v679_v31, -inf }
 0x222   : > { %681 = vmax.xlane.f32.xlu1 %v680_v32  ;;  %v755_v33 = vpop.f32.mrf.mxu0 }
 0x223   : > { %v758_v34 = vmul.f32 0.35355338, %v755_v33 }
 0x225   : > { %v759_v35 = vsel %vm575_vm3, %v758_v34, -inf }
 0x226   : > { %v834_v36 = vpop.f32.mrf.mxu2  ;;  %760 = vmax.xlane.f32.xlu2 %v759_v35 }
 0x227   : > { %v837_v37 = vmul.f32 0.35355338, %v834_v36 }
 0x229   : > { %v838_v38 = vsel %vm575_vm3, %v837_v37, -inf }
 0x22a   : > { %839 = vmax.xlane.f32.xlu0 %v838_v38 }
 0x23e   : > { %625 = vrot.lane.b32.xlu0 %v1334_v19, %s1218_s17 }
 0x291   : > { %v603_v39 = vpop.xlane.xlu2 %602 }
 0x292   : > { %v604_v40 = vsub.f32 %v600_v28, %v603_v39 }
 0x294   : > { %v605_v41 = vmul.f32 1.442695, %v604_v40 }
 0x295   : > { %v682_v42 = vpop.xlane.xlu1 %681 }
 0x296   : > { %1179 = vpow2.f32 %v605_v41  ;;  %v683_v43 = vsub.f32 %v679_v31, %v682_v42 }
 0x298   : > { %v684_v44 = vmul.f32 1.442695, %v683_v43 }
 0x299   : > { %v761_v45 = vpop.xlane.xlu2 %760 }
 0x29a   : > { %1181 = vpow2.f32 %v684_v44  ;;  %v762_v46 = vsub.f32 %v758_v34, %v761_v45 }
 0x29c   : > { %v1180_v47 = vpop.eup %1179  ;;  %v763_v48 = vmul.f32 1.442695, %v762_v46 }
 0x29d   : > { %v840_v49 = vpop.xlane.xlu0 %839  ;;  %v607_v50 = vsel %vm575_vm3, %v1180_v47, 0.0 }
 0x29e   : > { %v841_v51 = vsub.f32 %v837_v37, %v840_v49  ;;  %608 = vadd.xlane.f32.xlu2 %v607_v50  ;;  %1183 = vpow2.f32 %v763_v48 }
 0x2a0   : > { %v1358_v52 = vpop.eup %1181  ;;  %v842_v53 = vmul.f32 1.442695, %v841_v51 }
 0x2a1   : > { %v686_v54 = vsel %vm575_vm3, %v1358_v52, 0.0 }
 0x2a2   : > { %1185 = vpow2.f32 %v842_v53  ;;  %687 = vadd.xlane.f32.xlu1 %v686_v54  ;;  %v527_v53 = vld [vmem:[%s1473_s5 + $0x10] sm:$0xff]  ;;  %v526_v54 = vld [vmem:[%s1473_s5 + $0x8] sm:$0xff] }
 0x2a4   : > { %v1362_v55 = vpop.eup %1183 }
 0x2a5   : > { %v765_v57 = vsel %vm575_vm3, %v1362_v55, 0.0 }
 0x2a8   : > { %v1364_v56 = vpop.eup %1185 }
 0x2a9   : > { %v844_v58 = vsel %vm575_vm3, %v1364_v56, 0.0 }
 0x2aa   : > { %766 = vadd.xlane.f32.xlu1 %v765_v57  ;;  %845 = vadd.xlane.f32.xlu0 %v844_v58 }
 0x2b0   : > { %v626_v59 = vpop.permute.xlu0 %625 }
 0x2b1   : > { %646 = vmatpush.msrb.mxu1 %v626_v59 }
 0x2b6   : > { %704 = vrot.lane.b32.xlu2 %v1334_v19, %s1219_s18  ;;  %s425_s18 = scalar_lea.vmem %s1480_s12, %s1305_s27 }
 0x2be   : > { %783 = vrot.lane.b32.xlu0 %v1334_v19, %s1220_s19 }
 0x2c3   : > { %862 = vrot.lane.b32.xlu1 %v1334_v19, %s1221_s20 }
 0x311   : > { %v609_v60 = vpop.xlane.xlu2 %608 }
 0x312   : > { %1187 = vrcp.f32 %v609_v60  ;;  %v619_v3 = vand.u32 2147483647, %v609_v60  ;;  %v621_v4 = vand.u32 2147483648, %v609_v60  ;;  %vm615_vm5 = vweird.f32 %v609_v60 }
 0x314   : > { %vm620_vm7 = vcmp.eq.f32.partialorder %v619_v3, 8.507059e+37  ;;  %v622_v11 = vor.u32 1.1754944e-38, %v621_v4  ;;  %v1225_v3 = vmov 32.0  }
 0x315   : > { %v688_v61 = vpop.xlane.xlu1 %687 }
 0x316   : > { %1189 = vrcp.f32 %v688_v61  ;;  %v700_v12 = vand.u32 2147483648, %v688_v61  ;;  %v698_v14 = vand.u32 2147483647, %v688_v61  ;;  %vm694_vm9 = vweird.f32 %v688_v61 }
 0x318   : > { %v1188_v62 = vpop.eup %1187  ;;  %v701_v21 = vor.u32 1.1754944e-38, %v700_v12  ;;  %vm699_vm11 = vcmp.eq.f32.partialorder %v698_v14, 8.507059e+37  ;;  %v533_v14 = vld [vmem:[%s1475_s7 + $0x18] sm:$0xff] }
 0x319   : > { %v611_v63 = vmul.f32 %v1188_v62, %v609_v60  ;;  %v705_v0 = vpop.permute.xlu2 %704  ;;  %vm616_vm4 = vweird.f32 %v1188_v62 }
 0x31a   : > { %725 = vmatpush.msra.mxu3 %v705_v0  ;;  %vm617_vm6 = vmor %vm615_vm5, %vm616_vm4 }
 0x31b   : > { %v612_v1 = vsub.f32 1.0, %v611_v63 }
 0x31c   : > { %v1190_v2 = vpop.eup %1189 }
 0x31d   : > { %v613_v5 = vmul.f32 %v1188_v62, %v612_v1  ;;  %v690_v6 = vmul.f32 %v1190_v2, %v688_v61  ;;  %v767_v7 = vpop.xlane.xlu1 %766  ;;  %v846_v8 = vpop.xlane.xlu0 %845  ;;  %vm695_vm8 = vweird.f32 %v1190_v2 }
 0x31e   : > { %1191 = vrcp.f32 %v767_v7  ;;  %vm696_vm10 = vmor %vm694_vm9, %vm695_vm8  ;;  %v779_v29 = vand.u32 2147483648, %v767_v7  ;;  %v777_v32 = vand.u32 2147483647, %v767_v7  ;;  %vm773_vm13 = vweird.f32 %v767_v7 }
 0x31f   : > { %v614_v9 = vadd.f32 %v1188_v62, %v613_v5  ;;  %v691_v10 = vsub.f32 1.0, %v690_v6  ;;  %1193 = vrcp.f32 %v846_v8  ;;  %v858_v37 = vand.u32 2147483648, %v846_v8 }
 0x320   : > { %v780_v35 = vor.u32 1.1754944e-38, %v779_v29  ;;  %vm778_vm0 = vcmp.eq.f32.partialorder %v777_v32, 8.507059e+37  ;;  %vm852_vm1 = vweird.f32 %v846_v8  ;;  %v856_v39 = vand.u32 2147483647, %v846_v8 }
 0x321   : > { %v692_v13 = vmul.f32 %v1190_v2, %v691_v10  ;;  %v618_v15 = vsel %vm617_vm6, %v1188_v62, %v614_v9  ;;  %v859_v43 = vor.u32 1.1754944e-38, %v858_v37  ;;  %vm901_vm6 = vcmask 130048   ;;  %v1176_v62 = vld [vmem:[%s1474_s6] ss:$0 sm:$0xff]  ;;  %v540_v37 = vld [vmem:[%s1477_s9 + $0x28] sm:$0xff] }
 0x322   : > { %v623_v17 = vsel %vm620_vm7, %v622_v11, %v618_v15  ;;  %vm857_vm5 = vcmp.eq.f32.partialorder %v856_v39, 8.507059e+37  ;;  %vm903_vm7 = vcmask 195584   ;;  %1195 = vrcp.f32 %v1225_v3  ;;  %v532_v15 = vld [vmem:[%s1475_s7 + $0x10] sm:$0xff]  ;;  %v538_v39 = vld [vmem:[%s1477_s9 + $0x18] sm:$0xff] }
 0x323   : > { %v693_v18 = vadd.f32 %v1190_v2, %v692_v13  ;;  %v624_v19 = vmul.f32 %v1180_v47, %v623_v17  ;;  %v531_v17 = vld [vmem:[%s1475_s7 + $0x8] sm:$0xff] }
 0x324   : > { %v1192_v20 = vpop.eup %1191 }
 0x325   : > { %v1194_v22 = vpop.eup %1193  ;;  %v697_v23 = vsel %vm696_vm10, %v1190_v2, %v693_v18  ;;  %v769_v24 = vmul.f32 %v1192_v20, %v767_v7  ;;  %1137 = vmatmul.msk.f32.vlgmr.msrb.gmra.mxu1 %vm575_vm3, %v624_v19  ;;  %vm774_vm12 = vweird.f32 %v1192_v20  ;;  %v530_v18 = vld [vmem:[%s1475_s7] sm:$0xff] }
 0x326   : > { %v702_v25 = vsel %vm699_vm11, %v701_v21, %v697_v23  ;;  %v848_v26 = vmul.f32 %v1194_v22, %v846_v8  ;;  %vm853_vm14 = vweird.f32 %v1194_v22  ;;  %vm775_vm15 = vmor %vm773_vm13, %vm774_vm12  ;;  %vm1003_vm11 = vcmask 523264  }
 0x327   : > { %v770_v27 = vsub.f32 1.0, %v769_v24  ;;  %v703_v28 = vmul.f32 %v1358_v52, %v702_v25  ;;  %vm854_vm4 = vmor %vm852_vm1, %vm853_vm14  ;;  %v528_v52 = vld [vmem:[%s1473_s5 + $0x18] sm:$0xff] }
 0x328   : > { %v849_v30 = vsub.f32 1.0, %v848_v26  ;;  %923 = vmatpush.msrb.mxu0 %v528_v52  ;;  %v1196_v4 = vpop.eup %1195  ;;  %v1419_v26 = vld [vmem:[%s1479_s11] sm:$0xf] }
 0x329   : > { %v771_v31 = vmul.f32 %v1192_v20, %v770_v27  ;;  %1140 = vmatmul.msk.f32.vlgmr.msra.gmra.mxu3 %vm575_vm3, %v703_v28  ;;  %v936_v5 = vmul.f32 32.0, %v1196_v4  ;;  %v961_v29 = vperm.slane %v1419_v26, 0  ;;  %v963_v32 = vperm.slane %v1419_v26, 1 }
 0x32a   : > { %v850_v33 = vmul.f32 %v1194_v22, %v849_v30  ;;  %924 = vmatpush.msrb.mxu0 %v527_v53 }
 0x32b   : > { %v772_v34 = vadd.f32 %v1192_v20, %v771_v31  ;;  %v937_v6 = vsub.f32 1.0, %v936_v5 }
 0x32c   : > { %v851_v36 = vadd.f32 %v1194_v22, %v850_v33  ;;  %925 = vmatpush.msrb.mxu0 %v526_v54 }
 0x32d   : > { %v776_v38 = vsel %vm775_vm15, %v1192_v20, %v772_v34  ;;  %v938_v7 = vmul.f32 %v1196_v4, %v937_v6 }
 0x32e   : > { %v781_v40 = vsel %vm778_vm0, %v780_v35, %v776_v38  ;;  %v855_v41 = vsel %vm854_vm4, %v1194_v22, %v851_v36  ;;  %v542_v35 = vld [vmem:[%s1477_s9 + $0x38] sm:$0xff]  ;;  %v541_v36 = vld [vmem:[%s1477_s9 + $0x30] sm:$0xff]  ;;  %v539_v38 = vld [vmem:[%s1477_s9 + $0x20] sm:$0xff] }
 0x32f   : > { %v782_v42 = vmul.f32 %v1362_v55, %v781_v40  ;;  %v860_v45 = vsel %vm857_vm5, %v859_v43, %v855_v41  ;;  %v525_v55 = vld [vmem:[%s1473_s5] sm:$0xff]  ;;  %v939_v8 = vadd.f32 %v1196_v4, %v938_v7  ;;  %1015 = vmatpush.msra.mxu2 %v542_v35  ;;  %v537_v40 = vld [vmem:[%s1477_s9 + $0x10] sm:$0xff]  ;;  %v536_v41 = vld [vmem:[%s1477_s9 + $0x8] sm:$0xff] }
 0x330   : > { %v784_v44 = vpop.permute.xlu0 %783  ;;  %v861_v47 = vmul.f32 %v1364_v56, %v860_v45  ;;  %926 = vmatpush.msrb.mxu0 %v525_v55  ;;  %v1177_v43 = vld [vmem:[%s1476_s8] ss:$0 sm:$0xff] }
 0x331   : > { %804 = vmatpush.msra.mxu1 %v784_v44  ;;  %1016 = vmatpush.msra.mxu2 %v541_v36  ;;  %v1178_v55 = vld [vmem:[%s1478_s10] ss:$0 sm:$0xff] }
 0x332   : > { %1143 = vmatmul.msk.f32.vlgmr.msra.gmra.mxu1 %vm575_vm3, %v782_v42  ;;  %v535_v42 = vld [vmem:[%s1477_s9] sm:$0xff] }
 0x333   : > { %983 = vmatpush.msrb.mxu1 %v533_v14  ;;  %1017 = vmatpush.msra.mxu2 %v540_v37 }
 0x335   : > { %v863_v46 = vpop.permute.xlu1 %862  ;;  %984 = vmatpush.msrb.mxu1 %v532_v15  ;;  %1018 = vmatpush.msra.mxu2 %v539_v38 }
 0x336   : > { %883 = vmatpush.msrb.mxu3 %v863_v46 }
 0x337   : > { %1146 = vmatmul.msk.f32.vlgmr.msrb.gmra.mxu3 %vm575_vm3, %v861_v47  ;;  %985 = vmatpush.msrb.mxu1 %v531_v17 }
 0x338   : > { %1019 = vmatpush.msra.mxu2 %v538_v39 }
 0x339   : > { %986 = vmatpush.msrb.mxu1 %v530_v18 }
 0x33a   : > { %1020 = vmatpush.msra.mxu2 %v537_v40 }
 0x33c   : > { %1021 = vmatpush.msra.mxu2 %v536_v41 }
 0x33e   : > { %1022 = vmatpush.msra.mxu2 %v535_v42 }
 0x3a2   : > { %v648_v48 = vpop.f32.mrf.mxu1 }
 0x3ac   : > { %v727_v49 = vpop.f32.mrf.mxu3 }
 0x3ad   : > { %889 = vrot.lane.b32.xlu2 %v727_v49, %s1222_s22 }
 0x3af   : > { %v806_v50 = vpop.f32.mrf.mxu1 }
 0x3b0   : > { %893 = vrot.lane.b32.xlu1 %v806_v50, %s1223_s23 }
 0x3ba   : > { %v885_v51 = vpop.f32.mrf.mxu3 }
 0x3bb   : > { %897 = vrot.lane.b32.xlu0 %v885_v51, %s1224_s24 }
 0x407   : > { %v890_v56 = vpop.permute.xlu2 %889 }
 0x408   : > { %v900_v58 = vsel %vm575_vm3, %v648_v48, %v890_v56  ;;  %vm940_vm3 = vweird.f32 %v1196_v4 }
 0x409   : > { %v1399_v9 = vsel %vm940_vm3, %v1196_v4, %v939_v8 }
 0x422   : > { %v894_v57 = vpop.permute.xlu1 %893 }
 0x423   : > { %v902_v59 = vsel %vm901_vm6, %v900_v58, %v894_v57 }
 0x42d   : > { %v898_v60 = vpop.permute.xlu0 %897 }
 0x42e   : > { %v904_v61 = vsel %vm903_vm7, %v902_v59, %v898_v60 }
 0x42f   : > { %1147 = vmatmul.msk.f32.vlgmr.msrb.gmra.mxu0 %vm548_vm2, %v904_v61 }
 0x4ac   : > { %v928_v63 = vpop.f32.mrf.mxu0 }
 0x4ad   : > { %v929_v0 = vadd.f32 %v1176_v62, %v928_v63 }
 0x4af   : > { %v931_v1 = vadd.f32 %v929_v0, %v1327_v16 }
 0x4b1   : > { %v932_v2 = vsel %vm548_vm2, %v931_v1, 0.0 }
 0x4b2   : > { %933 = vadd.xlane.f32.xlu2 %v932_v2 }
 0x525   : > { %v934_v10 = vpop.xlane.xlu2 %933 }
 0x526   : > { %v942_v11 = vmul.f32 %v1399_v9, %v934_v10 }
 0x528   : > { %v943_v12 = vsub.f32 %v931_v1, %v942_v11  ;;  %v1050_v11 = vperm.slane %v1419_v26, 2 }
 0x52a   : > { %v944_v13 = vmul.f32 %v943_v12, %v943_v12 }
 0x52c   : > { %v945_v16 = vsel %vm548_vm2, %v944_v13, 0.0  ;;  %v1052_v13 = vperm.slane %v1419_v26, 3 }
 0x52d   : > { %946 = vadd.xlane.f32.xlu1 %v945_v16 }
 0x5a0   : > { %v947_v19 = vpop.xlane.xlu1 %946 }
 0x5a1   : > { %v948_v20 = vmul.f32 %v947_v19, %v1399_v9 }
 0x5a3   : > { %v949_v21 = vadd.f32 1e-05, %v948_v20 }
 0x5a5   : > { %1197 = vrsqrt.f32 %v949_v21  ;;  %vm956_vm9 = vweird.f32 %v949_v21 }
 0x5ab   : > { %v1198_v22 = vpop.eup %1197 }
 0x5ac   : > { %v951_v23 = vmul.f32 %v1198_v22, %v949_v21  ;;  %vm957_vm8 = vweird.f32 %v1198_v22 }
 0x5ad   : > { %vm958_vm10 = vmor %vm956_vm9, %vm957_vm8 }
 0x5ae   : > { %v952_v24 = vmul.f32 %v1198_v22, %v951_v23 }
 0x5b0   : > { %v953_v25 = vmul.f32 0.5, %v952_v24 }
 0x5b2   : > { %v954_v27 = vsub.f32 1.5, %v953_v25 }
 0x5b4   : > { %v955_v28 = vmul.f32 %v1198_v22, %v954_v27 }
 0x5b6   : > { %v959_v30 = vsel %vm958_vm10, %v1198_v22, %v955_v28 }
 0x5b7   : > { %v960_v31 = vmul.f32 %v959_v30, %v943_v12 }
 0x5b9   : > { %v962_v33 = vmul.f32 %v961_v29, %v960_v31 }
 0x5bb   : > { %v964_v34 = vadd.f32 %v963_v32, %v962_v33 }
 0x5bd   : > { %1148 = vmatmul.msk.f32.vlgmr.msrb.gmra.mxu1 %vm548_vm2, %v964_v34 }
 0x63a   : > { %v988_v44 = vpop.f32.mrf.mxu1 }
 0x63b   : > { %v989_v45 = vadd.f32 %v1177_v43, %v988_v44 }
 0x63d   : > { %v991_v46 = vmul.f32 %v989_v45, %v989_v45 }
 0x63f   : > { %v992_v47 = vmul.f32 %v991_v46, %v989_v45 }
 0x641   : > { %v993_v48 = vmul.f32 0.044715, %v992_v47 }
 0x643   : > { %v994_v49 = vadd.f32 %v993_v48, %v989_v45 }
 0x645   : > { %v995_v50 = vmul.f32 0.7978846, %v994_v49 }
 0x647   : > { %1199 = vtanh.f32 %v995_v50 }
 0x64d   : > { %v1200_v51 = vpop.eup %1199 }
 0x64e   : > { %v997_v52 = vadd.f32 1.0, %v1200_v51 }
 0x650   : > { %v998_v53 = vmul.f32 0.5, %v997_v52 }
 0x652   : > { %v999_v54 = vmul.f32 %v998_v53, %v989_v45 }
 0x654   : > { %1149 = vmatmul.msk.f32.vlgmr.msra.gmra.mxu2 %vm1003_vm11, %v999_v54 }
 0x6d7   : > { %v1024_v56 = vpop.f32.mrf.mxu2 }
 0x6d8   : > { %v1025_v57 = vadd.f32 %v1178_v55, %v1024_v56 }
 0x6da   : > { %v1027_v58 = vadd.f32 %v1025_v57, %v964_v34 }
 0x6dc   : > { %v1028_v59 = vsel %vm548_vm2, %v1027_v58, 0.0 }
 0x6dd   : > { %1029 = vadd.xlane.f32.xlu0 %v1028_v59 }
 0x750   : > { %v1030_v60 = vpop.xlane.xlu0 %1029 }
 0x751   : > { %v1031_v61 = vmul.f32 %v1030_v60, %v1399_v9 }
 0x753   : > { %v1032_v62 = vsub.f32 %v1027_v58, %v1031_v61 }
 0x755   : > { %v1033_v63 = vmul.f32 %v1032_v62, %v1032_v62 }
 0x757   : > { %v1034_v0 = vsel %vm548_vm2, %v1033_v63, 0.0 }
 0x758   : > { %1035 = vadd.xlane.f32.xlu2 %v1034_v0 }
 0x7cb   : > { %v1036_v1 = vpop.xlane.xlu2 %1035 }
 0x7cc   : > { %v1037_v2 = vmul.f32 %v1036_v1, %v1399_v9 }
 0x7ce   : > { %v1038_v3 = vadd.f32 1e-05, %v1037_v2 }
 0x7d0   : > { %1201 = vrsqrt.f32 %v1038_v3  ;;  %vm1045_vm13 = vweird.f32 %v1038_v3 }
 0x7d6   : > { %v1202_v4 = vpop.eup %1201 }
 0x7d7   : > { %v1040_v5 = vmul.f32 %v1202_v4, %v1038_v3  ;;  %vm1046_vm12 = vweird.f32 %v1202_v4 }
 0x7d8   : > { %vm1047_vm14 = vmor %vm1045_vm13, %vm1046_vm12 }
 0x7d9   : > { %v1041_v6 = vmul.f32 %v1202_v4, %v1040_v5 }
 0x7db   : > { %v1042_v7 = vmul.f32 0.5, %v1041_v6 }
 0x7dd   : > { %v1043_v8 = vsub.f32 1.5, %v1042_v7 }
 0x7df   : > { %v1044_v10 = vmul.f32 %v1202_v4, %v1043_v8 }
 0x7e1   : > { %v1048_v12 = vsel %vm1047_vm14, %v1202_v4, %v1044_v10 }
 0x7e2   : > { %v1049_v16 = vmul.f32 %v1048_v12, %v1032_v62 }
 0x7e4   : > { %v1051_v14 = vmul.f32 %v1050_v11, %v1049_v16 }
 0x7e6   : > { %v1053_v9 = vadd.f32 %v1052_v13, %v1051_v14 }
 0x7e8   : > { %1054 = vst.msk [vmem:[%s425_s18] sm:$0xff] %vm548_vm2, %v1053_v9 }
 0x7e9 PF: > { %s22_s21 = sadd.s32 1, %s1209_s21  }
 0x7ea   : > { %p19_p4 = scmp.ge.s32.totalorder %s22_s21, 4  }
 0x7ec   :  { %21 = sbr.rel (!%p19_p4) target bundleno = 1 (0x1), region = 101 }

// kernel: separateformer_forward.9
= control target key start
LH: loop header
LB: loop body
LE: loop exit
PB: predicated region body
PF: predicated region fallthrough
CT: control target
= control target key end

     0   :  { %s1975_s0 = inlined_call_operand.vmem [shape: f32[2,8,32], index: 0, kind: input, shape index: {}]   ;;  %s1976_s1 = inlined_call_operand.vmem [shape: f32[2,8,32], index: 1, kind: input, shape index: {}]   ;;  %s1977_s2 = inlined_call_operand.vmem [shape: f32[32,32], index: 2, kind: input, shape index: {}]   ;;  %s1978_s3 = inlined_call_operand.vmem [shape: f32[1,32], index: 3, kind: input, shape index: {}]   ;;  %s1979_s4 = inlined_call_operand.vmem [shape: f32[32,64], index: 4, kind: input, shape index: {}]   ;;  %s1980_s5 = inlined_call_operand.vmem [shape: f32[1,64], index: 5, kind: input, shape index: {}]   ;;  %s1981_s6 = inlined_call_operand.vmem [shape: f32[32,32], index: 6, kind: input, shape index: {}]   ;;  %s1982_s7 = inlined_call_operand.vmem [shape: f32[1,32], index: 7, kind: input, shape index: {}]   ;;  %s1983_s8 = inlined_call_operand.vmem [shape: f32[32,64], index: 8, kind: input, shape index: {}]   ;;  %s1984_s9 = inlined_call_operand.vmem [shape: f32[1,64], index: 9, kind: input, shape index: {}]   ;;  %s1985_s10 = inlined_call_operand.vmem [shape: f32[64,32], index: 10, kind: input, shape index: {}]   ;;  %s1986_s11 = inlined_call_operand.vmem [shape: f32[1,32], index: 11, kind: input, shape index: {}]   ;;  %s1987_s12 = inlined_call_operand.vmem [shape: f32[4,32], index: 12, kind: input, shape index: {}]   ;;  %s1988_s13 = inlined_call_operand.vmem [shape: f32[32,4], index: 13, kind: input, shape index: {}]   ;;  %s1989_s14 = inlined_call_operand.vmem [shape: f32[1,4], index: 14, kind: input, shape index: {}]   ;;  %s1990_s15 = inlined_call_operand.vmem [shape: f32[2,8,4], index: 15, kind: input, shape index: {}]   ;;  %s1991_s16 = inlined_call_operand.vmem [shape: f32[2,8,4], index: 16, kind: input, shape index: {}]   ;;  %s1992_s17 = inlined_call_operand.vmem [shape: f32[2,8,4], index: 17, kind: input, shape index: {}]   ;;  %s1993_s18 = inlined_call_operand.vmem [shape: f32[2,2,4], index: 18, kind: input, shape index: {}]   ;;  %s1994_s19 = inlined_call_operand.vmem [shape: f32[5,4], index: 19, kind: input, shape index: {}]   ;;  %s1995_s20 = inlined_call_operand.vmem [shape: f32[2,8,4], index: 20, kind: output, shape index: {0}]   ;;  %s1996_s21 = inlined_call_operand.vmem [shape: f32[2,8,4], index: 21, kind: output, shape index: {1}]  }
   0x1   :  { %2000 = sst [smem:[#allocation3_spill]] %s1975_s0 }
   0x2   :  { %2001 = sst [smem:[#allocation4_spill]] %s1976_s1 }
   0x3   :  { %2002 = sst [smem:[#allocation5_spill]] %s1977_s2  ;;  %s1756_s2 = smov 0  }
   0x4   :  { %2003 = sst [smem:[#allocation6_spill]] %s1978_s3 }
   0x5   :  { %2004 = sst [smem:[#allocation7_spill]] %s1979_s4 }
   0x6   :  { %2005 = sst [smem:[#allocation8_spill]] %s1980_s5 }
   0x7 LB: > { %2006 = sst [smem:[#allocation2_spill]] %s1633_s2  ;;  %s1540_s25 = sadd.s32 4294967295, %s1633_s2   ;;  %s1633_s2 = sphi %s1756_s2, %s32_s2  }
   0x8   : > { %p1544_p0 = scmp.ge.s32.totalorder %s1633_s2, 1  ;;  %p634_p1 = scmp.lt.s32.totalorder %s1633_s2, 3 }
   0xa   : > { %p635_p2 = pnand %p1544_p0, %p634_p1 }
   0xb   : > { %s2007_s3 = sld [smem:[#allocation7_spill]] (!%p635_p2)  ;;  %p716_p3 = scmp.lt.s32.totalorder (!%p635_p2), %s1540_s25, 1 }
   0xc   : > { %638 = sbr.rel (%p635_p2) target bundleno = 2296 (0x8f8), region = 100  ;;  %s2008_s30 = sld [smem:[#allocation5_spill]] (!%p635_p2) }
   0xd   : > { %s2009_s23 = sld [smem:[#allocation3_spill]] (!%p635_p2)  ;;  %s1637_s24 = smov (!%p635_p2), 112  }
   0xe   : > { %s2010_s2 = sld [smem:[#allocation4_spill]] (!%p635_p2)  ;;  %s1638_s26 = smov (!%p635_p2), 96  }
   0xf   : > { %s2011_s4 = sld [smem:[#allocation8_spill]] (!%p635_p2)  ;;  %s1640_s28 = smov (!%p635_p2), 72  }
  0x10   : > { %s1641_s0 = smov (!%p635_p2), 8   ;;  %s1643_s5 = smov (!%p635_p2), 24  }
  0x11   : > { %v785_v0 = vld [vmem:[%s2007_s3 + $0x18] sm:$0xff]  ;;  %v784_v1 = vld [vmem:[%s2007_s3 + $0x10] sm:$0xff]  ;;  %v783_v4 = vld [vmem:[%s2007_s3 + $0x8] sm:$0xff]  ;;  %s2015_s25 = smov (!%p716_p3, %s1540_s25), 1  ;;  %vm758_vm0 = vcmask 261120   ;;  %vm813_vm1 = vcmask 64512  }
  0x12   : > { %v753_v2 = vld [vmem:[%s2008_s30 + $0x18] sm:$0xff]  ;;  %805 = vmatpush.msra.mxu1 %v785_v0  ;;  %v752_v3 = vld [vmem:[%s2008_s30 + $0x10] sm:$0xff]  ;;  %v751_v5 = vld [vmem:[%s2008_s30 + $0x8] sm:$0xff]  ;;  %s1788_s29 = sshll.u32 %s2015_s25, 3 }
  0x13   : > { %774 = vmatpush.msra.mxu0 %v753_v2  ;;  %v782_v6 = vld [vmem:[%s2007_s3] sm:$0xff]  ;;  %s719_s1 = scalar_lea.vmem %s2009_s23, %s1788_s29  ;;  %s2012_s23 = sld [smem:[#allocation6_spill]] }
  0x14   : > { %806 = vmatpush.msra.mxu1 %v784_v1  ;;  %v750_v7 = vld [vmem:[%s2008_s30] sm:$0xff]  ;;  %s723_s27 = scalar_lea.vmem %s2010_s2, %s1788_s29  ;;  %s1635_s2 = smov 104  }
  0x15   : > { %775 = vmatpush.msra.mxu0 %v752_v3  ;;  %v748_v8 = vld [vmem:[%s719_s1] sm:$0xff]  ;;  %s1636_s1 = smov 120   ;;  %s727_s22 = scalar_lea.vmem %s1990_s15, %s1788_s29 }
  0x16   : > { %807 = vmatpush.msra.mxu1 %v783_v4  ;;  %v1801_v9 = vld [vmem:[%s723_s27] sm:$0xff]  ;;  %s1639_s27 = smov 88  }
  0x17   : > { %776 = vmatpush.msra.mxu0 %v751_v5  ;;  %v1593_v10 = vld [vmem:[%s2011_s4] ss:$0 sm:$0xff]  ;;  %s1642_s4 = smov 80  }
  0x18   : > { %808 = vmatpush.msra.mxu1 %v782_v6 }
  0x19   : > { %777 = vmatpush.msra.mxu0 %v750_v7  ;;  %1554 = vmatmul.msk.f32.vlgmr.msra.gmra.mxu1 %vm758_vm0, %v748_v8  ;;  %v1594_v11 = vld [vmem:[%s2012_s23] ss:$0 sm:$0xff]  ;;  %s1550_s23 = sshll.u32 %s2015_s25, 1 }
  0x1a   : > { %1553 = vmatmul.msk.f32.vlgmr.msra.gmra.mxu0 %vm758_vm0, %v1801_v9 }
  0x96   : > { %v810_v12 = vpop.f32.mrf.mxu1 }
  0x97   : > { %v779_v13 = vpop.f32.mrf.mxu0  ;;  %v1812_v14 = vadd.f32 %v1593_v10, %v810_v12 }
  0x98   : > { %v780_v15 = vadd.f32 %v1594_v11, %v779_v13 }
  0x99   : > { %1051 = vrot.lane.b32.xlu2 %v1812_v14, %s1635_s2  ;;  %893 = vrot.lane.b32.xlu1 %v1812_v14, %s1636_s1 }
  0x9a   : > { %1555 = vmatpush.xpose.msk.msra.mxu2 %vm813_vm1, %v1812_v14 }
  0x9d   : > { %1556 = vmatmul.msk.f32.vlgmr.msra.gmra.mxu2 %vm813_vm1, %v780_v15 }
  0xa1   : > { %1049 = vrot.lane.b32.xlu2 %v780_v15, %s1635_s2  ;;  %891 = vrot.lane.b32.xlu1 %v780_v15, %s1636_s1 }
  0xa9   : > { %970 = vrot.lane.b32.xlu2 %v780_v15, %s1637_s24  ;;  %972 = vrot.lane.b32.xlu1 %v1812_v14, %s1637_s24  ;;  %s731_s24 = scalar_lea.vmem %s1991_s16, %s1788_s29 }
  0xf3   : > { %v1052_v17 = vpop.permute.xlu2 %1051 }
  0xfb   : > { %v1050_v19 = vpop.permute.xlu2 %1049 }
 0x103   : > { %v971_v35 = vpop.permute.xlu2 %970 }
 0x10b   : > { %v894_v16 = vpop.permute.xlu1 %893 }
 0x10c   : > { %1558 = vmatpush.xpose.msk.msra.mxu3 %vm813_vm1, %v894_v16 }
 0x110   : > { %1564 = vmatpush.xpose.msk.msrb.mxu3 %vm813_vm1, %v1052_v17 }
 0x113   : > { %v892_v18 = vpop.permute.xlu1 %891 }
 0x114   : > { %1559 = vmatmul.msk.f32.vlgmr.msra.gmra.mxu3 %vm813_vm1, %v892_v18 }
 0x11b   : > { %v973_v34 = vpop.permute.xlu1 %972 }
 0x11c   : > { %1565 = vmatmul.msk.f32.vlgmr.msrb.gmra.mxu3 %vm813_vm1, %v1050_v19 }
 0x120   : > { %v837_v20 = vpop.f32.mrf.mxu2 }
 0x121   : > { %v840_v21 = vmul.f32 0.35355338, %v837_v20 }
 0x123   : > { %v841_v22 = vsel %vm813_vm1, %v840_v21, -inf }
 0x124   : > { %842 = vmax.xlane.f32.xlu0 %v841_v22 }
 0x197   : > { %v843_v23 = vpop.xlane.xlu0 %842  ;;  %v916_v24 = vpop.f32.mrf.mxu3 }
 0x198   : > { %v844_v25 = vsub.f32 %v840_v21, %v843_v23  ;;  %v919_v26 = vmul.f32 0.35355338, %v916_v24 }
 0x19a   : > { %v845_v27 = vmul.f32 1.442695, %v844_v25  ;;  %v920_v28 = vsel %vm813_vm1, %v919_v26, -inf }
 0x19b   : > { %921 = vmax.xlane.f32.xlu1 %v920_v28 }
 0x19c   : > { %1599 = vpow2.f32 %v845_v27 }
 0x19f   : > { %v1074_v29 = vpop.f32.mrf.mxu3 }
 0x1a0   : > { %v1077_v30 = vmul.f32 0.35355338, %v1074_v29 }
 0x1a2   : > { %v1600_v31 = vpop.eup %1599  ;;  %v1078_v32 = vsel %vm813_vm1, %v1077_v30, -inf }
 0x1a3   : > { %1079 = vmax.xlane.f32.xlu2 %v1078_v32  ;;  %v847_v33 = vsel %vm813_vm1, %v1600_v31, 0.0 }
 0x1a4   : > { %848 = vadd.xlane.f32.xlu0 %v847_v33 }
 0x1b8   : > { %865 = vrot.lane.b32.xlu0 %v1812_v14, %s1638_s26 }
 0x20e   : > { %v922_v36 = vpop.xlane.xlu1 %921 }
 0x20f   : > { %v923_v37 = vsub.f32 %v919_v26, %v922_v36 }
 0x211   : > { %v924_v38 = vmul.f32 1.442695, %v923_v37 }
 0x213   : > { %1601 = vpow2.f32 %v924_v38 }
 0x216   : > { %v1080_v39 = vpop.xlane.xlu2 %1079 }
 0x217   : > { %v1081_v40 = vsub.f32 %v1077_v30, %v1080_v39  ;;  %v849_v41 = vpop.xlane.xlu0 %848 }
 0x218   : > { %1603 = vrcp.f32 %v849_v41  ;;  %v861_v49 = vand.u32 2147483648, %v849_v41  ;;  %v859_v52 = vand.u32 2147483647, %v849_v41  ;;  %vm855_vm3 = vweird.f32 %v849_v41 }
 0x219   : > { %v1602_v42 = vpop.eup %1601  ;;  %v1082_v43 = vmul.f32 1.442695, %v1081_v40 }
 0x21a   : > { %v926_v44 = vsel %vm813_vm1, %v1602_v42, 0.0  ;;  %v862_v54 = vor.u32 1.1754944e-38, %v861_v49  ;;  %vm860_vm5 = vcmp.eq.f32.partialorder %v859_v52, 8.507059e+37 }
 0x21b   : > { %1605 = vpow2.f32 %v1082_v43  ;;  %927 = vadd.xlane.f32.xlu2 %v926_v44 }
 0x21e   : > { %v1604_v45 = vpop.eup %1603 }
 0x21f   : > { %v851_v46 = vmul.f32 %v1604_v45, %v849_v41  ;;  %vm856_vm2 = vweird.f32 %v1604_v45 }
 0x220   : > { %vm857_vm4 = vmor %vm855_vm3, %vm856_vm2 }
 0x221   : > { %v1830_v47 = vpop.eup %1605  ;;  %v852_v48 = vsub.f32 1.0, %v851_v46  ;;  %v1148_v46 = vld [vmem:[%s1981_s6 + $0x18] sm:$0xff] }
 0x222   : > { %v1084_v50 = vsel %vm813_vm1, %v1830_v47, 0.0 }
 0x223   : > { %v853_v51 = vmul.f32 %v1604_v45, %v852_v48  ;;  %1085 = vadd.xlane.f32.xlu1 %v1084_v50  ;;  %v1146_v48 = vld [vmem:[%s1981_s6 + $0x8] sm:$0xff]  ;;  %v1145_v50 = vld [vmem:[%s1981_s6] sm:$0xff] }
 0x225   : > { %v854_v53 = vadd.f32 %v1604_v45, %v853_v51 }
 0x227   : > { %v858_v55 = vsel %vm857_vm4, %v1604_v45, %v854_v53  ;;  %vm1141_vm4 = vcmask 130048  }
 0x228   : > { %v863_v56 = vsel %vm860_vm5, %v862_v54, %v858_v55  ;;  %vm1143_vm5 = vcmask 195584  }
 0x229   : > { %v864_v57 = vmul.f32 %v1600_v31, %v863_v56 }
 0x22a   : > { %v866_v58 = vpop.permute.xlu0 %865 }
 0x22b   : > { %886 = vmatpush.msrb.mxu0 %v866_v58 }
 0x22c   : > { %1557 = vmatmul.msk.f32.vlgmr.msrb.gmra.mxu0 %vm813_vm1, %v864_v57  ;;  %v1595_v57 = vld [vmem:[%s1982_s7] ss:$0 sm:$0xff] }
 0x22d   : > { %1561 = vmatpush.xpose.msk.msra.mxu0 %vm813_vm1, %v973_v34 }
 0x231   : > { %1168 = vmatpush.msrb.mxu0 %v1148_v46  ;;  %v1597_v46 = vld [vmem:[%s1986_s11] ss:$0 sm:$0xff] }
 0x234   : > { %1562 = vmatmul.msk.f32.vlgmr.msra.gmra.mxu0 %vm813_vm1, %v971_v35 }
 0x23c   : > { %944 = vrot.lane.b32.xlu1 %v1812_v14, %s1639_s27  ;;  %s1644_s27 = smov 16  }
 0x28e   : > { %v928_v59 = vpop.xlane.xlu2 %927 }
 0x28f   : > { %1607 = vrcp.f32 %v928_v59  ;;  %v940_v1 = vand.u32 2147483648, %v928_v59  ;;  %vm934_vm7 = vweird.f32 %v928_v59  ;;  %v938_v2 = vand.u32 2147483647, %v928_v59 }
 0x291   : > { %v941_v5 = vor.u32 1.1754944e-38, %v940_v1  ;;  %vm939_vm9 = vcmp.eq.f32.partialorder %v938_v2, 8.507059e+37 }
 0x295   : > { %v1608_v60 = vpop.eup %1607 }
 0x296   : > { %v930_v61 = vmul.f32 %v1608_v60, %v928_v59  ;;  %vm935_vm6 = vweird.f32 %v1608_v60  ;;  %v1086_v3 = vpop.xlane.xlu1 %1085 }
 0x297   : > { %vm936_vm8 = vmor %vm934_vm7, %vm935_vm6  ;;  %1609 = vrcp.f32 %v1086_v3  ;;  %v1098_v23 = vand.u32 2147483648, %v1086_v3  ;;  %vm1092_vm11 = vweird.f32 %v1086_v3  ;;  %v1096_v25 = vand.u32 2147483647, %v1086_v3 }
 0x298   : > { %v931_v62 = vsub.f32 1.0, %v930_v61 }
 0x299   : > { %v1099_v29 = vor.u32 1.1754944e-38, %v1098_v23  ;;  %vm1097_vm13 = vcmp.eq.f32.partialorder %v1096_v25, 8.507059e+37 }
 0x29a   : > { %v932_v63 = vmul.f32 %v1608_v60, %v931_v62  ;;  %v1645_v62 = vmov 32.0  }
 0x29c   : > { %v933_v0 = vadd.f32 %v1608_v60, %v932_v63 }
 0x29d   : > { %v1610_v15 = vpop.eup %1609 }
 0x29e   : > { %v937_v4 = vsel %vm936_vm8, %v1608_v60, %v933_v0  ;;  %v1088_v16 = vmul.f32 %v1610_v15, %v1086_v3  ;;  %vm1093_vm10 = vweird.f32 %v1610_v15 }
 0x29f   : > { %v942_v7 = vsel %vm939_vm9, %v941_v5, %v937_v4  ;;  %vm1094_vm12 = vmor %vm1092_vm11, %vm1093_vm10  ;;  %vm1260_vm9 = vcmask 523264  }
 0x2a0   : > { %v943_v10 = vmul.f32 %v1602_v42, %v942_v7  ;;  %v1089_v18 = vsub.f32 1.0, %v1088_v16 }
 0x2a2   : > { %v1090_v21 = vmul.f32 %v1610_v15, %v1089_v18 }
 0x2a4   : > { %v1091_v22 = vadd.f32 %v1610_v15, %v1090_v21 }
 0x2a6   : > { %v1095_v28 = vsel %vm1094_vm12, %v1610_v15, %v1091_v22  ;;  %v1888_v22 = vld [vmem:[%s1987_s12] sm:$0xf] }
 0x2a7   : > { %v1100_v30 = vsel %vm1097_vm13, %v1099_v29, %v1095_v28  ;;  %v1207_v25 = vperm.slane %v1888_v22, 0  ;;  %v1209_v28 = vperm.slane %v1888_v22, 1 }
 0x2a8   : > { %v1101_v32 = vmul.f32 %v1830_v47, %v1100_v30  ;;  %v1147_v47 = vld [vmem:[%s1981_s6 + $0x10] sm:$0xff] }
 0x2a9   : > { %v1838_v6 = vpop.f32.mrf.mxu0  ;;  %1169 = vmatpush.msrb.mxu0 %v1147_v47 }
 0x2ab   : > { %1170 = vmatpush.msrb.mxu0 %v1146_v48 }
 0x2ad   : > { %1171 = vmatpush.msrb.mxu0 %v1145_v50 }
 0x2ae   : > { %v945_v8 = vpop.permute.xlu1 %944 }
 0x2af   : > { %965 = vmatpush.msrb.mxu2 %v945_v8 }
 0x2b0   : > { %1560 = vmatmul.msk.f32.vlgmr.msrb.gmra.mxu2 %vm813_vm1, %v943_v10  ;;  %v1214_v10 = vld [vmem:[%s1983_s8 + $0x18] sm:$0xff] }
 0x2b1   : > { %v995_v11 = vpop.f32.mrf.mxu0 }
 0x2b2   : > { %v998_v12 = vmul.f32 0.35355338, %v995_v11  ;;  %v1213_v11 = vld [vmem:[%s1983_s8 + $0x10] sm:$0xff] }
 0x2b4   : > { %v999_v13 = vsel %vm813_vm1, %v998_v12, -inf }
 0x2b5   : > { %1000 = vmax.xlane.f32.xlu0 %v999_v13  ;;  %v1211_v13 = vld [vmem:[%s1983_s8] sm:$0xff] }
 0x2c9   : > { %1102 = vrot.lane.b32.xlu0 %v1812_v14, %s1640_s28  ;;  %s739_s28 = scalar_lea.vmem %s1993_s18, %s1550_s23  ;;  %s747_s23 = scalar_lea.vmem %s1996_s21, %s1788_s29 }
 0x328   : > { %v1001_v17 = vpop.xlane.xlu0 %1000 }
 0x329   : > { %v1002_v19 = vsub.f32 %v998_v12, %v1001_v17  ;;  %v1212_v12 = vld [vmem:[%s1983_s8 + $0x8] sm:$0xff] }
 0x32b   : > { %v1003_v20 = vmul.f32 1.442695, %v1002_v19 }
 0x32d   : > { %1611 = vpow2.f32 %v1003_v20 }
 0x333   : > { %v1612_v24 = vpop.eup %1611  ;;  %v967_v26 = vpop.f32.mrf.mxu2 }
 0x334   : > { %1129 = vrot.lane.b32.xlu0 %v967_v26, %s1641_s0  ;;  %v1005_v27 = vsel %vm813_vm1, %v1612_v24, 0.0 }
 0x335   : > { %1006 = vadd.xlane.f32.xlu2 %v1005_v27 }
 0x33b   : > { %v1103_v31 = vpop.permute.xlu0 %1102 }
 0x33c   : > { %1123 = vmatpush.msra.mxu2 %v1103_v31  ;;  %v1255_v31 = vld [vmem:[%s1985_s10 + $0x38] sm:$0xff] }
 0x33d   : > { %1566 = vmatmul.msk.f32.vlgmr.msra.gmra.mxu2 %vm813_vm1, %v1101_v32  ;;  %1272 = vmatpush.msra.mxu3 %v1255_v31  ;;  %v1254_v32 = vld [vmem:[%s1985_s10 + $0x30] sm:$0xff] }
 0x33f   : > { %1273 = vmatpush.msra.mxu3 %v1254_v32 }
 0x34d   : > { %1023 = vrot.lane.b32.xlu2 %v1812_v14, %s1642_s4  ;;  %s735_s4 = scalar_lea.vmem %s1992_s17, %s1788_s29 }
 0x3a6   : > { %v1130_v51 = vpop.permute.xlu0 %1129 }
 0x3a7   : > { %v1140_v52 = vsel %vm813_vm1, %v1838_v6, %v1130_v51 }
 0x3a8   : > { %v1007_v33 = vpop.xlane.xlu2 %1006 }
 0x3a9   : > { %1613 = vrcp.f32 %v1007_v33  ;;  %v1019_v38 = vand.u32 2147483648, %v1007_v33  ;;  %v1017_v40 = vand.u32 2147483647, %v1007_v33  ;;  %vm1013_vm15 = vweird.f32 %v1007_v33 }
 0x3aa   : > { %1615 = vrcp.f32 %v1645_v62 }
 0x3ab   : > { %v1020_v42 = vor.u32 1.1754944e-38, %v1019_v38  ;;  %vm1018_vm3 = vcmp.eq.f32.partialorder %v1017_v40, 8.507059e+37  ;;  %v1248_v38 = vld [vmem:[%s1985_s10] sm:$0xff] }
 0x3af   : > { %v1614_v34 = vpop.eup %1613 }
 0x3b0   : > { %v1009_v35 = vmul.f32 %v1614_v34, %v1007_v33  ;;  %v1024_v36 = vpop.permute.xlu2 %1023  ;;  %vm1014_vm14 = vweird.f32 %v1614_v34  ;;  %v1616_v63 = vpop.eup %1615  ;;  %v1253_v33 = vld [vmem:[%s1985_s10 + $0x28] sm:$0xff] }
 0x3b1   : > { %1044 = vmatpush.msrb.mxu1 %v1024_v36  ;;  %vm1015_vm2 = vmor %vm1013_vm15, %vm1014_vm14  ;;  %v1182_v0 = vmul.f32 32.0, %v1616_v63  ;;  %1274 = vmatpush.msra.mxu3 %v1253_v33  ;;  %v1250_v36 = vld [vmem:[%s1985_s10 + $0x10] sm:$0xff] }
 0x3b2   : > { %v1010_v37 = vsub.f32 1.0, %v1009_v35  ;;  %v1251_v35 = vld [vmem:[%s1985_s10 + $0x18] sm:$0xff] }
 0x3b3   : > { %v1183_v1 = vsub.f32 1.0, %v1182_v0  ;;  %1234 = vmatpush.msra.mxu1 %v1214_v10 }
 0x3b4   : > { %v1011_v39 = vmul.f32 %v1614_v34, %v1010_v37  ;;  %v1249_v37 = vld [vmem:[%s1985_s10 + $0x8] sm:$0xff] }
 0x3b5   : > { %v1184_v2 = vmul.f32 %v1616_v63, %v1183_v1  ;;  %1235 = vmatpush.msra.mxu1 %v1213_v11 }
 0x3b6   : > { %v1012_v41 = vadd.f32 %v1614_v34, %v1011_v39  ;;  %v1596_v39 = vld [vmem:[%s1984_s9] ss:$0 sm:$0xff] }
 0x3b7   : > { %v1185_v3 = vadd.f32 %v1616_v63, %v1184_v2  ;;  %1236 = vmatpush.msra.mxu1 %v1212_v12 }
 0x3b8   : > { %v1016_v43 = vsel %vm1015_vm2, %v1614_v34, %v1012_v41  ;;  %v1252_v34 = vld [vmem:[%s1985_s10 + $0x20] sm:$0xff] }
 0x3b9   : > { %v1021_v44 = vsel %vm1018_vm3, %v1020_v42, %v1016_v43  ;;  %1237 = vmatpush.msra.mxu1 %v1211_v13  ;;  %1275 = vmatpush.msra.mxu3 %v1252_v34 }
 0x3ba   : > { %v1022_v45 = vmul.f32 %v1612_v24, %v1021_v44 }
 0x3bb   : > { %1276 = vmatpush.msra.mxu3 %v1251_v35 }
 0x3bc   : > { %1563 = vmatmul.msk.f32.vlgmr.msrb.gmra.mxu1 %vm813_vm1, %v1022_v45  ;;  %vm1186_vm1 = vweird.f32 %v1616_v63 }
 0x3bd   : > { %v1868_v4 = vsel %vm1186_vm1, %v1616_v63, %v1185_v3  ;;  %1277 = vmatpush.msra.mxu3 %v1250_v36 }
 0x3bf   : > { %1278 = vmatpush.msra.mxu3 %v1249_v37 }
 0x3c0   : > { %v1125_v14 = vpop.f32.mrf.mxu2 }
 0x3c1   : > { %1137 = vrot.lane.b32.xlu2 %v1125_v14, %s1643_s5  ;;  %1279 = vmatpush.msra.mxu3 %v1248_v38  ;;  %v1363_v38 = vld [vmem:[%s727_s22] sm:$0xff] }
 0x41b   : > { %v1138_v54 = vpop.permute.xlu2 %1137 }
 0x439   : > { %v1046_v49 = vpop.f32.mrf.mxu1 }
 0x43a   : > { %1133 = vrot.lane.b32.xlu1 %v1046_v49, %s1644_s27 }
 0x4ac   : > { %v1134_v53 = vpop.permute.xlu1 %1133 }
 0x4ad   : > { %v1142_v55 = vsel %vm1141_vm4, %v1140_v52, %v1134_v53 }
 0x4ae   : > { %v1144_v56 = vsel %vm1143_vm5, %v1142_v55, %v1138_v54 }
 0x4af   : > { %1567 = vmatmul.msk.f32.vlgmr.msrb.gmra.mxu0 %vm758_vm0, %v1144_v56  ;;  %v1314_v56 = vld [vmem:[%s1988_s13 + $0x18] sm:$0xff] }
 0x4b0   : > { %1334 = vmatpush.msrb.mxu2 %v1314_v56 }
 0x52c   : > { %v1173_v58 = vpop.f32.mrf.mxu0 }
 0x52d   : > { %v1174_v59 = vadd.f32 %v1595_v57, %v1173_v58  ;;  %v1313_v57 = vld [vmem:[%s1988_s13 + $0x10] sm:$0xff]  ;;  %v1312_v58 = vld [vmem:[%s1988_s13 + $0x8] sm:$0xff] }
 0x52e   : > { %1335 = vmatpush.msrb.mxu2 %v1313_v57 }
 0x52f   : > { %v1177_v60 = vadd.f32 %v1174_v59, %v1801_v9  ;;  %v1311_v59 = vld [vmem:[%s1988_s13] sm:$0xff] }
 0x530   : > { %1336 = vmatpush.msrb.mxu2 %v1312_v58 }
 0x531   : > { %v1178_v61 = vsel %vm758_vm0, %v1177_v60, 0.0 }
 0x532   : > { %1179 = vadd.xlane.f32.xlu0 %v1178_v61  ;;  %1337 = vmatpush.msrb.mxu2 %v1311_v59 }
 0x5a5   : > { %v1180_v5 = vpop.xlane.xlu0 %1179 }
 0x5a6   : > { %v1188_v6 = vmul.f32 %v1868_v4, %v1180_v5 }
 0x5a8   : > { %v1189_v7 = vsub.f32 %v1177_v60, %v1188_v6  ;;  %v1307_v6 = vperm.slane %v1888_v22, 2 }
 0x5aa   : > { %v1190_v8 = vmul.f32 %v1189_v7, %v1189_v7 }
 0x5ac   : > { %v1191_v9 = vsel %vm758_vm0, %v1190_v8, 0.0 }
 0x5ad   : > { %1192 = vadd.xlane.f32.xlu1 %v1191_v9  ;;  %v1309_v9 = vperm.slane %v1888_v22, 3 }
 0x620   : > { %v1193_v15 = vpop.xlane.xlu1 %1192 }
 0x621   : > { %v1194_v16 = vmul.f32 %v1193_v15, %v1868_v4 }
 0x623   : > { %v1195_v17 = vadd.f32 1e-05, %v1194_v16 }
 0x625   : > { %1617 = vrsqrt.f32 %v1195_v17  ;;  %vm1202_vm7 = vweird.f32 %v1195_v17 }
 0x62b   : > { %v1618_v18 = vpop.eup %1617 }
 0x62c   : > { %v1197_v19 = vmul.f32 %v1618_v18, %v1195_v17  ;;  %vm1203_vm6 = vweird.f32 %v1618_v18 }
 0x62d   : > { %vm1204_vm8 = vmor %vm1202_vm7, %vm1203_vm6  ;;  %vm1389_vm6 = vcmask 31744  }
 0x62e   : > { %v1198_v20 = vmul.f32 %v1618_v18, %v1197_v19 }
 0x630   : > { %v1199_v21 = vmul.f32 0.5, %v1198_v20 }
 0x632   : > { %v1200_v23 = vsub.f32 1.5, %v1199_v21 }
 0x634   : > { %v1201_v24 = vmul.f32 %v1618_v18, %v1200_v23 }
 0x636   : > { %v1205_v26 = vsel %vm1204_vm8, %v1618_v18, %v1201_v24 }
 0x637   : > { %v1206_v27 = vmul.f32 %v1205_v26, %v1189_v7  ;;  %v1598_v26 = vld [vmem:[%s1989_s14] ss:$0 sm:$0xff] }
 0x639   : > { %v1208_v29 = vmul.f32 %v1207_v25, %v1206_v27 }
 0x63b   : > { %v1210_v30 = vadd.f32 %v1209_v28, %v1208_v29 }
 0x63d   : > { %1568 = vmatmul.msk.f32.vlgmr.msra.gmra.mxu1 %vm758_vm0, %v1210_v30 }
 0x6ba   : > { %v1239_v40 = vpop.f32.mrf.mxu1 }
 0x6bb   : > { %v1240_v41 = vadd.f32 %v1596_v39, %v1239_v40  ;;  %v1365_v40 = vld [vmem:[%s731_s24] sm:$0xff]  ;;  %s743_s24 = scalar_lea.vmem %s1995_s20, %s1788_s29 }
 0x6bd   : > { %v1243_v42 = vmin.f32 %v1240_v41, 0.0  ;;  %vm1242_vm10 = vcmp.gt.f32.partialorder %v1240_v41, 0.0 }
 0x6bf   : > { %v1244_v43 = vmul.f32 1.442695, %v1243_v42 }
 0x6c1   : > { %1619 = vpow2.f32 %v1244_v43 }
 0x6c7   : > { %v1620_v44 = vpop.eup %1619 }
 0x6c8   : > { %v1569_v45 = vadd.f32 -1.0, %v1620_v44 }
 0x6ca   : > { %v1247_v14 = vsel %vm1242_vm10, %v1240_v41, %v1569_v45  ;;  %v1343_v45 = vld [vmem:[%s739_s28] sm:$0x3] }
 0x6cb   : > { %1570 = vmatmul.msk.f32.vlgmr.msra.gmra.mxu3 %vm1260_vm9, %v1247_v14 }
 0x74e   : > { %v1281_v47 = vpop.f32.mrf.mxu3 }
 0x74f   : > { %v1282_v48 = vadd.f32 %v1597_v46, %v1281_v47 }
 0x751   : > { %v1284_v49 = vadd.f32 %v1282_v48, %v1210_v30  ;;  %v1385_v48 = vperm.slane %v1343_v45, 1 }
 0x753   : > { %v1285_v50 = vsel %vm758_vm0, %v1284_v49, 0.0 }
 0x754   : > { %1286 = vadd.xlane.f32.xlu2 %v1285_v50  ;;  %v1391_v50 = vld [vmem:[%s735_s4] sm:$0xff] }
 0x7c7   : > { %v1287_v51 = vpop.xlane.xlu2 %1286 }
 0x7c8   : > { %v1288_v52 = vmul.f32 %v1287_v51, %v1868_v4 }
 0x7ca   : > { %v1289_v53 = vsub.f32 %v1284_v49, %v1288_v52  ;;  %v1387_v52 = vperm.slane %v1343_v45, 0 }
 0x7cc   : > { %v1290_v54 = vmul.f32 %v1289_v53, %v1289_v53 }
 0x7ce   : > { %v1291_v55 = vsel %vm758_vm0, %v1290_v54, 0.0 }
 0x7cf   : > { %1292 = vadd.xlane.f32.xlu0 %v1291_v55 }
 0x842   : > { %v1293_v60 = vpop.xlane.xlu0 %1292 }
 0x843   : > { %v1294_v61 = vmul.f32 %v1293_v60, %v1868_v4  ;;  %v1342_v4 = vld [vmem:[%s1994_s19] sm:$0x1f] }
 0x844   : > { %v1346_v12 = vadd.f32 1e-10, %v1342_v4  ;;  %v1344_v28 = vperm.slane %v1342_v4, 1  ;;  %v1367_v43 = vperm.slane %v1342_v4, 3  ;;  %v1392_v49 = vperm.slane %v1342_v4, 4 }
 0x845   : > { %v1295_v62 = vadd.f32 1e-05, %v1294_v61 }
 0x846   : > { %v1347_v13 = vperm.slane %v1346_v12, 0  ;;  %v1369_v15 = vperm.slane %v1346_v12, 2  ;;  %v1393_v54 = vmul.f32 %v1392_v49, %v1391_v50 }
 0x847   : > { %1621 = vrsqrt.f32 %v1295_v62  ;;  %vm1302_vm12 = vweird.f32 %v1295_v62 }
 0x848   : > { %1623 = vrcp.f32 %v1347_v13  ;;  %vm1353_vm14 = vweird.f32 %v1347_v13  ;;  %v1359_v22 = vand.u32 2147483648, %v1347_v13  ;;  %v1357_v24 = vand.u32 2147483647, %v1347_v13 }
 0x849   : > { %1625 = vrcp.f32 %v1369_v15  ;;  %vm1375_vm3 = vweird.f32 %v1369_v15  ;;  %v1381_v34 = vand.u32 2147483648, %v1369_v15  ;;  %v1379_v37 = vand.u32 2147483647, %v1369_v15 }
 0x84a   : > { %v1360_v27 = vor.u32 1.1754944e-38, %v1359_v22  ;;  %vm1358_vm2 = vcmp.eq.f32.partialorder %v1357_v24, 8.507059e+37 }
 0x84b   : > { %v1382_v41 = vor.u32 1.1754944e-38, %v1381_v34  ;;  %vm1380_vm1 = vcmp.eq.f32.partialorder %v1379_v37, 8.507059e+37 }
 0x84d   : > { %v1622_v63 = vpop.eup %1621 }
 0x84e   : > { %v1297_v0 = vmul.f32 %v1622_v63, %v1295_v62  ;;  %vm1303_vm11 = vweird.f32 %v1622_v63  ;;  %v1624_v16 = vpop.eup %1623 }
 0x84f   : > { %vm1304_vm13 = vmor %vm1302_vm12, %vm1303_vm11  ;;  %v1349_v17 = vmul.f32 %v1624_v16, %v1347_v13  ;;  %v1626_v19 = vpop.eup %1625  ;;  %vm1354_vm15 = vweird.f32 %v1624_v16 }
 0x850   : > { %v1298_v1 = vmul.f32 %v1622_v63, %v1297_v0  ;;  %v1371_v21 = vmul.f32 %v1626_v19, %v1369_v15  ;;  %vm1376_vm4 = vweird.f32 %v1626_v19 }
 0x851   : > { %v1350_v18 = vsub.f32 1.0, %v1349_v17  ;;  %vm1377_vm5 = vmor %vm1375_vm3, %vm1376_vm4 }
 0x852   : > { %v1299_v2 = vmul.f32 0.5, %v1298_v1  ;;  %v1372_v25 = vsub.f32 1.0, %v1371_v21 }
 0x853   : > { %v1351_v20 = vmul.f32 %v1624_v16, %v1350_v18 }
 0x854   : > { %v1300_v3 = vsub.f32 1.5, %v1299_v2  ;;  %v1373_v30 = vmul.f32 %v1626_v19, %v1372_v25 }
 0x855   : > { %v1352_v23 = vadd.f32 %v1624_v16, %v1351_v20 }
 0x856   : > { %v1301_v5 = vmul.f32 %v1622_v63, %v1300_v3  ;;  %v1374_v36 = vadd.f32 %v1626_v19, %v1373_v30 }
 0x858   : > { %v1305_v7 = vsel %vm1304_vm13, %v1622_v63, %v1301_v5  ;;  %v1378_v44 = vsel %vm1377_vm5, %v1626_v19, %v1374_v36 }
 0x859   : > { %v1306_v8 = vmul.f32 %v1305_v7, %v1289_v53  ;;  %v1383_v46 = vsel %vm1380_vm1, %v1382_v41, %v1378_v44 }
 0x85b   : > { %v1308_v10 = vmul.f32 %v1307_v6, %v1306_v8 }
 0x85d   : > { %v1310_v11 = vadd.f32 %v1309_v9, %v1308_v10 }
 0x85f   : > { %1571 = vmatmul.msk.f32.vlgmr.msrb.gmra.mxu2 %vm758_vm0, %v1310_v11  ;;  %vm1355_vm0 = vmor %vm1353_vm14, %vm1354_vm15 }
 0x860   : > { %v1356_v29 = vsel %vm1355_vm0, %v1624_v16, %v1352_v23 }
 0x861   : > { %v1361_v33 = vsel %vm1358_vm2, %v1360_v27, %v1356_v29 }
 0x8e2   : > { %v1339_v31 = vpop.f32.mrf.mxu2 }
 0x8e3   : > { %v1340_v32 = vadd.f32 %v1598_v26, %v1339_v31 }
 0x8e5   : > { %v1345_v35 = vsub.f32 %v1340_v32, %v1344_v28 }
 0x8e7   : > { %v1362_v39 = vmul.f32 %v1361_v33, %v1345_v35 }
 0x8e9   : > { %v1364_v42 = vmul.f32 %v1363_v38, %v1362_v39 }
 0x8eb   : > { %v1366_v14 = vadd.f32 %v1365_v40, %v1364_v42 }
 0x8ed   : > { %v1368_v47 = vsub.f32 %v1366_v14, %v1367_v43 }
 0x8ef   : > { %v1384_v51 = vmul.f32 %v1383_v46, %v1368_v47 }
 0x8f1   : > { %v1386_v53 = vmul.f32 %v1385_v48, %v1384_v51 }
 0x8f3   : > { %v1388_v55 = vadd.f32 %v1387_v52, %v1386_v53 }
 0x8f5   : > { %1390 = vst.msk [vmem:[%s747_s23] sm:$0xff] %vm1389_vm6, %v1388_v55  ;;  %v1394_v56 = vadd.f32 %v1393_v54, %v1388_v55 }
 0x8f7   : > { %1395 = vst.msk [vmem:[%s743_s24] sm:$0xff] %vm1389_vm6, %v1394_v56 }
 0x8f8 PF: > { %s2013_s26 = sld [smem:[#allocation2_spill]] }
 0x8fe   : > { %s32_s2 = sadd.s32 1, %s2013_s26  }
 0x8ff   : > { %p29_p4 = scmp.ge.s32.totalorder %s32_s2, 4  }
 0x901   :  { %31 = sbr.rel (!%p29_p4) target bundleno = 7 (0x7), region = 157 }

</bundles_post_ra>
